<compile_context>
chip_gen: v5e
topology: v5e:2x2
jax: 0.10.0
libtpu: 0.0.40
codegen_flags: <defaults>
</compile_context>

<pallas_src>
import jax
import jax.numpy as jnp
from jax.experimental import pallas as pl
from jax.experimental.pallas import tpu as pltpu


# -----------------------------------------------------------------------------
# Fused path (stride >= kernel): one kernel writes the final NCHW output.
# -----------------------------------------------------------------------------
def _make_fused_kernel(NB, TH, S, K, Cout, W_out):
    def kernel(x_ref, w_ref, e_ref, b_ref, o_ref):
        # x_ref: [NB, Cin, TH, W]        input rows for this grid step
        # w_ref: [K*K*Cout, Cin]         rows ordered (kh, kw, cout), resident
        # e_ref: [K, W, W_out]           0/1 lane-scatter matrices, resident
        # b_ref: [Cout, 1]               bias column, resident
        # o_ref: [NB, Cout, TH*S, W_out] final NCHW output rows for this step
        w = w_ref[...]
        bias = b_ref[...].astype(jnp.float32)                    # [Cout, 1]
        e = [e_ref[b] for b in range(K)]                         # K x [W, W_out]
        if S > K:
            gap_row = jnp.broadcast_to(bias, (Cout, W_out)).astype(o_ref.dtype)
        for i in range(NB):
            for h in range(TH):
                xrow = x_ref[i, :, h, :]                          # [Cin, W]
                # all (kh, kw, cout) contributions of this input row (MXU)
                y = jnp.dot(w, xrow,
                            preferred_element_type=jnp.float32)   # [K*K*Cout, W]
                for a in range(K):                                # output row h*S + a
                    acc = None
                    for b in range(K):                            # W interleave on MXU
                        r0 = (a * K + b) * Cout
                        part = jnp.dot(y[r0:r0 + Cout, :], e[b],
                                       preferred_element_type=jnp.float32)
                        acc = part if acc is None else acc + part
                    o_ref[i, :, h * S + a, :] = (acc + bias).astype(o_ref.dtype)
                for a in range(K, S):                             # zero-gap rows (S > K)
                    o_ref[i, :, h * S + a, :] = gap_row
    return kernel


def _pick_rows(H, S, Cout, W_out):
    """Input-image rows handled per grid step (TH)."""
    budget = 16 * 1024 * 1024        # double-buffered output block budget (bytes)
    unroll_cap = 16                  # rows unrolled per step (compile-time bound)
    best = None
    th = 8
    while th <= min(H, unroll_cap):
        if H % th == 0 and 2 * th * S * W_out * Cout * 4 <= budget:
            best = th
        th += 8
    return best if best is not None else H   # TH == H is always block-legal


def _pick_batch(N, H, TH, K):
    """Images per grid step (NB); keep >= 2 total grid steps when possible."""
    nb = 1
    for cand in range(2, N + 1):
        if N % cand != 0:
            continue
        if cand * TH * (K * K + 1) > 128:      # unrolled-dot budget
            break
        if (N // cand) * (H // TH) < 2:        # keep both v7x TensorCores busy
            break
        nb = cand
    return nb


def _fused_conv_transpose(x, weight, bias, S):
    N, Cin, H, W = x.shape
    _, Cout, K, _ = weight.shape
    H_out = (H - 1) * S + K
    W_out = (W - 1) * S + K
    KKC = K * K * Cout

    TH = _pick_rows(H, S, Cout, W_out)
    NB = _pick_batch(N, H, TH, K)
    RB = TH * S
    grid = (N // NB, H // TH)

    # weight rows ordered (kh, kw, cout) so per-(kh, kw) slices are contiguous
    w2 = jnp.transpose(weight, (2, 3, 1, 0)).reshape(KKC, Cin)
    # 0/1 scatter matrices: E[b][w, w*S + b] = 1  (W-axis depth-to-space on MXU)
    wi = jnp.arange(W)
    e = jnp.zeros((K, W, W_out), jnp.float32)
    for b in range(K):
        e = e.at[b, wi, wi * S + b].set(1.0)
    b2 = bias.reshape(Cout, 1)

    kernel = _make_fused_kernel(NB, TH, S, K, Cout, W_out)
    canvas = pl.pallas_call(
        kernel,
        out_shape=jax.ShapeDtypeStruct((N, Cout, H * S, W_out), x.dtype),
        grid=grid,
        in_specs=[
            pl.BlockSpec((NB, Cin, TH, W), lambda nb, hb: (nb, 0, hb, 0)),
            pl.BlockSpec((KKC, Cin), lambda nb, hb: (0, 0)),
            pl.BlockSpec((K, W, W_out), lambda nb, hb: (0, 0, 0)),
            pl.BlockSpec((Cout, 1), lambda nb, hb: (0, 0)),
        ],
        out_specs=pl.BlockSpec((NB, Cout, RB, W_out), lambda nb, hb: (nb, 0, hb, 0)),
        compiler_params=pltpu.CompilerParams(
            dimension_semantics=("parallel", "parallel")),
    )(x, w2, e, b2)
    # S > K: the canvas has (S - K) trailing rows past the true output extent.
    return canvas if S == K else canvas[:, :, :H_out, :]


# -----------------------------------------------------------------------------
# Overlap fallback (stride < kernel): per-(kh,kw) contributions from a
# lane-dense matmul kernel, overlap-added in XLA.  Not used by this module
# (Upsample has stride == kernel).
# TODO(synk): fold the overlap-add into a tiled Pallas accumulator kernel if
# this path ever becomes hot.
# -----------------------------------------------------------------------------
def _contrib_matmul_kernel(w_ref, x_ref, o_ref):
    o_ref[...] = jnp.dot(w_ref[...], x_ref[...],
                         preferred_element_type=jnp.float32).astype(o_ref.dtype)


def _overlap_conv_transpose(x, weight, bias, S):
    N, Cin, H, W = x.shape
    _, Cout, K, _ = weight.shape
    HW = H * W
    KKC = Cout * K * K
    H_out = (H - 1) * S + K
    W_out = (W - 1) * S + K

    # keep the spatial tile lane-dense: pad H*W up to a multiple of 128
    HWp = ((HW + 127) // 128) * 128
    x_flat = x.reshape(N, Cin, HW)
    if HWp != HW:
        x_flat = jnp.pad(x_flat, ((0, 0), (0, 0), (0, HWp - HW)))

    budget = 16 * 1024 * 1024
    cap = max(128, (budget // (8 * (KKC + Cin))) // 128 * 128)
    TM, t = 128, 128
    while t <= min(HWp, cap):
        if HWp % t == 0:
            TM = t
        t += 128

    w_t = jnp.transpose(weight, (1, 2, 3, 0)).reshape(KKC, Cin)
    y_t = pl.pallas_call(
        _contrib_matmul_kernel,
        out_shape=jax.ShapeDtypeStruct((N, KKC, HWp), x.dtype),
        grid=(N, HWp // TM),
        in_specs=[
            pl.BlockSpec((KKC, Cin), lambda n, m: (0, 0)),
            pl.BlockSpec((None, Cin, TM), lambda n, m: (n, 0, m)),
        ],
        out_specs=pl.BlockSpec((None, KKC, TM), lambda n, m: (n, 0, m)),
        compiler_params=pltpu.CompilerParams(
            dimension_semantics=("parallel", "parallel")),
    )(w_t, x_flat)

    y6 = y_t[:, :, :HW].reshape(N, Cout, K, K, H, W)
    acc = jnp.zeros((N, Cout, H_out, W_out), jnp.float32)
    for kh in range(K):
        for kw in range(K):
            acc = acc.at[:, :, kh:kh + (H - 1) * S + 1:S,
                         kw:kw + (W - 1) * S + 1:S].add(
                             y6[:, :, kh, kw].astype(jnp.float32))
    return (acc + bias.reshape(1, Cout, 1, 1)).astype(x.dtype)


def upsample_conv_transpose2d(x, weight, bias, stride):
    """nn.ConvTranspose2d(Cin, Cout, kernel_size=K, stride=stride)(x), NCHW in/out."""
    S = int(stride)
    K = weight.shape[2]
    if S >= K:
        return _fused_conv_transpose(x, weight, bias, S)
    return _overlap_conv_transpose(x, weight, bias, S)


# -----------------------------------------------------------------------------
# Pure-JAX reference (torch ConvTranspose2d, no padding, given stride)
# -----------------------------------------------------------------------------
def _reference(x_nchw, weight, bias, stride):
    N, Cin, H, W = x_nchw.shape
    _, Cout, K, _ = weight.shape
    S = int(stride)
    x_nhwc = jnp.transpose(x_nchw, (0, 2, 3, 1))
    contrib = jnp.einsum('nhwi,iokl->nhwklo', x_nhwc, weight)   # [N,H,W,K,K,Cout]
    H_out = (H - 1) * S + K
    W_out = (W - 1) * S + K
    out = jnp.zeros((N, H_out, W_out, Cout), jnp.float32)
    for kh in range(K):
        for kw in range(K):
            out = out.at[:, kh:kh + (H - 1) * S + 1:S,
                         kw:kw + (W - 1) * S + 1:S, :].add(contrib[:, :, :, kh, kw, :])
    out = out + bias.reshape(1, 1, 1, Cout)
    return jnp.transpose(out, (0, 3, 1, 2)).astype(x_nchw.dtype)


if __name__ == "__main__":
    # Module instantiation: Upsample(input_dim=4, output_dim=8, kernel=2, stride=2)
    N, Cin, H, W = 2, 4, 16, 16
    Cout, K, S = 8, 2, 2

    key = jax.random.PRNGKey(0)
    kx, kw, kb = jax.random.split(key, 3)

    x = jax.random.normal(kx, (N, Cin, H, W), dtype=jnp.float32)
    # deterministic init mimicking torch's uniform(-sqrt(k), sqrt(k)), k = 1/(Cout*K*K)
    bound = (1.0 / (Cout * K * K)) ** 0.5
    weight = jax.random.uniform(kw, (Cin, Cout, K, K), minval=-bound, maxval=bound,
                                dtype=jnp.float32)
    bias = jax.random.uniform(kb, (Cout,), minval=-bound, maxval=bound, dtype=jnp.float32)

    out = jax.block_until_ready(upsample_conv_transpose2d(x, weight, bias, S))
    ref = jax.block_until_ready(_reference(x, weight, bias, S))

    assert out.shape == (N, Cout, (H - 1) * S + K, (W - 1) * S + K), out.shape
    assert jnp.allclose(out, ref, atol=1e-5, rtol=1e-5), float(jnp.max(jnp.abs(out - ref)))

    print("KERNEL_OK")
</pallas_src>

<mosaic_0001>
module attributes {stable_mosaic.version = 11 : i64} {
  func.func @kernel(%arg0: i32, %arg1: i32, %arg2: memref<1x4x16x16xf32, #tpu.memory_space<vmem>>, %arg3: memref<32x4xf32, #tpu.memory_space<vmem>>, %arg4: memref<2x16x32xf32, #tpu.memory_space<vmem>>, %arg5: memref<8x1xf32, #tpu.memory_space<vmem>>, %arg6: memref<1x8x32x32xf32, #tpu.memory_space<vmem>>) attributes {dimension_semantics = [#tpu.dimension_semantics<parallel>, #tpu.dimension_semantics<parallel>], iteration_bounds = array<i64: 2, 1>, scalar_prefetch = 0 : i64, scratch_operands = 0 : i64, tpu.core_type = #tpu.core_type<tc>, window_params = [{transform_indices = @transform_0, window_bounds = array<i64: 1, 4, 16, 16>}, {pipeline_mode = #tpu.pipeline_mode<synchronous>, transform_indices = @transform_1, window_bounds = array<i64: 32, 4>}, {pipeline_mode = #tpu.pipeline_mode<synchronous>, transform_indices = @transform_2, window_bounds = array<i64: 2, 16, 32>}, {pipeline_mode = #tpu.pipeline_mode<synchronous>, transform_indices = @transform_3, window_bounds = array<i64: 8, 1>}, {transform_indices = @transform_4, window_bounds = array<i64: 1, 8, 32, 32>}]} {
    %c0 = arith.constant 0 : index
    %c0_0 = arith.constant 0 : index
    %0 = vector.load %arg3[%c0, %c0_0] : memref<32x4xf32, #tpu.memory_space<vmem>>, vector<32x4xf32>
    %c0_1 = arith.constant 0 : index
    %c0_2 = arith.constant 0 : index
    %1 = vector.load %arg5[%c0_1, %c0_2] : memref<8x1xf32, #tpu.memory_space<vmem>>, vector<8x1xf32>
    %c0_3 = arith.constant 0 : index
    %c0_4 = arith.constant 0 : index
    %c0_5 = arith.constant 0 : index
    %2 = vector.load %arg4[%c0_3, %c0_4, %c0_5] : memref<2x16x32xf32, #tpu.memory_space<vmem>>, vector<1x16x32xf32>
    %3 = vector.shape_cast %2 : vector<1x16x32xf32> to vector<16x32xf32>
    %c1 = arith.constant 1 : index
    %c0_6 = arith.constant 0 : index
    %c0_7 = arith.constant 0 : index
    %4 = vector.load %arg4[%c1, %c0_6, %c0_7] : memref<2x16x32xf32, #tpu.memory_space<vmem>>, vector<1x16x32xf32>
    %5 = vector.shape_cast %4 : vector<1x16x32xf32> to vector<16x32xf32>
    %c0_8 = arith.constant 0 : index
    %c0_9 = arith.constant 0 : index
    %c0_10 = arith.constant 0 : index
    %c0_11 = arith.constant 0 : index
    %6 = vector.load %arg2[%c0_8, %c0_9, %c0_10, %c0_11] : memref<1x4x16x16xf32, #tpu.memory_space<vmem>>, vector<1x4x1x16xf32>
    %7 = vector.shape_cast %6 : vector<1x4x1x16xf32> to vector<4x16xf32>
    %cst = arith.constant dense<0.000000e+00> : vector<32x16xf32>
    %8 = tpu.matmul %0, %7, %cst {dimension_numbers = #tpu.dot_dimension_numbers<[1], [0], [0], [1], [0, 0, 1, 1], [], []>} : vector<32x4xf32>, vector<4x16xf32>, vector<32x16xf32> -> vector<32x16xf32>
    %9 = vector.extract_strided_slice %8 {offsets = [0, 0], sizes = [8, 16], strides = [1, 1]} : vector<32x16xf32> to vector<8x16xf32>
    %cst_12 = arith.constant dense<0.000000e+00> : vector<8x32xf32>
    %10 = tpu.matmul %9, %3, %cst_12 {dimension_numbers = #tpu.dot_dimension_numbers<[1], [0], [0], [1], [0, 0, 1, 1], [], []>} : vector<8x16xf32>, vector<16x32xf32>, vector<8x32xf32> -> vector<8x32xf32>
    %11 = vector.extract_strided_slice %8 {offsets = [8, 0], sizes = [8, 16], strides = [1, 1]} : vector<32x16xf32> to vector<8x16xf32>
    %cst_13 = arith.constant dense<0.000000e+00> : vector<8x32xf32>
    %12 = tpu.matmul %11, %5, %cst_13 {dimension_numbers = #tpu.dot_dimension_numbers<[1], [0], [0], [1], [0, 0, 1, 1], [], []>} : vector<8x16xf32>, vector<16x32xf32>, vector<8x32xf32> -> vector<8x32xf32>
    %13 = arith.addf %10, %12 : vector<8x32xf32>
    %14 = vector.broadcast %1 : vector<8x1xf32> to vector<8x32xf32>
    %15 = arith.addf %13, %14 : vector<8x32xf32>
    %c0_14 = arith.constant 0 : index
    %c0_15 = arith.constant 0 : index
    %c0_16 = arith.constant 0 : index
    %c0_17 = arith.constant 0 : index
    %16 = vector.load %arg6[%c0_14, %c0_15, %c0_16, %c0_17] : memref<1x8x32x32xf32, #tpu.memory_space<vmem>>, vector<1x8x1x32xf32>
    %17 = vector.shape_cast %16 : vector<1x8x1x32xf32> to vector<8x32xf32>
    %18 = vector.shape_cast %15 : vector<8x32xf32> to vector<1x8x1x32xf32>
    tpu.vector_store %arg6[%c0_14, %c0_15, %c0_16, %c0_17], %18 {strides = array<i32>} : memref<1x8x32x32xf32, #tpu.memory_space<vmem>>, vector<1x8x1x32xf32>,
    %19 = vector.extract_strided_slice %8 {offsets = [16, 0], sizes = [8, 16], strides = [1, 1]} : vector<32x16xf32> to vector<8x16xf32>
    %cst_18 = arith.constant dense<0.000000e+00> : vector<8x32xf32>
    %20 = tpu.matmul %19, %3, %cst_18 {dimension_numbers = #tpu.dot_dimension_numbers<[1], [0], [0], [1], [0, 0, 1, 1], [], []>} : vector<8x16xf32>, vector<16x32xf32>, vector<8x32xf32> -> vector<8x32xf32>
    %21 = vector.extract_strided_slice %8 {offsets = [24, 0], sizes = [8, 16], strides = [1, 1]} : vector<32x16xf32> to vector<8x16xf32>
    %cst_19 = arith.constant dense<0.000000e+00> : vector<8x32xf32>
    %22 = tpu.matmul %21, %5, %cst_19 {dimension_numbers = #tpu.dot_dimension_numbers<[1], [0], [0], [1], [0, 0, 1, 1], [], []>} : vector<8x16xf32>, vector<16x32xf32>, vector<8x32xf32> -> vector<8x32xf32>
    %23 = arith.addf %20, %22 : vector<8x32xf32>
    %24 = vector.broadcast %1 : vector<8x1xf32> to vector<8x32xf32>
    %25 = arith.addf %23, %24 : vector<8x32xf32>
    %c0_20 = arith.constant 0 : index
    %c0_21 = arith.constant 0 : index
    %c1_22 = arith.constant 1 : index
    %c0_23 = arith.constant 0 : index
    %26 = vector.load %arg6[%c0_20, %c0_21, %c1_22, %c0_23] : memref<1x8x32x32xf32, #tpu.memory_space<vmem>>, vector<1x8x1x32xf32>
    %27 = vector.shape_cast %26 : vector<1x8x1x32xf32> to vector<8x32xf32>
    %28 = vector.shape_cast %25 : vector<8x32xf32> to vector<1x8x1x32xf32>
    tpu.vector_store %arg6[%c0_20, %c0_21, %c1_22, %c0_23], %28 {strides = array<i32>} : memref<1x8x32x32xf32, #tpu.memory_space<vmem>>, vector<1x8x1x32xf32>,
    %c0_24 = arith.constant 0 : index
    %c0_25 = arith.constant 0 : index
    %c1_26 = arith.constant 1 : index
    %c0_27 = arith.constant 0 : index
    %29 = vector.load %arg2[%c0_24, %c0_25, %c1_26, %c0_27] : memref<1x4x16x16xf32, #tpu.memory_space<vmem>>, vector<1x4x1x16xf32>
    %30 = vector.shape_cast %29 : vector<1x4x1x16xf32> to vector<4x16xf32>
    %cst_28 = arith.constant dense<0.000000e+00> : vector<32x16xf32>
    %31 = tpu.matmul %0, %30, %cst_28 {dimension_numbers = #tpu.dot_dimension_numbers<[1], [0], [0], [1], [0, 0, 1, 1], [], []>} : vector<32x4xf32>, vector<4x16xf32>, vector<32x16xf32> -> vector<32x16xf32>
    %32 = vector.extract_strided_slice %31 {offsets = [0, 0], sizes = [8, 16], strides = [1, 1]} : vector<32x16xf32> to vector<8x16xf32>
    %cst_29 = arith.constant dense<0.000000e+00> : vector<8x32xf32>
    %33 = tpu.matmul %32, %3, %cst_29 {dimension_numbers = #tpu.dot_dimension_numbers<[1], [0], [0], [1], [0, 0, 1, 1], [], []>} : vector<8x16xf32>, vector<16x32xf32>, vector<8x32xf32> -> vector<8x32xf32>
    %34 = vector.extract_strided_slice %31 {offsets = [8, 0], sizes = [8, 16], strides = [1, 1]} : vector<32x16xf32> to vector<8x16xf32>
    %cst_30 = arith.constant dense<0.000000e+00> : vector<8x32xf32>
    %35 = tpu.matmul %34, %5, %cst_30 {dimension_numbers = #tpu.dot_dimension_numbers<[1], [0], [0], [1], [0, 0, 1, 1], [], []>} : vector<8x16xf32>, vector<16x32xf32>, vector<8x32xf32> -> vector<8x32xf32>
    %36 = arith.addf %33, %35 : vector<8x32xf32>
    %37 = vector.broadcast %1 : vector<8x1xf32> to vector<8x32xf32>
    %38 = arith.addf %36, %37 : vector<8x32xf32>
    %c0_31 = arith.constant 0 : index
    %c0_32 = arith.constant 0 : index
    %c2 = arith.constant 2 : index
    %c0_33 = arith.constant 0 : index
    %39 = vector.load %arg6[%c0_31, %c0_32, %c2, %c0_33] : memref<1x8x32x32xf32, #tpu.memory_space<vmem>>, vector<1x8x1x32xf32>
    %40 = vector.shape_cast %39 : vector<1x8x1x32xf32> to vector<8x32xf32>
    %41 = vector.shape_cast %38 : vector<8x32xf32> to vector<1x8x1x32xf32>
    tpu.vector_store %arg6[%c0_31, %c0_32, %c2, %c0_33], %41 {strides = array<i32>} : memref<1x8x32x32xf32, #tpu.memory_space<vmem>>, vector<1x8x1x32xf32>,
    %42 = vector.extract_strided_slice %31 {offsets = [16, 0], sizes = [8, 16], strides = [1, 1]} : vector<32x16xf32> to vector<8x16xf32>
    %cst_34 = arith.constant dense<0.000000e+00> : vector<8x32xf32>
    %43 = tpu.matmul %42, %3, %cst_34 {dimension_numbers = #tpu.dot_dimension_numbers<[1], [0], [0], [1], [0, 0, 1, 1], [], []>} : vector<8x16xf32>, vector<16x32xf32>, vector<8x32xf32> -> vector<8x32xf32>
    %44 = vector.extract_strided_slice %31 {offsets = [24, 0], sizes = [8, 16], strides = [1, 1]} : vector<32x16xf32> to vector<8x16xf32>
    %cst_35 = arith.constant dense<0.000000e+00> : vector<8x32xf32>
    %45 = tpu.matmul %44, %5, %cst_35 {dimension_numbers = #tpu.dot_dimension_numbers<[1], [0], [0], [1], [0, 0, 1, 1], [], []>} : vector<8x16xf32>, vector<16x32xf32>, vector<8x32xf32> -> vector<8x32xf32>
    %46 = arith.addf %43, %45 : vector<8x32xf32>
    %47 = vector.broadcast %1 : vector<8x1xf32> to vector<8x32xf32>
    %48 = arith.addf %46, %47 : vector<8x32xf32>
    %c0_36 = arith.constant 0 : index
    %c0_37 = arith.constant 0 : index
    %c3 = arith.constant 3 : index
    %c0_38 = arith.constant 0 : index
    %49 = vector.load %arg6[%c0_36, %c0_37, %c3, %c0_38] : memref<1x8x32x32xf32, #tpu.memory_space<vmem>>, vector<1x8x1x32xf32>
    %50 = vector.shape_cast %49 : vector<1x8x1x32xf32> to vector<8x32xf32>
    %51 = vector.shape_cast %48 : vector<8x32xf32> to vector<1x8x1x32xf32>
    tpu.vector_store %arg6[%c0_36, %c0_37, %c3, %c0_38], %51 {strides = array<i32>} : memref<1x8x32x32xf32, #tpu.memory_space<vmem>>, vector<1x8x1x32xf32>,
    %c0_39 = arith.constant 0 : index
    %c0_40 = arith.constant 0 : index
    %c2_41 = arith.constant 2 : index
    %c0_42 = arith.constant 0 : index
    %52 = vector.load %arg2[%c0_39, %c0_40, %c2_41, %c0_42] : memref<1x4x16x16xf32, #tpu.memory_space<vmem>>, vector<1x4x1x16xf32>
    %53 = vector.shape_cast %52 : vector<1x4x1x16xf32> to vector<4x16xf32>
    %cst_43 = arith.constant dense<0.000000e+00> : vector<32x16xf32>
    %54 = tpu.matmul %0, %53, %cst_43 {dimension_numbers = #tpu.dot_dimension_numbers<[1], [0], [0], [1], [0, 0, 1, 1], [], []>} : vector<32x4xf32>, vector<4x16xf32>, vector<32x16xf32> -> vector<32x16xf32>
    %55 = vector.extract_strided_slice %54 {offsets = [0, 0], sizes = [8, 16], strides = [1, 1]} : vector<32x16xf32> to vector<8x16xf32>
    %cst_44 = arith.constant dense<0.000000e+00> : vector<8x32xf32>
    %56 = tpu.matmul %55, %3, %cst_44 {dimension_numbers = #tpu.dot_dimension_numbers<[1], [0], [0], [1], [0, 0, 1, 1], [], []>} : vector<8x16xf32>, vector<16x32xf32>, vector<8x32xf32> -> vector<8x32xf32>
    %57 = vector.extract_strided_slice %54 {offsets = [8, 0], sizes = [8, 16], strides = [1, 1]} : vector<32x16xf32> to vector<8x16xf32>
    %cst_45 = arith.constant dense<0.000000e+00> : vector<8x32xf32>
    %58 = tpu.matmul %57, %5, %cst_45 {dimension_numbers = #tpu.dot_dimension_numbers<[1], [0], [0], [1], [0, 0, 1, 1], [], []>} : vector<8x16xf32>, vector<16x32xf32>, vector<8x32xf32> -> vector<8x32xf32>
    %59 = arith.addf %56, %58 : vector<8x32xf32>
    %60 = vector.broadcast %1 : vector<8x1xf32> to vector<8x32xf32>
    %61 = arith.addf %59, %60 : vector<8x32xf32>
    %c0_46 = arith.constant 0 : index
    %c0_47 = arith.constant 0 : index
    %c4 = arith.constant 4 : index
    %c0_48 = arith.constant 0 : index
    %62 = vector.load %arg6[%c0_46, %c0_47, %c4, %c0_48] : memref<1x8x32x32xf32, #tpu.memory_space<vmem>>, vector<1x8x1x32xf32>
    %63 = vector.shape_cast %62 : vector<1x8x1x32xf32> to vector<8x32xf32>
    %64 = vector.shape_cast %61 : vector<8x32xf32> to vector<1x8x1x32xf32>
    tpu.vector_store %arg6[%c0_46, %c0_47, %c4, %c0_48], %64 {strides = array<i32>} : memref<1x8x32x32xf32, #tpu.memory_space<vmem>>, vector<1x8x1x32xf32>,
    %65 = vector.extract_strided_slice %54 {offsets = [16, 0], sizes = [8, 16], strides = [1, 1]} : vector<32x16xf32> to vector<8x16xf32>
    %cst_49 = arith.constant dense<0.000000e+00> : vector<8x32xf32>
    %66 = tpu.matmul %65, %3, %cst_49 {dimension_numbers = #tpu.dot_dimension_numbers<[1], [0], [0], [1], [0, 0, 1, 1], [], []>} : vector<8x16xf32>, vector<16x32xf32>, vector<8x32xf32> -> vector<8x32xf32>
    %67 = vector.extract_strided_slice %54 {offsets = [24, 0], sizes = [8, 16], strides = [1, 1]} : vector<32x16xf32> to vector<8x16xf32>
    %cst_50 = arith.constant dense<0.000000e+00> : vector<8x32xf32>
    %68 = tpu.matmul %67, %5, %cst_50 {dimension_numbers = #tpu.dot_dimension_numbers<[1], [0], [0], [1], [0, 0, 1, 1], [], []>} : vector<8x16xf32>, vector<16x32xf32>, vector<8x32xf32> -> vector<8x32xf32>
    %69 = arith.addf %66, %68 : vector<8x32xf32>
    %70 = vector.broadcast %1 : vector<8x1xf32> to vector<8x32xf32>
    %71 = arith.addf %69, %70 : vector<8x32xf32>
    %c0_51 = arith.constant 0 : index
    %c0_52 = arith.constant 0 : index
    %c5 = arith.constant 5 : index
    %c0_53 = arith.constant 0 : index
    %72 = vector.load %arg6[%c0_51, %c0_52, %c5, %c0_53] : memref<1x8x32x32xf32, #tpu.memory_space<vmem>>, vector<1x8x1x32xf32>
    %73 = vector.shape_cast %72 : vector<1x8x1x32xf32> to vector<8x32xf32>
    %74 = vector.shape_cast %71 : vector<8x32xf32> to vector<1x8x1x32xf32>
    tpu.vector_store %arg6[%c0_51, %c0_52, %c5, %c0_53], %74 {strides = array<i32>} : memref<1x8x32x32xf32, #tpu.memory_space<vmem>>, vector<1x8x1x32xf32>,
    %c0_54 = arith.constant 0 : index
    %c0_55 = arith.constant 0 : index
    %c3_56 = arith.constant 3 : index
    %c0_57 = arith.constant 0 : index
    %75 = vector.load %arg2[%c0_54, %c0_55, %c3_56, %c0_57] : memref<1x4x16x16xf32, #tpu.memory_space<vmem>>, vector<1x4x1x16xf32>
    %76 = vector.shape_cast %75 : vector<1x4x1x16xf32> to vector<4x16xf32>
    %cst_58 = arith.constant dense<0.000000e+00> : vector<32x16xf32>
    %77 = tpu.matmul %0, %76, %cst_58 {dimension_numbers = #tpu.dot_dimension_numbers<[1], [0], [0], [1], [0, 0, 1, 1], [], []>} : vector<32x4xf32>, vector<4x16xf32>, vector<32x16xf32> -> vector<32x16xf32>
    %78 = vector.extract_strided_slice %77 {offsets = [0, 0], sizes = [8, 16], strides = [1, 1]} : vector<32x16xf32> to vector<8x16xf32>
    %cst_59 = arith.constant dense<0.000000e+00> : vector<8x32xf32>
    %79 = tpu.matmul %78, %3, %cst_59 {dimension_numbers = #tpu.dot_dimension_numbers<[1], [0], [0], [1], [0, 0, 1, 1], [], []>} : vector<8x16xf32>, vector<16x32xf32>, vector<8x32xf32> -> vector<8x32xf32>
    %80 = vector.extract_strided_slice %77 {offsets = [8, 0], sizes = [8, 16], strides = [1, 1]} : vector<32x16xf32> to vector<8x16xf32>
    %cst_60 = arith.constant dense<0.000000e+00> : vector<8x32xf32>
    %81 = tpu.matmul %80, %5, %cst_60 {dimension_numbers = #tpu.dot_dimension_numbers<[1], [0], [0], [1], [0, 0, 1, 1], [], []>} : vector<8x16xf32>, vector<16x32xf32>, vector<8x32xf32> -> vector<8x32xf32>
    %82 = arith.addf %79, %81 : vector<8x32xf32>
    %83 = vector.broadcast %1 : vector<8x1xf32> to vector<8x32xf32>
    %84 = arith.addf %82, %83 : vector<8x32xf32>
    %c0_61 = arith.constant 0 : index
    %c0_62 = arith.constant 0 : index
    %c6 = arith.constant 6 : index
    %c0_63 = arith.constant 0 : index
    %85 = vector.load %arg6[%c0_61, %c0_62, %c6, %c0_63] : memref<1x8x32x32xf32, #tpu.memory_space<vmem>>, vector<1x8x1x32xf32>
    %86 = vector.shape_cast %85 : vector<1x8x1x32xf32> to vector<8x32xf32>
    %87 = vector.shape_cast %84 : vector<8x32xf32> to vector<1x8x1x32xf32>
    tpu.vector_store %arg6[%c0_61, %c0_62, %c6, %c0_63], %87 {strides = array<i32>} : memref<1x8x32x32xf32, #tpu.memory_space<vmem>>, vector<1x8x1x32xf32>,
    %88 = vector.extract_strided_slice %77 {offsets = [16, 0], sizes = [8, 16], strides = [1, 1]} : vector<32x16xf32> to vector<8x16xf32>
    %cst_64 = arith.constant dense<0.000000e+00> : vector<8x32xf32>
    %89 = tpu.matmul %88, %3, %cst_64 {dimension_numbers = #tpu.dot_dimension_numbers<[1], [0], [0], [1], [0, 0, 1, 1], [], []>} : vector<8x16xf32>, vector<16x32xf32>, vector<8x32xf32> -> vector<8x32xf32>
    %90 = vector.extract_strided_slice %77 {offsets = [24, 0], sizes = [8, 16], strides = [1, 1]} : vector<32x16xf32> to vector<8x16xf32>
    %cst_65 = arith.constant dense<0.000000e+00> : vector<8x32xf32>
    %91 = tpu.matmul %90, %5, %cst_65 {dimension_numbers = #tpu.dot_dimension_numbers<[1], [0], [0], [1], [0, 0, 1, 1], [], []>} : vector<8x16xf32>, vector<16x32xf32>, vector<8x32xf32> -> vector<8x32xf32>
    %92 = arith.addf %89, %91 : vector<8x32xf32>
    %93 = vector.broadcast %1 : vector<8x1xf32> to vector<8x32xf32>
    %94 = arith.addf %92, %93 : vector<8x32xf32>
    %c0_66 = arith.constant 0 : index
    %c0_67 = arith.constant 0 : index
    %c7 = arith.constant 7 : index
    %c0_68 = arith.constant 0 : index
    %95 = vector.load %arg6[%c0_66, %c0_67, %c7, %c0_68] : memref<1x8x32x32xf32, #tpu.memory_space<vmem>>, vector<1x8x1x32xf32>
    %96 = vector.shape_cast %95 : vector<1x8x1x32xf32> to vector<8x32xf32>
    %97 = vector.shape_cast %94 : vector<8x32xf32> to vector<1x8x1x32xf32>
    tpu.vector_store %arg6[%c0_66, %c0_67, %c7, %c0_68], %97 {strides = array<i32>} : memref<1x8x32x32xf32, #tpu.memory_space<vmem>>, vector<1x8x1x32xf32>,
    %c0_69 = arith.constant 0 : index
    %c0_70 = arith.constant 0 : index
    %c4_71 = arith.constant 4 : index
    %c0_72 = arith.constant 0 : index
    %98 = vector.load %arg2[%c0_69, %c0_70, %c4_71, %c0_72] : memref<1x4x16x16xf32, #tpu.memory_space<vmem>>, vector<1x4x1x16xf32>
    %99 = vector.shape_cast %98 : vector<1x4x1x16xf32> to vector<4x16xf32>
    %cst_73 = arith.constant dense<0.000000e+00> : vector<32x16xf32>
    %100 = tpu.matmul %0, %99, %cst_73 {dimension_numbers = #tpu.dot_dimension_numbers<[1], [0], [0], [1], [0, 0, 1, 1], [], []>} : vector<32x4xf32>, vector<4x16xf32>, vector<32x16xf32> -> vector<32x16xf32>
    %101 = vector.extract_strided_slice %100 {offsets = [0, 0], sizes = [8, 16], strides = [1, 1]} : vector<32x16xf32> to vector<8x16xf32>
    %cst_74 = arith.constant dense<0.000000e+00> : vector<8x32xf32>
    %102 = tpu.matmul %101, %3, %cst_74 {dimension_numbers = #tpu.dot_dimension_numbers<[1], [0], [0], [1], [0, 0, 1, 1], [], []>} : vector<8x16xf32>, vector<16x32xf32>, vector<8x32xf32> -> vector<8x32xf32>
    %103 = vector.extract_strided_slice %100 {offsets = [8, 0], sizes = [8, 16], strides = [1, 1]} : vector<32x16xf32> to vector<8x16xf32>
    %cst_75 = arith.constant dense<0.000000e+00> : vector<8x32xf32>
    %104 = tpu.matmul %103, %5, %cst_75 {dimension_numbers = #tpu.dot_dimension_numbers<[1], [0], [0], [1], [0, 0, 1, 1], [], []>} : vector<8x16xf32>, vector<16x32xf32>, vector<8x32xf32> -> vector<8x32xf32>
    %105 = arith.addf %102, %104 : vector<8x32xf32>
    %106 = vector.broadcast %1 : vector<8x1xf32> to vector<8x32xf32>
    %107 = arith.addf %105, %106 : vector<8x32xf32>
    %c0_76 = arith.constant 0 : index
    %c0_77 = arith.constant 0 : index
    %c8 = arith.constant 8 : index
    %c0_78 = arith.constant 0 : index
    %108 = vector.load %arg6[%c0_76, %c0_77, %c8, %c0_78] : memref<1x8x32x32xf32, #tpu.memory_space<vmem>>, vector<1x8x1x32xf32>
    %109 = vector.shape_cast %108 : vector<1x8x1x32xf32> to vector<8x32xf32>
    %110 = vector.shape_cast %107 : vector<8x32xf32> to vector<1x8x1x32xf32>
    tpu.vector_store %arg6[%c0_76, %c0_77, %c8, %c0_78], %110 {strides = array<i32>} : memref<1x8x32x32xf32, #tpu.memory_space<vmem>>, vector<1x8x1x32xf32>,
    %111 = vector.extract_strided_slice %100 {offsets = [16, 0], sizes = [8, 16], strides = [1, 1]} : vector<32x16xf32> to vector<8x16xf32>
    %cst_79 = arith.constant dense<0.000000e+00> : vector<8x32xf32>
    %112 = tpu.matmul %111, %3, %cst_79 {dimension_numbers = #tpu.dot_dimension_numbers<[1], [0], [0], [1], [0, 0, 1, 1], [], []>} : vector<8x16xf32>, vector<16x32xf32>, vector<8x32xf32> -> vector<8x32xf32>
    %113 = vector.extract_strided_slice %100 {offsets = [24, 0], sizes = [8, 16], strides = [1, 1]} : vector<32x16xf32> to vector<8x16xf32>
    %cst_80 = arith.constant dense<0.000000e+00> : vector<8x32xf32>
    %114 = tpu.matmul %113, %5, %cst_80 {dimension_numbers = #tpu.dot_dimension_numbers<[1], [0], [0], [1], [0, 0, 1, 1], [], []>} : vector<8x16xf32>, vector<16x32xf32>, vector<8x32xf32> -> vector<8x32xf32>
    %115 = arith.addf %112, %114 : vector<8x32xf32>
    %116 = vector.broadcast %1 : vector<8x1xf32> to vector<8x32xf32>
    %117 = arith.addf %115, %116 : vector<8x32xf32>
    %c0_81 = arith.constant 0 : index
    %c0_82 = arith.constant 0 : index
    %c9 = arith.constant 9 : index
    %c0_83 = arith.constant 0 : index
    %118 = vector.load %arg6[%c0_81, %c0_82, %c9, %c0_83] : memref<1x8x32x32xf32, #tpu.memory_space<vmem>>, vector<1x8x1x32xf32>
    %119 = vector.shape_cast %118 : vector<1x8x1x32xf32> to vector<8x32xf32>
    %120 = vector.shape_cast %117 : vector<8x32xf32> to vector<1x8x1x32xf32>
    tpu.vector_store %arg6[%c0_81, %c0_82, %c9, %c0_83], %120 {strides = array<i32>} : memref<1x8x32x32xf32, #tpu.memory_space<vmem>>, vector<1x8x1x32xf32>,
    %c0_84 = arith.constant 0 : index
    %c0_85 = arith.constant 0 : index
    %c5_86 = arith.constant 5 : index
    %c0_87 = arith.constant 0 : index
    %121 = vector.load %arg2[%c0_84, %c0_85, %c5_86, %c0_87] : memref<1x4x16x16xf32, #tpu.memory_space<vmem>>, vector<1x4x1x16xf32>
    %122 = vector.shape_cast %121 : vector<1x4x1x16xf32> to vector<4x16xf32>
    %cst_88 = arith.constant dense<0.000000e+00> : vector<32x16xf32>
    %123 = tpu.matmul %0, %122, %cst_88 {dimension_numbers = #tpu.dot_dimension_numbers<[1], [0], [0], [1], [0, 0, 1, 1], [], []>} : vector<32x4xf32>, vector<4x16xf32>, vector<32x16xf32> -> vector<32x16xf32>
    %124 = vector.extract_strided_slice %123 {offsets = [0, 0], sizes = [8, 16], strides = [1, 1]} : vector<32x16xf32> to vector<8x16xf32>
    %cst_89 = arith.constant dense<0.000000e+00> : vector<8x32xf32>
    %125 = tpu.matmul %124, %3, %cst_89 {dimension_numbers = #tpu.dot_dimension_numbers<[1], [0], [0], [1], [0, 0, 1, 1], [], []>} : vector<8x16xf32>, vector<16x32xf32>, vector<8x32xf32> -> vector<8x32xf32>
    %126 = vector.extract_strided_slice %123 {offsets = [8, 0], sizes = [8, 16], strides = [1, 1]} : vector<32x16xf32> to vector<8x16xf32>
    %cst_90 = arith.constant dense<0.000000e+00> : vector<8x32xf32>
    %127 = tpu.matmul %126, %5, %cst_90 {dimension_numbers = #tpu.dot_dimension_numbers<[1], [0], [0], [1], [0, 0, 1, 1], [], []>} : vector<8x16xf32>, vector<16x32xf32>, vector<8x32xf32> -> vector<8x32xf32>
    %128 = arith.addf %125, %127 : vector<8x32xf32>
    %129 = vector.broadcast %1 : vector<8x1xf32> to vector<8x32xf32>
    %130 = arith.addf %128, %129 : vector<8x32xf32>
    %c0_91 = arith.constant 0 : index
    %c0_92 = arith.constant 0 : index
    %c10 = arith.constant 10 : index
    %c0_93 = arith.constant 0 : index
    %131 = vector.load %arg6[%c0_91, %c0_92, %c10, %c0_93] : memref<1x8x32x32xf32, #tpu.memory_space<vmem>>, vector<1x8x1x32xf32>
    %132 = vector.shape_cast %131 : vector<1x8x1x32xf32> to vector<8x32xf32>
    %133 = vector.shape_cast %130 : vector<8x32xf32> to vector<1x8x1x32xf32>
    tpu.vector_store %arg6[%c0_91, %c0_92, %c10, %c0_93], %133 {strides = array<i32>} : memref<1x8x32x32xf32, #tpu.memory_space<vmem>>, vector<1x8x1x32xf32>,
    %134 = vector.extract_strided_slice %123 {offsets = [16, 0], sizes = [8, 16], strides = [1, 1]} : vector<32x16xf32> to vector<8x16xf32>
    %cst_94 = arith.constant dense<0.000000e+00> : vector<8x32xf32>
    %135 = tpu.matmul %134, %3, %cst_94 {dimension_numbers = #tpu.dot_dimension_numbers<[1], [0], [0], [1], [0, 0, 1, 1], [], []>} : vector<8x16xf32>, vector<16x32xf32>, vector<8x32xf32> -> vector<8x32xf32>
    %136 = vector.extract_strided_slice %123 {offsets = [24, 0], sizes = [8, 16], strides = [1, 1]} : vector<32x16xf32> to vector<8x16xf32>
    %cst_95 = arith.constant dense<0.000000e+00> : vector<8x32xf32>
    %137 = tpu.matmul %136, %5, %cst_95 {dimension_numbers = #tpu.dot_dimension_numbers<[1], [0], [0], [1], [0, 0, 1, 1], [], []>} : vector<8x16xf32>, vector<16x32xf32>, vector<8x32xf32> -> vector<8x32xf32>
    %138 = arith.addf %135, %137 : vector<8x32xf32>
    %139 = vector.broadcast %1 : vector<8x1xf32> to vector<8x32xf32>
    %140 = arith.addf %138, %139 : vector<8x32xf32>
    %c0_96 = arith.constant 0 : index
    %c0_97 = arith.constant 0 : index
    %c11 = arith.constant 11 : index
    %c0_98 = arith.constant 0 : index
    %141 = vector.load %arg6[%c0_96, %c0_97, %c11, %c0_98] : memref<1x8x32x32xf32, #tpu.memory_space<vmem>>, vector<1x8x1x32xf32>
    %142 = vector.shape_cast %141 : vector<1x8x1x32xf32> to vector<8x32xf32>
    %143 = vector.shape_cast %140 : vector<8x32xf32> to vector<1x8x1x32xf32>
    tpu.vector_store %arg6[%c0_96, %c0_97, %c11, %c0_98], %143 {strides = array<i32>} : memref<1x8x32x32xf32, #tpu.memory_space<vmem>>, vector<1x8x1x32xf32>,
    %c0_99 = arith.constant 0 : index
    %c0_100 = arith.constant 0 : index
    %c6_101 = arith.constant 6 : index
    %c0_102 = arith.constant 0 : index
    %144 = vector.load %arg2[%c0_99, %c0_100, %c6_101, %c0_102] : memref<1x4x16x16xf32, #tpu.memory_space<vmem>>, vector<1x4x1x16xf32>
    %145 = vector.shape_cast %144 : vector<1x4x1x16xf32> to vector<4x16xf32>
    %cst_103 = arith.constant dense<0.000000e+00> : vector<32x16xf32>
    %146 = tpu.matmul %0, %145, %cst_103 {dimension_numbers = #tpu.dot_dimension_numbers<[1], [0], [0], [1], [0, 0, 1, 1], [], []>} : vector<32x4xf32>, vector<4x16xf32>, vector<32x16xf32> -> vector<32x16xf32>
    %147 = vector.extract_strided_slice %146 {offsets = [0, 0], sizes = [8, 16], strides = [1, 1]} : vector<32x16xf32> to vector<8x16xf32>
    %cst_104 = arith.constant dense<0.000000e+00> : vector<8x32xf32>
    %148 = tpu.matmul %147, %3, %cst_104 {dimension_numbers = #tpu.dot_dimension_numbers<[1], [0], [0], [1], [0, 0, 1, 1], [], []>} : vector<8x16xf32>, vector<16x32xf32>, vector<8x32xf32> -> vector<8x32xf32>
    %149 = vector.extract_strided_slice %146 {offsets = [8, 0], sizes = [8, 16], strides = [1, 1]} : vector<32x16xf32> to vector<8x16xf32>
    %cst_105 = arith.constant dense<0.000000e+00> : vector<8x32xf32>
    %150 = tpu.matmul %149, %5, %cst_105 {dimension_numbers = #tpu.dot_dimension_numbers<[1], [0], [0], [1], [0, 0, 1, 1], [], []>} : vector<8x16xf32>, vector<16x32xf32>, vector<8x32xf32> -> vector<8x32xf32>
    %151 = arith.addf %148, %150 : vector<8x32xf32>
    %152 = vector.broadcast %1 : vector<8x1xf32> to vector<8x32xf32>
    %153 = arith.addf %151, %152 : vector<8x32xf32>
    %c0_106 = arith.constant 0 : index
    %c0_107 = arith.constant 0 : index
    %c12 = arith.constant 12 : index
    %c0_108 = arith.constant 0 : index
    %154 = vector.load %arg6[%c0_106, %c0_107, %c12, %c0_108] : memref<1x8x32x32xf32, #tpu.memory_space<vmem>>, vector<1x8x1x32xf32>
    %155 = vector.shape_cast %154 : vector<1x8x1x32xf32> to vector<8x32xf32>
    %156 = vector.shape_cast %153 : vector<8x32xf32> to vector<1x8x1x32xf32>
    tpu.vector_store %arg6[%c0_106, %c0_107, %c12, %c0_108], %156 {strides = array<i32>} : memref<1x8x32x32xf32, #tpu.memory_space<vmem>>, vector<1x8x1x32xf32>,
    %157 = vector.extract_strided_slice %146 {offsets = [16, 0], sizes = [8, 16], strides = [1, 1]} : vector<32x16xf32> to vector<8x16xf32>
    %cst_109 = arith.constant dense<0.000000e+00> : vector<8x32xf32>
    %158 = tpu.matmul %157, %3, %cst_109 {dimension_numbers = #tpu.dot_dimension_numbers<[1], [0], [0], [1], [0, 0, 1, 1], [], []>} : vector<8x16xf32>, vector<16x32xf32>, vector<8x32xf32> -> vector<8x32xf32>
    %159 = vector.extract_strided_slice %146 {offsets = [24, 0], sizes = [8, 16], strides = [1, 1]} : vector<32x16xf32> to vector<8x16xf32>
    %cst_110 = arith.constant dense<0.000000e+00> : vector<8x32xf32>
    %160 = tpu.matmul %159, %5, %cst_110 {dimension_numbers = #tpu.dot_dimension_numbers<[1], [0], [0], [1], [0, 0, 1, 1], [], []>} : vector<8x16xf32>, vector<16x32xf32>, vector<8x32xf32> -> vector<8x32xf32>
    %161 = arith.addf %158, %160 : vector<8x32xf32>
    %162 = vector.broadcast %1 : vector<8x1xf32> to vector<8x32xf32>
    %163 = arith.addf %161, %162 : vector<8x32xf32>
    %c0_111 = arith.constant 0 : index
    %c0_112 = arith.constant 0 : index
    %c13 = arith.constant 13 : index
    %c0_113 = arith.constant 0 : index
    %164 = vector.load %arg6[%c0_111, %c0_112, %c13, %c0_113] : memref<1x8x32x32xf32, #tpu.memory_space<vmem>>, vector<1x8x1x32xf32>
    %165 = vector.shape_cast %164 : vector<1x8x1x32xf32> to vector<8x32xf32>
    %166 = vector.shape_cast %163 : vector<8x32xf32> to vector<1x8x1x32xf32>
    tpu.vector_store %arg6[%c0_111, %c0_112, %c13, %c0_113], %166 {strides = array<i32>} : memref<1x8x32x32xf32, #tpu.memory_space<vmem>>, vector<1x8x1x32xf32>,
    %c0_114 = arith.constant 0 : index
    %c0_115 = arith.constant 0 : index
    %c7_116 = arith.constant 7 : index
    %c0_117 = arith.constant 0 : index
    %167 = vector.load %arg2[%c0_114, %c0_115, %c7_116, %c0_117] : memref<1x4x16x16xf32, #tpu.memory_space<vmem>>, vector<1x4x1x16xf32>
    %168 = vector.shape_cast %167 : vector<1x4x1x16xf32> to vector<4x16xf32>
    %cst_118 = arith.constant dense<0.000000e+00> : vector<32x16xf32>
    %169 = tpu.matmul %0, %168, %cst_118 {dimension_numbers = #tpu.dot_dimension_numbers<[1], [0], [0], [1], [0, 0, 1, 1], [], []>} : vector<32x4xf32>, vector<4x16xf32>, vector<32x16xf32> -> vector<32x16xf32>
    %170 = vector.extract_strided_slice %169 {offsets = [0, 0], sizes = [8, 16], strides = [1, 1]} : vector<32x16xf32> to vector<8x16xf32>
    %cst_119 = arith.constant dense<0.000000e+00> : vector<8x32xf32>
    %171 = tpu.matmul %170, %3, %cst_119 {dimension_numbers = #tpu.dot_dimension_numbers<[1], [0], [0], [1], [0, 0, 1, 1], [], []>} : vector<8x16xf32>, vector<16x32xf32>, vector<8x32xf32> -> vector<8x32xf32>
    %172 = vector.extract_strided_slice %169 {offsets = [8, 0], sizes = [8, 16], strides = [1, 1]} : vector<32x16xf32> to vector<8x16xf32>
    %cst_120 = arith.constant dense<0.000000e+00> : vector<8x32xf32>
    %173 = tpu.matmul %172, %5, %cst_120 {dimension_numbers = #tpu.dot_dimension_numbers<[1], [0], [0], [1], [0, 0, 1, 1], [], []>} : vector<8x16xf32>, vector<16x32xf32>, vector<8x32xf32> -> vector<8x32xf32>
    %174 = arith.addf %171, %173 : vector<8x32xf32>
    %175 = vector.broadcast %1 : vector<8x1xf32> to vector<8x32xf32>
    %176 = arith.addf %174, %175 : vector<8x32xf32>
    %c0_121 = arith.constant 0 : index
    %c0_122 = arith.constant 0 : index
    %c14 = arith.constant 14 : index
    %c0_123 = arith.constant 0 : index
    %177 = vector.load %arg6[%c0_121, %c0_122, %c14, %c0_123] : memref<1x8x32x32xf32, #tpu.memory_space<vmem>>, vector<1x8x1x32xf32>
    %178 = vector.shape_cast %177 : vector<1x8x1x32xf32> to vector<8x32xf32>
    %179 = vector.shape_cast %176 : vector<8x32xf32> to vector<1x8x1x32xf32>
    tpu.vector_store %arg6[%c0_121, %c0_122, %c14, %c0_123], %179 {strides = array<i32>} : memref<1x8x32x32xf32, #tpu.memory_space<vmem>>, vector<1x8x1x32xf32>,
    %180 = vector.extract_strided_slice %169 {offsets = [16, 0], sizes = [8, 16], strides = [1, 1]} : vector<32x16xf32> to vector<8x16xf32>
    %cst_124 = arith.constant dense<0.000000e+00> : vector<8x32xf32>
    %181 = tpu.matmul %180, %3, %cst_124 {dimension_numbers = #tpu.dot_dimension_numbers<[1], [0], [0], [1], [0, 0, 1, 1], [], []>} : vector<8x16xf32>, vector<16x32xf32>, vector<8x32xf32> -> vector<8x32xf32>
    %182 = vector.extract_strided_slice %169 {offsets = [24, 0], sizes = [8, 16], strides = [1, 1]} : vector<32x16xf32> to vector<8x16xf32>
    %cst_125 = arith.constant dense<0.000000e+00> : vector<8x32xf32>
    %183 = tpu.matmul %182, %5, %cst_125 {dimension_numbers = #tpu.dot_dimension_numbers<[1], [0], [0], [1], [0, 0, 1, 1], [], []>} : vector<8x16xf32>, vector<16x32xf32>, vector<8x32xf32> -> vector<8x32xf32>
    %184 = arith.addf %181, %183 : vector<8x32xf32>
    %185 = vector.broadcast %1 : vector<8x1xf32> to vector<8x32xf32>
    %186 = arith.addf %184, %185 : vector<8x32xf32>
    %c0_126 = arith.constant 0 : index
    %c0_127 = arith.constant 0 : index
    %c15 = arith.constant 15 : index
    %c0_128 = arith.constant 0 : index
    %187 = vector.load %arg6[%c0_126, %c0_127, %c15, %c0_128] : memref<1x8x32x32xf32, #tpu.memory_space<vmem>>, vector<1x8x1x32xf32>
    %188 = vector.shape_cast %187 : vector<1x8x1x32xf32> to vector<8x32xf32>
    %189 = vector.shape_cast %186 : vector<8x32xf32> to vector<1x8x1x32xf32>
    tpu.vector_store %arg6[%c0_126, %c0_127, %c15, %c0_128], %189 {strides = array<i32>} : memref<1x8x32x32xf32, #tpu.memory_space<vmem>>, vector<1x8x1x32xf32>,
    %c0_129 = arith.constant 0 : index
    %c0_130 = arith.constant 0 : index
    %c8_131 = arith.constant 8 : index
    %c0_132 = arith.constant 0 : index
    %190 = vector.load %arg2[%c0_129, %c0_130, %c8_131, %c0_132] : memref<1x4x16x16xf32, #tpu.memory_space<vmem>>, vector<1x4x1x16xf32>
    %191 = vector.shape_cast %190 : vector<1x4x1x16xf32> to vector<4x16xf32>
    %cst_133 = arith.constant dense<0.000000e+00> : vector<32x16xf32>
    %192 = tpu.matmul %0, %191, %cst_133 {dimension_numbers = #tpu.dot_dimension_numbers<[1], [0], [0], [1], [0, 0, 1, 1], [], []>} : vector<32x4xf32>, vector<4x16xf32>, vector<32x16xf32> -> vector<32x16xf32>
    %193 = vector.extract_strided_slice %192 {offsets = [0, 0], sizes = [8, 16], strides = [1, 1]} : vector<32x16xf32> to vector<8x16xf32>
    %cst_134 = arith.constant dense<0.000000e+00> : vector<8x32xf32>
    %194 = tpu.matmul %193, %3, %cst_134 {dimension_numbers = #tpu.dot_dimension_numbers<[1], [0], [0], [1], [0, 0, 1, 1], [], []>} : vector<8x16xf32>, vector<16x32xf32>, vector<8x32xf32> -> vector<8x32xf32>
    %195 = vector.extract_strided_slice %192 {offsets = [8, 0], sizes = [8, 16], strides = [1, 1]} : vector<32x16xf32> to vector<8x16xf32>
    %cst_135 = arith.constant dense<0.000000e+00> : vector<8x32xf32>
    %196 = tpu.matmul %195, %5, %cst_135 {dimension_numbers = #tpu.dot_dimension_numbers<[1], [0], [0], [1], [0, 0, 1, 1], [], []>} : vector<8x16xf32>, vector<16x32xf32>, vector<8x32xf32> -> vector<8x32xf32>
    %197 = arith.addf %194, %196 : vector<8x32xf32>
    %198 = vector.broadcast %1 : vector<8x1xf32> to vector<8x32xf32>
    %199 = arith.addf %197, %198 : vector<8x32xf32>
    %c0_136 = arith.constant 0 : index
    %c0_137 = arith.constant 0 : index
    %c16 = arith.constant 16 : index
    %c0_138 = arith.constant 0 : index
    %200 = vector.load %arg6[%c0_136, %c0_137, %c16, %c0_138] : memref<1x8x32x32xf32, #tpu.memory_space<vmem>>, vector<1x8x1x32xf32>
    %201 = vector.shape_cast %200 : vector<1x8x1x32xf32> to vector<8x32xf32>
    %202 = vector.shape_cast %199 : vector<8x32xf32> to vector<1x8x1x32xf32>
    tpu.vector_store %arg6[%c0_136, %c0_137, %c16, %c0_138], %202 {strides = array<i32>} : memref<1x8x32x32xf32, #tpu.memory_space<vmem>>, vector<1x8x1x32xf32>,
    %203 = vector.extract_strided_slice %192 {offsets = [16, 0], sizes = [8, 16], strides = [1, 1]} : vector<32x16xf32> to vector<8x16xf32>
    %cst_139 = arith.constant dense<0.000000e+00> : vector<8x32xf32>
    %204 = tpu.matmul %203, %3, %cst_139 {dimension_numbers = #tpu.dot_dimension_numbers<[1], [0], [0], [1], [0, 0, 1, 1], [], []>} : vector<8x16xf32>, vector<16x32xf32>, vector<8x32xf32> -> vector<8x32xf32>
    %205 = vector.extract_strided_slice %192 {offsets = [24, 0], sizes = [8, 16], strides = [1, 1]} : vector<32x16xf32> to vector<8x16xf32>
    %cst_140 = arith.constant dense<0.000000e+00> : vector<8x32xf32>
    %206 = tpu.matmul %205, %5, %cst_140 {dimension_numbers = #tpu.dot_dimension_numbers<[1], [0], [0], [1], [0, 0, 1, 1], [], []>} : vector<8x16xf32>, vector<16x32xf32>, vector<8x32xf32> -> vector<8x32xf32>
    %207 = arith.addf %204, %206 : vector<8x32xf32>
    %208 = vector.broadcast %1 : vector<8x1xf32> to vector<8x32xf32>
    %209 = arith.addf %207, %208 : vector<8x32xf32>
    %c0_141 = arith.constant 0 : index
    %c0_142 = arith.constant 0 : index
    %c17 = arith.constant 17 : index
    %c0_143 = arith.constant 0 : index
    %210 = vector.load %arg6[%c0_141, %c0_142, %c17, %c0_143] : memref<1x8x32x32xf32, #tpu.memory_space<vmem>>, vector<1x8x1x32xf32>
    %211 = vector.shape_cast %210 : vector<1x8x1x32xf32> to vector<8x32xf32>
    %212 = vector.shape_cast %209 : vector<8x32xf32> to vector<1x8x1x32xf32>
    tpu.vector_store %arg6[%c0_141, %c0_142, %c17, %c0_143], %212 {strides = array<i32>} : memref<1x8x32x32xf32, #tpu.memory_space<vmem>>, vector<1x8x1x32xf32>,
    %c0_144 = arith.constant 0 : index
    %c0_145 = arith.constant 0 : index
    %c9_146 = arith.constant 9 : index
    %c0_147 = arith.constant 0 : index
    %213 = vector.load %arg2[%c0_144, %c0_145, %c9_146, %c0_147] : memref<1x4x16x16xf32, #tpu.memory_space<vmem>>, vector<1x4x1x16xf32>
    %214 = vector.shape_cast %213 : vector<1x4x1x16xf32> to vector<4x16xf32>
    %cst_148 = arith.constant dense<0.000000e+00> : vector<32x16xf32>
    %215 = tpu.matmul %0, %214, %cst_148 {dimension_numbers = #tpu.dot_dimension_numbers<[1], [0], [0], [1], [0, 0, 1, 1], [], []>} : vector<32x4xf32>, vector<4x16xf32>, vector<32x16xf32> -> vector<32x16xf32>
    %216 = vector.extract_strided_slice %215 {offsets = [0, 0], sizes = [8, 16], strides = [1, 1]} : vector<32x16xf32> to vector<8x16xf32>
    %cst_149 = arith.constant dense<0.000000e+00> : vector<8x32xf32>
    %217 = tpu.matmul %216, %3, %cst_149 {dimension_numbers = #tpu.dot_dimension_numbers<[1], [0], [0], [1], [0, 0, 1, 1], [], []>} : vector<8x16xf32>, vector<16x32xf32>, vector<8x32xf32> -> vector<8x32xf32>
    %218 = vector.extract_strided_slice %215 {offsets = [8, 0], sizes = [8, 16], strides = [1, 1]} : vector<32x16xf32> to vector<8x16xf32>
    %cst_150 = arith.constant dense<0.000000e+00> : vector<8x32xf32>
    %219 = tpu.matmul %218, %5, %cst_150 {dimension_numbers = #tpu.dot_dimension_numbers<[1], [0], [0], [1], [0, 0, 1, 1], [], []>} : vector<8x16xf32>, vector<16x32xf32>, vector<8x32xf32> -> vector<8x32xf32>
    %220 = arith.addf %217, %219 : vector<8x32xf32>
    %221 = vector.broadcast %1 : vector<8x1xf32> to vector<8x32xf32>
    %222 = arith.addf %220, %221 : vector<8x32xf32>
    %c0_151 = arith.constant 0 : index
    %c0_152 = arith.constant 0 : index
    %c18 = arith.constant 18 : index
    %c0_153 = arith.constant 0 : index
    %223 = vector.load %arg6[%c0_151, %c0_152, %c18, %c0_153] : memref<1x8x32x32xf32, #tpu.memory_space<vmem>>, vector<1x8x1x32xf32>
    %224 = vector.shape_cast %223 : vector<1x8x1x32xf32> to vector<8x32xf32>
    %225 = vector.shape_cast %222 : vector<8x32xf32> to vector<1x8x1x32xf32>
    tpu.vector_store %arg6[%c0_151, %c0_152, %c18, %c0_153], %225 {strides = array<i32>} : memref<1x8x32x32xf32, #tpu.memory_space<vmem>>, vector<1x8x1x32xf32>,
    %226 = vector.extract_strided_slice %215 {offsets = [16, 0], sizes = [8, 16], strides = [1, 1]} : vector<32x16xf32> to vector<8x16xf32>
    %cst_154 = arith.constant dense<0.000000e+00> : vector<8x32xf32>
    %227 = tpu.matmul %226, %3, %cst_154 {dimension_numbers = #tpu.dot_dimension_numbers<[1], [0], [0], [1], [0, 0, 1, 1], [], []>} : vector<8x16xf32>, vector<16x32xf32>, vector<8x32xf32> -> vector<8x32xf32>
    %228 = vector.extract_strided_slice %215 {offsets = [24, 0], sizes = [8, 16], strides = [1, 1]} : vector<32x16xf32> to vector<8x16xf32>
    %cst_155 = arith.constant dense<0.000000e+00> : vector<8x32xf32>
    %229 = tpu.matmul %228, %5, %cst_155 {dimension_numbers = #tpu.dot_dimension_numbers<[1], [0], [0], [1], [0, 0, 1, 1], [], []>} : vector<8x16xf32>, vector<16x32xf32>, vector<8x32xf32> -> vector<8x32xf32>
    %230 = arith.addf %227, %229 : vector<8x32xf32>
    %231 = vector.broadcast %1 : vector<8x1xf32> to vector<8x32xf32>
    %232 = arith.addf %230, %231 : vector<8x32xf32>
    %c0_156 = arith.constant 0 : index
    %c0_157 = arith.constant 0 : index
    %c19 = arith.constant 19 : index
    %c0_158 = arith.constant 0 : index
    %233 = vector.load %arg6[%c0_156, %c0_157, %c19, %c0_158] : memref<1x8x32x32xf32, #tpu.memory_space<vmem>>, vector<1x8x1x32xf32>
    %234 = vector.shape_cast %233 : vector<1x8x1x32xf32> to vector<8x32xf32>
    %235 = vector.shape_cast %232 : vector<8x32xf32> to vector<1x8x1x32xf32>
    tpu.vector_store %arg6[%c0_156, %c0_157, %c19, %c0_158], %235 {strides = array<i32>} : memref<1x8x32x32xf32, #tpu.memory_space<vmem>>, vector<1x8x1x32xf32>,
    %c0_159 = arith.constant 0 : index
    %c0_160 = arith.constant 0 : index
    %c10_161 = arith.constant 10 : index
    %c0_162 = arith.constant 0 : index
    %236 = vector.load %arg2[%c0_159, %c0_160, %c10_161, %c0_162] : memref<1x4x16x16xf32, #tpu.memory_space<vmem>>, vector<1x4x1x16xf32>
    %237 = vector.shape_cast %236 : vector<1x4x1x16xf32> to vector<4x16xf32>
    %cst_163 = arith.constant dense<0.000000e+00> : vector<32x16xf32>
    %238 = tpu.matmul %0, %237, %cst_163 {dimension_numbers = #tpu.dot_dimension_numbers<[1], [0], [0], [1], [0, 0, 1, 1], [], []>} : vector<32x4xf32>, vector<4x16xf32>, vector<32x16xf32> -> vector<32x16xf32>
    %239 = vector.extract_strided_slice %238 {offsets = [0, 0], sizes = [8, 16], strides = [1, 1]} : vector<32x16xf32> to vector<8x16xf32>
    %cst_164 = arith.constant dense<0.000000e+00> : vector<8x32xf32>
    %240 = tpu.matmul %239, %3, %cst_164 {dimension_numbers = #tpu.dot_dimension_numbers<[1], [0], [0], [1], [0, 0, 1, 1], [], []>} : vector<8x16xf32>, vector<16x32xf32>, vector<8x32xf32> -> vector<8x32xf32>
    %241 = vector.extract_strided_slice %238 {offsets = [8, 0], sizes = [8, 16], strides = [1, 1]} : vector<32x16xf32> to vector<8x16xf32>
    %cst_165 = arith.constant dense<0.000000e+00> : vector<8x32xf32>
    %242 = tpu.matmul %241, %5, %cst_165 {dimension_numbers = #tpu.dot_dimension_numbers<[1], [0], [0], [1], [0, 0, 1, 1], [], []>} : vector<8x16xf32>, vector<16x32xf32>, vector<8x32xf32> -> vector<8x32xf32>
    %243 = arith.addf %240, %242 : vector<8x32xf32>
    %244 = vector.broadcast %1 : vector<8x1xf32> to vector<8x32xf32>
    %245 = arith.addf %243, %244 : vector<8x32xf32>
    %c0_166 = arith.constant 0 : index
    %c0_167 = arith.constant 0 : index
    %c20 = arith.constant 20 : index
    %c0_168 = arith.constant 0 : index
    %246 = vector.load %arg6[%c0_166, %c0_167, %c20, %c0_168] : memref<1x8x32x32xf32, #tpu.memory_space<vmem>>, vector<1x8x1x32xf32>
    %247 = vector.shape_cast %246 : vector<1x8x1x32xf32> to vector<8x32xf32>
    %248 = vector.shape_cast %245 : vector<8x32xf32> to vector<1x8x1x32xf32>
    tpu.vector_store %arg6[%c0_166, %c0_167, %c20, %c0_168], %248 {strides = array<i32>} : memref<1x8x32x32xf32, #tpu.memory_space<vmem>>, vector<1x8x1x32xf32>,
    %249 = vector.extract_strided_slice %238 {offsets = [16, 0], sizes = [8, 16], strides = [1, 1]} : vector<32x16xf32> to vector<8x16xf32>
    %cst_169 = arith.constant dense<0.000000e+00> : vector<8x32xf32>
    %250 = tpu.matmul %249, %3, %cst_169 {dimension_numbers = #tpu.dot_dimension_numbers<[1], [0], [0], [1], [0, 0, 1, 1], [], []>} : vector<8x16xf32>, vector<16x32xf32>, vector<8x32xf32> -> vector<8x32xf32>
    %251 = vector.extract_strided_slice %238 {offsets = [24, 0], sizes = [8, 16], strides = [1, 1]} : vector<32x16xf32> to vector<8x16xf32>
    %cst_170 = arith.constant dense<0.000000e+00> : vector<8x32xf32>
    %252 = tpu.matmul %251, %5, %cst_170 {dimension_numbers = #tpu.dot_dimension_numbers<[1], [0], [0], [1], [0, 0, 1, 1], [], []>} : vector<8x16xf32>, vector<16x32xf32>, vector<8x32xf32> -> vector<8x32xf32>
    %253 = arith.addf %250, %252 : vector<8x32xf32>
    %254 = vector.broadcast %1 : vector<8x1xf32> to vector<8x32xf32>
    %255 = arith.addf %253, %254 : vector<8x32xf32>
    %c0_171 = arith.constant 0 : index
    %c0_172 = arith.constant 0 : index
    %c21 = arith.constant 21 : index
    %c0_173 = arith.constant 0 : index
    %256 = vector.load %arg6[%c0_171, %c0_172, %c21, %c0_173] : memref<1x8x32x32xf32, #tpu.memory_space<vmem>>, vector<1x8x1x32xf32>
    %257 = vector.shape_cast %256 : vector<1x8x1x32xf32> to vector<8x32xf32>
    %258 = vector.shape_cast %255 : vector<8x32xf32> to vector<1x8x1x32xf32>
    tpu.vector_store %arg6[%c0_171, %c0_172, %c21, %c0_173], %258 {strides = array<i32>} : memref<1x8x32x32xf32, #tpu.memory_space<vmem>>, vector<1x8x1x32xf32>,
    %c0_174 = arith.constant 0 : index
    %c0_175 = arith.constant 0 : index
    %c11_176 = arith.constant 11 : index
    %c0_177 = arith.constant 0 : index
    %259 = vector.load %arg2[%c0_174, %c0_175, %c11_176, %c0_177] : memref<1x4x16x16xf32, #tpu.memory_space<vmem>>, vector<1x4x1x16xf32>
    %260 = vector.shape_cast %259 : vector<1x4x1x16xf32> to vector<4x16xf32>
    %cst_178 = arith.constant dense<0.000000e+00> : vector<32x16xf32>
    %261 = tpu.matmul %0, %260, %cst_178 {dimension_numbers = #tpu.dot_dimension_numbers<[1], [0], [0], [1], [0, 0, 1, 1], [], []>} : vector<32x4xf32>, vector<4x16xf32>, vector<32x16xf32> -> vector<32x16xf32>
    %262 = vector.extract_strided_slice %261 {offsets = [0, 0], sizes = [8, 16], strides = [1, 1]} : vector<32x16xf32> to vector<8x16xf32>
    %cst_179 = arith.constant dense<0.000000e+00> : vector<8x32xf32>
    %263 = tpu.matmul %262, %3, %cst_179 {dimension_numbers = #tpu.dot_dimension_numbers<[1], [0], [0], [1], [0, 0, 1, 1], [], []>} : vector<8x16xf32>, vector<16x32xf32>, vector<8x32xf32> -> vector<8x32xf32>
    %264 = vector.extract_strided_slice %261 {offsets = [8, 0], sizes = [8, 16], strides = [1, 1]} : vector<32x16xf32> to vector<8x16xf32>
    %cst_180 = arith.constant dense<0.000000e+00> : vector<8x32xf32>
    %265 = tpu.matmul %264, %5, %cst_180 {dimension_numbers = #tpu.dot_dimension_numbers<[1], [0], [0], [1], [0, 0, 1, 1], [], []>} : vector<8x16xf32>, vector<16x32xf32>, vector<8x32xf32> -> vector<8x32xf32>
    %266 = arith.addf %263, %265 : vector<8x32xf32>
    %267 = vector.broadcast %1 : vector<8x1xf32> to vector<8x32xf32>
    %268 = arith.addf %266, %267 : vector<8x32xf32>
    %c0_181 = arith.constant 0 : index
    %c0_182 = arith.constant 0 : index
    %c22 = arith.constant 22 : index
    %c0_183 = arith.constant 0 : index
    %269 = vector.load %arg6[%c0_181, %c0_182, %c22, %c0_183] : memref<1x8x32x32xf32, #tpu.memory_space<vmem>>, vector<1x8x1x32xf32>
    %270 = vector.shape_cast %269 : vector<1x8x1x32xf32> to vector<8x32xf32>
    %271 = vector.shape_cast %268 : vector<8x32xf32> to vector<1x8x1x32xf32>
    tpu.vector_store %arg6[%c0_181, %c0_182, %c22, %c0_183], %271 {strides = array<i32>} : memref<1x8x32x32xf32, #tpu.memory_space<vmem>>, vector<1x8x1x32xf32>,
    %272 = vector.extract_strided_slice %261 {offsets = [16, 0], sizes = [8, 16], strides = [1, 1]} : vector<32x16xf32> to vector<8x16xf32>
    %cst_184 = arith.constant dense<0.000000e+00> : vector<8x32xf32>
    %273 = tpu.matmul %272, %3, %cst_184 {dimension_numbers = #tpu.dot_dimension_numbers<[1], [0], [0], [1], [0, 0, 1, 1], [], []>} : vector<8x16xf32>, vector<16x32xf32>, vector<8x32xf32> -> vector<8x32xf32>
    %274 = vector.extract_strided_slice %261 {offsets = [24, 0], sizes = [8, 16], strides = [1, 1]} : vector<32x16xf32> to vector<8x16xf32>
    %cst_185 = arith.constant dense<0.000000e+00> : vector<8x32xf32>
    %275 = tpu.matmul %274, %5, %cst_185 {dimension_numbers = #tpu.dot_dimension_numbers<[1], [0], [0], [1], [0, 0, 1, 1], [], []>} : vector<8x16xf32>, vector<16x32xf32>, vector<8x32xf32> -> vector<8x32xf32>
    %276 = arith.addf %273, %275 : vector<8x32xf32>
    %277 = vector.broadcast %1 : vector<8x1xf32> to vector<8x32xf32>
    %278 = arith.addf %276, %277 : vector<8x32xf32>
    %c0_186 = arith.constant 0 : index
    %c0_187 = arith.constant 0 : index
    %c23 = arith.constant 23 : index
    %c0_188 = arith.constant 0 : index
    %279 = vector.load %arg6[%c0_186, %c0_187, %c23, %c0_188] : memref<1x8x32x32xf32, #tpu.memory_space<vmem>>, vector<1x8x1x32xf32>
    %280 = vector.shape_cast %279 : vector<1x8x1x32xf32> to vector<8x32xf32>
    %281 = vector.shape_cast %278 : vector<8x32xf32> to vector<1x8x1x32xf32>
    tpu.vector_store %arg6[%c0_186, %c0_187, %c23, %c0_188], %281 {strides = array<i32>} : memref<1x8x32x32xf32, #tpu.memory_space<vmem>>, vector<1x8x1x32xf32>,
    %c0_189 = arith.constant 0 : index
    %c0_190 = arith.constant 0 : index
    %c12_191 = arith.constant 12 : index
    %c0_192 = arith.constant 0 : index
    %282 = vector.load %arg2[%c0_189, %c0_190, %c12_191, %c0_192] : memref<1x4x16x16xf32, #tpu.memory_space<vmem>>, vector<1x4x1x16xf32>
    %283 = vector.shape_cast %282 : vector<1x4x1x16xf32> to vector<4x16xf32>
    %cst_193 = arith.constant dense<0.000000e+00> : vector<32x16xf32>
    %284 = tpu.matmul %0, %283, %cst_193 {dimension_numbers = #tpu.dot_dimension_numbers<[1], [0], [0], [1], [0, 0, 1, 1], [], []>} : vector<32x4xf32>, vector<4x16xf32>, vector<32x16xf32> -> vector<32x16xf32>
    %285 = vector.extract_strided_slice %284 {offsets = [0, 0], sizes = [8, 16], strides = [1, 1]} : vector<32x16xf32> to vector<8x16xf32>
    %cst_194 = arith.constant dense<0.000000e+00> : vector<8x32xf32>
    %286 = tpu.matmul %285, %3, %cst_194 {dimension_numbers = #tpu.dot_dimension_numbers<[1], [0], [0], [1], [0, 0, 1, 1], [], []>} : vector<8x16xf32>, vector<16x32xf32>, vector<8x32xf32> -> vector<8x32xf32>
    %287 = vector.extract_strided_slice %284 {offsets = [8, 0], sizes = [8, 16], strides = [1, 1]} : vector<32x16xf32> to vector<8x16xf32>
    %cst_195 = arith.constant dense<0.000000e+00> : vector<8x32xf32>
    %288 = tpu.matmul %287, %5, %cst_195 {dimension_numbers = #tpu.dot_dimension_numbers<[1], [0], [0], [1], [0, 0, 1, 1], [], []>} : vector<8x16xf32>, vector<16x32xf32>, vector<8x32xf32> -> vector<8x32xf32>
    %289 = arith.addf %286, %288 : vector<8x32xf32>
    %290 = vector.broadcast %1 : vector<8x1xf32> to vector<8x32xf32>
    %291 = arith.addf %289, %290 : vector<8x32xf32>
    %c0_196 = arith.constant 0 : index
    %c0_197 = arith.constant 0 : index
    %c24 = arith.constant 24 : index
    %c0_198 = arith.constant 0 : index
    %292 = vector.load %arg6[%c0_196, %c0_197, %c24, %c0_198] : memref<1x8x32x32xf32, #tpu.memory_space<vmem>>, vector<1x8x1x32xf32>
    %293 = vector.shape_cast %292 : vector<1x8x1x32xf32> to vector<8x32xf32>
    %294 = vector.shape_cast %291 : vector<8x32xf32> to vector<1x8x1x32xf32>
    tpu.vector_store %arg6[%c0_196, %c0_197, %c24, %c0_198], %294 {strides = array<i32>} : memref<1x8x32x32xf32, #tpu.memory_space<vmem>>, vector<1x8x1x32xf32>,
    %295 = vector.extract_strided_slice %284 {offsets = [16, 0], sizes = [8, 16], strides = [1, 1]} : vector<32x16xf32> to vector<8x16xf32>
    %cst_199 = arith.constant dense<0.000000e+00> : vector<8x32xf32>
    %296 = tpu.matmul %295, %3, %cst_199 {dimension_numbers = #tpu.dot_dimension_numbers<[1], [0], [0], [1], [0, 0, 1, 1], [], []>} : vector<8x16xf32>, vector<16x32xf32>, vector<8x32xf32> -> vector<8x32xf32>
    %297 = vector.extract_strided_slice %284 {offsets = [24, 0], sizes = [8, 16], strides = [1, 1]} : vector<32x16xf32> to vector<8x16xf32>
    %cst_200 = arith.constant dense<0.000000e+00> : vector<8x32xf32>
    %298 = tpu.matmul %297, %5, %cst_200 {dimension_numbers = #tpu.dot_dimension_numbers<[1], [0], [0], [1], [0, 0, 1, 1], [], []>} : vector<8x16xf32>, vector<16x32xf32>, vector<8x32xf32> -> vector<8x32xf32>
    %299 = arith.addf %296, %298 : vector<8x32xf32>
    %300 = vector.broadcast %1 : vector<8x1xf32> to vector<8x32xf32>
    %301 = arith.addf %299, %300 : vector<8x32xf32>
    %c0_201 = arith.constant 0 : index
    %c0_202 = arith.constant 0 : index
    %c25 = arith.constant 25 : index
    %c0_203 = arith.constant 0 : index
    %302 = vector.load %arg6[%c0_201, %c0_202, %c25, %c0_203] : memref<1x8x32x32xf32, #tpu.memory_space<vmem>>, vector<1x8x1x32xf32>
    %303 = vector.shape_cast %302 : vector<1x8x1x32xf32> to vector<8x32xf32>
    %304 = vector.shape_cast %301 : vector<8x32xf32> to vector<1x8x1x32xf32>
    tpu.vector_store %arg6[%c0_201, %c0_202, %c25, %c0_203], %304 {strides = array<i32>} : memref<1x8x32x32xf32, #tpu.memory_space<vmem>>, vector<1x8x1x32xf32>,
    %c0_204 = arith.constant 0 : index
    %c0_205 = arith.constant 0 : index
    %c13_206 = arith.constant 13 : index
    %c0_207 = arith.constant 0 : index
    %305 = vector.load %arg2[%c0_204, %c0_205, %c13_206, %c0_207] : memref<1x4x16x16xf32, #tpu.memory_space<vmem>>, vector<1x4x1x16xf32>
    %306 = vector.shape_cast %305 : vector<1x4x1x16xf32> to vector<4x16xf32>
    %cst_208 = arith.constant dense<0.000000e+00> : vector<32x16xf32>
    %307 = tpu.matmul %0, %306, %cst_208 {dimension_numbers = #tpu.dot_dimension_numbers<[1], [0], [0], [1], [0, 0, 1, 1], [], []>} : vector<32x4xf32>, vector<4x16xf32>, vector<32x16xf32> -> vector<32x16xf32>
    %308 = vector.extract_strided_slice %307 {offsets = [0, 0], sizes = [8, 16], strides = [1, 1]} : vector<32x16xf32> to vector<8x16xf32>
    %cst_209 = arith.constant dense<0.000000e+00> : vector<8x32xf32>
    %309 = tpu.matmul %308, %3, %cst_209 {dimension_numbers = #tpu.dot_dimension_numbers<[1], [0], [0], [1], [0, 0, 1, 1], [], []>} : vector<8x16xf32>, vector<16x32xf32>, vector<8x32xf32> -> vector<8x32xf32>
    %310 = vector.extract_strided_slice %307 {offsets = [8, 0], sizes = [8, 16], strides = [1, 1]} : vector<32x16xf32> to vector<8x16xf32>
    %cst_210 = arith.constant dense<0.000000e+00> : vector<8x32xf32>
    %311 = tpu.matmul %310, %5, %cst_210 {dimension_numbers = #tpu.dot_dimension_numbers<[1], [0], [0], [1], [0, 0, 1, 1], [], []>} : vector<8x16xf32>, vector<16x32xf32>, vector<8x32xf32> -> vector<8x32xf32>
    %312 = arith.addf %309, %311 : vector<8x32xf32>
    %313 = vector.broadcast %1 : vector<8x1xf32> to vector<8x32xf32>
    %314 = arith.addf %312, %313 : vector<8x32xf32>
    %c0_211 = arith.constant 0 : index
    %c0_212 = arith.constant 0 : index
    %c26 = arith.constant 26 : index
    %c0_213 = arith.constant 0 : index
    %315 = vector.load %arg6[%c0_211, %c0_212, %c26, %c0_213] : memref<1x8x32x32xf32, #tpu.memory_space<vmem>>, vector<1x8x1x32xf32>
    %316 = vector.shape_cast %315 : vector<1x8x1x32xf32> to vector<8x32xf32>
    %317 = vector.shape_cast %314 : vector<8x32xf32> to vector<1x8x1x32xf32>
    tpu.vector_store %arg6[%c0_211, %c0_212, %c26, %c0_213], %317 {strides = array<i32>} : memref<1x8x32x32xf32, #tpu.memory_space<vmem>>, vector<1x8x1x32xf32>,
    %318 = vector.extract_strided_slice %307 {offsets = [16, 0], sizes = [8, 16], strides = [1, 1]} : vector<32x16xf32> to vector<8x16xf32>
    %cst_214 = arith.constant dense<0.000000e+00> : vector<8x32xf32>
    %319 = tpu.matmul %318, %3, %cst_214 {dimension_numbers = #tpu.dot_dimension_numbers<[1], [0], [0], [1], [0, 0, 1, 1], [], []>} : vector<8x16xf32>, vector<16x32xf32>, vector<8x32xf32> -> vector<8x32xf32>
    %320 = vector.extract_strided_slice %307 {offsets = [24, 0], sizes = [8, 16], strides = [1, 1]} : vector<32x16xf32> to vector<8x16xf32>
    %cst_215 = arith.constant dense<0.000000e+00> : vector<8x32xf32>
    %321 = tpu.matmul %320, %5, %cst_215 {dimension_numbers = #tpu.dot_dimension_numbers<[1], [0], [0], [1], [0, 0, 1, 1], [], []>} : vector<8x16xf32>, vector<16x32xf32>, vector<8x32xf32> -> vector<8x32xf32>
    %322 = arith.addf %319, %321 : vector<8x32xf32>
    %323 = vector.broadcast %1 : vector<8x1xf32> to vector<8x32xf32>
    %324 = arith.addf %322, %323 : vector<8x32xf32>
    %c0_216 = arith.constant 0 : index
    %c0_217 = arith.constant 0 : index
    %c27 = arith.constant 27 : index
    %c0_218 = arith.constant 0 : index
    %325 = vector.load %arg6[%c0_216, %c0_217, %c27, %c0_218] : memref<1x8x32x32xf32, #tpu.memory_space<vmem>>, vector<1x8x1x32xf32>
    %326 = vector.shape_cast %325 : vector<1x8x1x32xf32> to vector<8x32xf32>
    %327 = vector.shape_cast %324 : vector<8x32xf32> to vector<1x8x1x32xf32>
    tpu.vector_store %arg6[%c0_216, %c0_217, %c27, %c0_218], %327 {strides = array<i32>} : memref<1x8x32x32xf32, #tpu.memory_space<vmem>>, vector<1x8x1x32xf32>,
    %c0_219 = arith.constant 0 : index
    %c0_220 = arith.constant 0 : index
    %c14_221 = arith.constant 14 : index
    %c0_222 = arith.constant 0 : index
    %328 = vector.load %arg2[%c0_219, %c0_220, %c14_221, %c0_222] : memref<1x4x16x16xf32, #tpu.memory_space<vmem>>, vector<1x4x1x16xf32>
    %329 = vector.shape_cast %328 : vector<1x4x1x16xf32> to vector<4x16xf32>
    %cst_223 = arith.constant dense<0.000000e+00> : vector<32x16xf32>
    %330 = tpu.matmul %0, %329, %cst_223 {dimension_numbers = #tpu.dot_dimension_numbers<[1], [0], [0], [1], [0, 0, 1, 1], [], []>} : vector<32x4xf32>, vector<4x16xf32>, vector<32x16xf32> -> vector<32x16xf32>
    %331 = vector.extract_strided_slice %330 {offsets = [0, 0], sizes = [8, 16], strides = [1, 1]} : vector<32x16xf32> to vector<8x16xf32>
    %cst_224 = arith.constant dense<0.000000e+00> : vector<8x32xf32>
    %332 = tpu.matmul %331, %3, %cst_224 {dimension_numbers = #tpu.dot_dimension_numbers<[1], [0], [0], [1], [0, 0, 1, 1], [], []>} : vector<8x16xf32>, vector<16x32xf32>, vector<8x32xf32> -> vector<8x32xf32>
    %333 = vector.extract_strided_slice %330 {offsets = [8, 0], sizes = [8, 16], strides = [1, 1]} : vector<32x16xf32> to vector<8x16xf32>
    %cst_225 = arith.constant dense<0.000000e+00> : vector<8x32xf32>
    %334 = tpu.matmul %333, %5, %cst_225 {dimension_numbers = #tpu.dot_dimension_numbers<[1], [0], [0], [1], [0, 0, 1, 1], [], []>} : vector<8x16xf32>, vector<16x32xf32>, vector<8x32xf32> -> vector<8x32xf32>
    %335 = arith.addf %332, %334 : vector<8x32xf32>
    %336 = vector.broadcast %1 : vector<8x1xf32> to vector<8x32xf32>
    %337 = arith.addf %335, %336 : vector<8x32xf32>
    %c0_226 = arith.constant 0 : index
    %c0_227 = arith.constant 0 : index
    %c28 = arith.constant 28 : index
    %c0_228 = arith.constant 0 : index
    %338 = vector.load %arg6[%c0_226, %c0_227, %c28, %c0_228] : memref<1x8x32x32xf32, #tpu.memory_space<vmem>>, vector<1x8x1x32xf32>
    %339 = vector.shape_cast %338 : vector<1x8x1x32xf32> to vector<8x32xf32>
    %340 = vector.shape_cast %337 : vector<8x32xf32> to vector<1x8x1x32xf32>
    tpu.vector_store %arg6[%c0_226, %c0_227, %c28, %c0_228], %340 {strides = array<i32>} : memref<1x8x32x32xf32, #tpu.memory_space<vmem>>, vector<1x8x1x32xf32>,
    %341 = vector.extract_strided_slice %330 {offsets = [16, 0], sizes = [8, 16], strides = [1, 1]} : vector<32x16xf32> to vector<8x16xf32>
    %cst_229 = arith.constant dense<0.000000e+00> : vector<8x32xf32>
    %342 = tpu.matmul %341, %3, %cst_229 {dimension_numbers = #tpu.dot_dimension_numbers<[1], [0], [0], [1], [0, 0, 1, 1], [], []>} : vector<8x16xf32>, vector<16x32xf32>, vector<8x32xf32> -> vector<8x32xf32>
    %343 = vector.extract_strided_slice %330 {offsets = [24, 0], sizes = [8, 16], strides = [1, 1]} : vector<32x16xf32> to vector<8x16xf32>
    %cst_230 = arith.constant dense<0.000000e+00> : vector<8x32xf32>
    %344 = tpu.matmul %343, %5, %cst_230 {dimension_numbers = #tpu.dot_dimension_numbers<[1], [0], [0], [1], [0, 0, 1, 1], [], []>} : vector<8x16xf32>, vector<16x32xf32>, vector<8x32xf32> -> vector<8x32xf32>
    %345 = arith.addf %342, %344 : vector<8x32xf32>
    %346 = vector.broadcast %1 : vector<8x1xf32> to vector<8x32xf32>
    %347 = arith.addf %345, %346 : vector<8x32xf32>
    %c0_231 = arith.constant 0 : index
    %c0_232 = arith.constant 0 : index
    %c29 = arith.constant 29 : index
    %c0_233 = arith.constant 0 : index
    %348 = vector.load %arg6[%c0_231, %c0_232, %c29, %c0_233] : memref<1x8x32x32xf32, #tpu.memory_space<vmem>>, vector<1x8x1x32xf32>
    %349 = vector.shape_cast %348 : vector<1x8x1x32xf32> to vector<8x32xf32>
    %350 = vector.shape_cast %347 : vector<8x32xf32> to vector<1x8x1x32xf32>
    tpu.vector_store %arg6[%c0_231, %c0_232, %c29, %c0_233], %350 {strides = array<i32>} : memref<1x8x32x32xf32, #tpu.memory_space<vmem>>, vector<1x8x1x32xf32>,
    %c0_234 = arith.constant 0 : index
    %c0_235 = arith.constant 0 : index
    %c15_236 = arith.constant 15 : index
    %c0_237 = arith.constant 0 : index
    %351 = vector.load %arg2[%c0_234, %c0_235, %c15_236, %c0_237] : memref<1x4x16x16xf32, #tpu.memory_space<vmem>>, vector<1x4x1x16xf32>
    %352 = vector.shape_cast %351 : vector<1x4x1x16xf32> to vector<4x16xf32>
    %cst_238 = arith.constant dense<0.000000e+00> : vector<32x16xf32>
    %353 = tpu.matmul %0, %352, %cst_238 {dimension_numbers = #tpu.dot_dimension_numbers<[1], [0], [0], [1], [0, 0, 1, 1], [], []>} : vector<32x4xf32>, vector<4x16xf32>, vector<32x16xf32> -> vector<32x16xf32>
    %354 = vector.extract_strided_slice %353 {offsets = [0, 0], sizes = [8, 16], strides = [1, 1]} : vector<32x16xf32> to vector<8x16xf32>
    %cst_239 = arith.constant dense<0.000000e+00> : vector<8x32xf32>
    %355 = tpu.matmul %354, %3, %cst_239 {dimension_numbers = #tpu.dot_dimension_numbers<[1], [0], [0], [1], [0, 0, 1, 1], [], []>} : vector<8x16xf32>, vector<16x32xf32>, vector<8x32xf32> -> vector<8x32xf32>
    %356 = vector.extract_strided_slice %353 {offsets = [8, 0], sizes = [8, 16], strides = [1, 1]} : vector<32x16xf32> to vector<8x16xf32>
    %cst_240 = arith.constant dense<0.000000e+00> : vector<8x32xf32>
    %357 = tpu.matmul %356, %5, %cst_240 {dimension_numbers = #tpu.dot_dimension_numbers<[1], [0], [0], [1], [0, 0, 1, 1], [], []>} : vector<8x16xf32>, vector<16x32xf32>, vector<8x32xf32> -> vector<8x32xf32>
    %358 = arith.addf %355, %357 : vector<8x32xf32>
    %359 = vector.broadcast %1 : vector<8x1xf32> to vector<8x32xf32>
    %360 = arith.addf %358, %359 : vector<8x32xf32>
    %c0_241 = arith.constant 0 : index
    %c0_242 = arith.constant 0 : index
    %c30 = arith.constant 30 : index
    %c0_243 = arith.constant 0 : index
    %361 = vector.load %arg6[%c0_241, %c0_242, %c30, %c0_243] : memref<1x8x32x32xf32, #tpu.memory_space<vmem>>, vector<1x8x1x32xf32>
    %362 = vector.shape_cast %361 : vector<1x8x1x32xf32> to vector<8x32xf32>
    %363 = vector.shape_cast %360 : vector<8x32xf32> to vector<1x8x1x32xf32>
    tpu.vector_store %arg6[%c0_241, %c0_242, %c30, %c0_243], %363 {strides = array<i32>} : memref<1x8x32x32xf32, #tpu.memory_space<vmem>>, vector<1x8x1x32xf32>,
    %364 = vector.extract_strided_slice %353 {offsets = [16, 0], sizes = [8, 16], strides = [1, 1]} : vector<32x16xf32> to vector<8x16xf32>
    %cst_244 = arith.constant dense<0.000000e+00> : vector<8x32xf32>
    %365 = tpu.matmul %364, %3, %cst_244 {dimension_numbers = #tpu.dot_dimension_numbers<[1], [0], [0], [1], [0, 0, 1, 1], [], []>} : vector<8x16xf32>, vector<16x32xf32>, vector<8x32xf32> -> vector<8x32xf32>
    %366 = vector.extract_strided_slice %353 {offsets = [24, 0], sizes = [8, 16], strides = [1, 1]} : vector<32x16xf32> to vector<8x16xf32>
    %cst_245 = arith.constant dense<0.000000e+00> : vector<8x32xf32>
    %367 = tpu.matmul %366, %5, %cst_245 {dimension_numbers = #tpu.dot_dimension_numbers<[1], [0], [0], [1], [0, 0, 1, 1], [], []>} : vector<8x16xf32>, vector<16x32xf32>, vector<8x32xf32> -> vector<8x32xf32>
    %368 = arith.addf %365, %367 : vector<8x32xf32>
    %369 = vector.broadcast %1 : vector<8x1xf32> to vector<8x32xf32>
    %370 = arith.addf %368, %369 : vector<8x32xf32>
    %c0_246 = arith.constant 0 : index
    %c0_247 = arith.constant 0 : index
    %c31 = arith.constant 31 : index
    %c0_248 = arith.constant 0 : index
    %371 = vector.load %arg6[%c0_246, %c0_247, %c31, %c0_248] : memref<1x8x32x32xf32, #tpu.memory_space<vmem>>, vector<1x8x1x32xf32>
    %372 = vector.shape_cast %371 : vector<1x8x1x32xf32> to vector<8x32xf32>
    %373 = vector.shape_cast %370 : vector<8x32xf32> to vector<1x8x1x32xf32>
    tpu.vector_store %arg6[%c0_246, %c0_247, %c31, %c0_248], %373 {strides = array<i32>} : memref<1x8x32x32xf32, #tpu.memory_space<vmem>>, vector<1x8x1x32xf32>,
    return
  }
  func.func @transform_0(%arg0: i32, %arg1: i32) -> (i32, i32, i32, i32) {
    %c0_i32 = arith.constant 0 : i32
    %c0_i32_0 = arith.constant 0 : i32
    %c0_i32_1 = arith.constant 0 : i32
    return %arg0, %c0_i32, %arg1, %c0_i32_0 : i32, i32, i32, i32
  }
  func.func @transform_1(%arg0: i32, %arg1: i32) -> (i32, i32) {
    %c0_i32 = arith.constant 0 : i32
    %c0_i32_0 = arith.constant 0 : i32
    %c0_i32_1 = arith.constant 0 : i32
    return %c0_i32, %c0_i32_0 : i32, i32
  }
  func.func @transform_2(%arg0: i32, %arg1: i32) -> (i32, i32, i32) {
    %c0_i32 = arith.constant 0 : i32
    %c0_i32_0 = arith.constant 0 : i32
    %c0_i32_1 = arith.constant 0 : i32
    %c0_i32_2 = arith.constant 0 : i32
    return %c0_i32, %c0_i32_0, %c0_i32_1 : i32, i32, i32
  }
  func.func @transform_3(%arg0: i32, %arg1: i32) -> (i32, i32) {
    %c0_i32 = arith.constant 0 : i32
    %c0_i32_0 = arith.constant 0 : i32
    %c0_i32_1 = arith.constant 0 : i32
    return %c0_i32, %c0_i32_0 : i32, i32
  }
  func.func @transform_4(%arg0: i32, %arg1: i32) -> (i32, i32, i32, i32) {
    %c0_i32 = arith.constant 0 : i32
    %c0_i32_0 = arith.constant 0 : i32
    %c0_i32_1 = arith.constant 0 : i32
    return %arg0, %c0_i32, %arg1, %c0_i32_0 : i32, i32, i32, i32
  }
}

</mosaic_0001>

<bundles_post_ra>
// kernel: tpu_custom_call.1
= control target key start
LH: loop header
LB: loop body
LE: loop exit
PB: predicated region body
PF: predicated region fallthrough
CT: control target
= control target key end

     0   :  { %9 = vsyncpa [#allocation3], 0  ;;  %s4914_s0 = inlined_call_operand.hbm [shape: f32[2,4,16,16], index: 0, kind: input, shape index: {}]   ;;  %s4915_s1 = inlined_call_operand.vmem [shape: f32[32,4], index: 1, kind: input, shape index: {}]   ;;  %s4916_s2 = inlined_call_operand.vmem [shape: f32[2,16,32], index: 2, kind: input, shape index: {}]   ;;  %s4917_s3 = inlined_call_operand.vmem [shape: f32[8,1], index: 3, kind: input, shape index: {}]   ;;  %s4918_s4 = inlined_call_operand.hbm [shape: f32[2,8,32,32], index: 4, kind: output, shape index: {}]  }
   0x1   :  { %11 = vsyncpa [#allocation3 + $0x1], 0 }
   0x2   :  { %12 = vsyncpa [#allocation4], 0 }
   0x3   :  { %14 = vsyncpa [#allocation4 + $0x1], 0  ;;  %s3716_s15 = smov 0   ;;  %s3718_s16 = smov 0  }
   0x4   :  { %s3720_s17 = smov 0   ;;  %s3722_s18 = smov 0  }
   0x5   :  { %s3724_s19 = smov 0   ;;  %s3726_s20 = smov 0  }
   0x6 LB: > { %s3337_s21 = sadd.s32 4294967295, %s3684_s20   ;;  %s3338_s22 = sadd.s32 4294967294, %s3684_s20   ;;  %s3684_s20 = sphi %s3726_s20, %s20_s20   ;;  %s3680_s19 = sphi %s3724_s19, %s4927_s19   ;;  %s3676_s18 = sphi %s3722_s18, %s4926_s18   ;;  %s3672_s17 = sphi %s3720_s17, %s4925_s17   ;;  %s3668_s16 = sphi %s3718_s16, %s4924_s16   ;;  %s3664_s15 = sphi %s3716_s15, %s4923_s15  }
   0x7   : > { %s32_s23 = sadd.s32 1, %s3680_s19  ;;  %s41_s24 = sadd.s32 1, %s3672_s17 }
   0x8   : > { %p34_p0 = scmp.ge.s32.totalorder %s32_s23, 2  ;;  %p48_p1 = scmp.ne.s32.totalorder %s3672_s17, %s3668_s16 }
   0x9   : > { %p49_p2 = scmp.eq.s32.totalorder %s3684_s20, 0  ;;  %p54_p3 = scmp.ne.s32.totalorder %s3668_s16, %s3664_s15 }
   0xa   : > { %s4929_s23 = smov (%p34_p0, %s32_s23), 0  ;;  %p55_p5 = scmp.eq.s32.totalorder %s3337_s21, 0 }
   0xb   : > { %p3757_p4 = por %p49_p2, %p48_p1  ;;  %s36_s26 = ssub.s32 %s3680_s19, %s4929_s23 }
   0xc   : > { %p143_p6 = scmp.eq.s32.totalorder %s3337_s21, 1  ;;  %p39_p7 = scmp.eq.s32.totalorder %s36_s26, 0 }
   0xd   : > { %p3763_p8 = por %p55_p5, %p54_p3  ;;  %p149_p10 = scmp.eq.s32.totalorder %s3338_s22, 1 }
   0xe   : > { %p3767_p9 = por %p143_p6, %p48_p1  ;;  %p3340_p12 = scmp.ge.s32.totalorder %s3684_s20, 2 }
   0xf   : > { %s3772_s29 = scalar_select %p39_p7, %s3672_s17, %s41_s24  }
  0x10   : > { %p3774_p11 = por %p149_p10, %p54_p3  ;;  %p3512_p13 = scmp.lt.s32.totalorder %s3684_s20, 2 }
  0x11   : > { %s178_s5 = sand.u32 1, %s3672_s17   ;;  %s3498_s7 = sshll.u32 %s3680_s19, 6 }
  0x12   : > { %s3341_s6 = sshll.u32 %s178_s5, 6  ;;  %s189_s10 = scalar_lea.hbm %s4914_s0, %s3498_s7 }
  0x13   : > { %s182_s11 = scalar_lea.vmem [#allocation2], %s3341_s6  ;;  %s190_s13 = sshll.u32 %s189_s10, 4  ;;  %s191_s13 = int_to_ptr.hbm [resolvable:$true] %s190_s13 }
  0x14   : > { %s192_s12 = sshll.u32 %s182_s11, 4  ;;  %p3505_p0 = pnand %p3512_p13, %p3757_p4  ;;  %s193_s12 = int_to_ptr.vmem [resolvable:$true] %s192_s12 }
  0x15   : > { %p3344_p1 = scmp.ge.s32.totalorder %s3684_s20, 1  ;;  %s179_s14 = scalar_lea.sflag [#allocation3], %s178_s5 }
  0x16   : > { %s3686_s21 = smov 128   ;;  %s3687_s22 = smov 8  }
  0x17   : > { %3507 = dma.hbm_to_vmem [thread:$0]  (!%p3505_p0), %s191_s13, 1024, %s193_s12, %s179_s14, %s3686_s21, %s3686_s21, %s3687_s22  }
  0x18   : > { %p200_p2 = scmp.lt.s32.totalorder %s3684_s20, 3 }
  0x1a   : > { %p201_p3 = pnand %p3344_p1, %p200_p2 }
  0x1b   : > { %s3790_s24 = sand.u32 (!%p201_p3), 1, %s3668_s16  }
  0x1c   : > { %204 = sbr.rel (%p201_p3) target bundleno = 721 (0x2d1), region = 36  ;;  %s3345_s26 = sshll.u32 (!%p201_p3), %s3790_s24, 6 }
  0x1d   : > { %s207_s6 = scalar_lea.sflag (!%p201_p3), [#allocation3], %s3790_s24  ;;  %s3794_s7 = scalar_lea.vmem (!%p201_p3), [#allocation2], %s3345_s26 }
  0x21   : > { %3655 = dma.done.wait (%p3763_p8), %s207_s6, 1024  }
  0x22   : > { %3657 = vsyncadd (%p3763_p8), %s207_s6, 4294966272  ;;  %vm257_vm0 = vcmask 1041409   ;;  %v248_v0 = vld [vmem:[%s3794_s7] sm:$0x1]  ;;  %v249_v1 = vld [vmem:[%s3794_s7 + $0x10] sm:$0x1] }
  0x23   : > { %v250_v2 = vld [vmem:[%s3794_s7 + $0x20] sm:$0x1]  ;;  %v251_v3 = vld [vmem:[%s3794_s7 + $0x30] sm:$0x1]  ;;  %v256_v4 = vrot.slane %v249_v1, 7  ;;  %vm260_vm1 = vcmask 1042434  }
  0x24   : > { %v259_v5 = vrot.slane %v250_v2, 6  ;;  %v262_v6 = vrot.slane %v251_v3, 5  ;;  %vm263_vm2 = vcmask 1043459   ;;  %v457_v7 = vld [vmem:[%s3794_s7 + $0x1] sm:$0x1]  ;;  %vm278_vm3 = vcmask 1043456  }
  0x25   : > { %v458_v8 = vld [vmem:[%s3794_s7 + $0x11] sm:$0x1]  ;;  %v258_v9 = vsel %vm257_vm0, %v256_v4, %v248_v0  ;;  %v459_v10 = vld [vmem:[%s3794_s7 + $0x21] sm:$0x1]  ;;  %vm265_vm4 = vcmask 31744   ;;  %v3818_v17 = vld [vmem:[%s4916_s2 + $0x8] sm:$0xff] }
  0x26   : > { %v460_v11 = vld [vmem:[%s3794_s7 + $0x31] sm:$0x1]  ;;  %v465_v12 = vrot.slane %v458_v8, 7  ;;  %v261_v13 = vsel %vm260_vm1, %v259_v5, %v258_v9  ;;  %v3813_v14 = vld [vmem:[%s4915_s1] sm:$0xff]  ;;  %v467_v15 = vrot.slane %v459_v10, 6  ;;  %351 = vmatpush.msra.mxu3 %v3818_v17  ;;  %v3834_v22 = vld [vmem:[%s4915_s1 + $0x8] sm:$0xff] }
  0x27   : > { %v469_v16 = vrot.slane %v460_v11, 5  ;;  %v264_v18 = vsel %vm263_vm2, %v262_v6, %v261_v13  ;;  %v3843_v23 = vld [vmem:[%s4915_s1 + $0x10] sm:$0xff]  ;;  %v3852_v24 = vld [vmem:[%s4915_s1 + $0x18] sm:$0xff]  ;;  %v3861_v25 = vld [vmem:[%s4916_s2] sm:$0xff]  ;;  %v3688_v29 = vmov 0   ;;  %vm310_vm5 = vcmask 130048  }
  0x28   : > { %v466_v19 = vsel %vm257_vm0, %v465_v12, %v457_v7  ;;  %3349 = vmatpush.msk.msra.mxu0 %vm278_vm3, %v264_v18  ;;  %352 = vmatpush.msra.mxu3 %v3861_v25  ;;  %v3867_v26 = vld [vmem:[%s4916_s2 + $0x18] sm:$0xff]  ;;  %v3875_v27 = vld [vmem:[%s4916_s2 + $0x10] sm:$0xff]  ;;  %v242_v28 = vld [vmem:[%s4917_s3] sm:$0xff]  ;;  %s3346_s9 = sshll.u32 %s3790_s24, 8  ;;  %vm378_vm6 = vcmask 253952   ;;  %s3499_s6 = sshll.u32 %s3676_s18, 8 }
  0x29   : > { %v468_v20 = vsel %vm260_vm1, %v467_v15, %v466_v19  ;;  %3350 = vmatmul.msk.f32.vlgmr.msra.gmra.mxu0 %vm265_vm4, %v3813_v14  ;;  %328 = vmatpush.msra.mxu1 %v3867_v26  ;;  %v827_v31 = vld [vmem:[%s3794_s7 + $0x3] sm:$0x1]  ;;  %v828_v32 = vld [vmem:[%s3794_s7 + $0x13] sm:$0x1]  ;;  %v643_v45 = vld [vmem:[%s3794_s7 + $0x12] sm:$0x1]  ;;  %s3246_s5 = scalar_lea.hbm %s4918_s4, %s3499_s6 }
  0x2a   : > { %v470_v21 = vsel %vm263_vm2, %v469_v16, %v468_v20  ;;  %404 = vmatpush.msrb.mxu3 %v3867_v26  ;;  %704 = vmatpush.msrb.mxu0 %v3867_v26  ;;  %v829_v33 = vld [vmem:[%s3794_s7 + $0x23] sm:$0x1]  ;;  %v830_v34 = vld [vmem:[%s3794_s7 + $0x33] sm:$0x1]  ;;  %v835_v35 = vrot.slane %v828_v32, 7  ;;  %v650_v47 = vrot.slane %v643_v45, 7 }
  0x2b   : > { %3358 = vmatpush.msk.msra.mxu2 %vm278_vm3, %v470_v21  ;;  %329 = vmatpush.msra.mxu1 %v3875_v27  ;;  %v837_v36 = vrot.slane %v829_v33, 6  ;;  %v839_v37 = vrot.slane %v830_v34, 5  ;;  %v644_v46 = vld [vmem:[%s3794_s7 + $0x22] sm:$0x1]  ;;  %v645_v50 = vld [vmem:[%s3794_s7 + $0x32] sm:$0x1] }
  0x2c   : > { %3359 = vmatmul.msk.f32.vlgmr.msra.gmra.mxu2 %vm265_vm4, %v3813_v14  ;;  %405 = vmatpush.msrb.mxu3 %v3875_v27  ;;  %v836_v38 = vsel %vm257_vm0, %v835_v35, %v827_v31  ;;  %v642_v48 = vld [vmem:[%s3794_s7 + $0x2] sm:$0x1]  ;;  %v652_v51 = vrot.slane %v644_v46, 6  ;;  %v1013_v53 = vld [vmem:[%s3794_s7 + $0x14] sm:$0x1]  ;;  %v654_v54 = vrot.slane %v645_v50, 5 }
  0x2d   : > { %427 = vmatpush.msrb.mxu1 %v3818_v17  ;;  %705 = vmatpush.msrb.mxu0 %v3875_v27  ;;  %v838_v39 = vsel %vm260_vm1, %v837_v36, %v836_v38  ;;  %v651_v52 = vsel %vm257_vm0, %v650_v47, %v642_v48  ;;  %v1014_v57 = vld [vmem:[%s3794_s7 + $0x24] sm:$0x1]  ;;  %v1020_v58 = vrot.slane %v1013_v53, 7  ;;  %v1015_v61 = vld [vmem:[%s3794_s7 + $0x34] sm:$0x1]  ;;  %s4043_s10 = scalar_lea.vmem [#allocation5], %s3346_s9 }
  0x2e   : > { %3567 = vset.pattern.permute.xlu0 %v3688_v29  ;;  %v840_v40 = vsel %vm263_vm2, %v839_v37, %v838_v39  ;;  %v653_v56 = vsel %vm260_vm1, %v652_v51, %v651_v52  ;;  %v1012_v59 = vld [vmem:[%s3794_s7 + $0x4] sm:$0x1]  ;;  %v1022_v62 = vrot.slane %v1014_v57, 6  ;;  %v1197_v0 = vld [vmem:[%s3794_s7 + $0x5] sm:$0x1]  ;;  %v1024_v6 = vrot.slane %v1015_v61, 5 }
  0x2f   : > { %774 = vmatpush.msra.mxu0 %v3867_v26  ;;  %428 = vmatpush.msrb.mxu1 %v3861_v25  ;;  %v655_v60 = vsel %vm263_vm2, %v654_v54, %v653_v56  ;;  %v1021_v63 = vsel %vm257_vm0, %v1020_v58, %v1012_v59  ;;  %v1198_v1 = vld [vmem:[%s3794_s7 + $0x15] sm:$0x1]  ;;  %v1199_v2 = vld [vmem:[%s3794_s7 + $0x25] sm:$0x1]  ;;  %v1382_v15 = vld [vmem:[%s3794_s7 + $0x6] sm:$0x1] }
  0x30   : > { %359 = vperm.xlu0 %3567, %v242_v28   ;;  %3376 = vmatpush.msk.msrb.mxu2 %vm278_vm3, %v840_v40  ;;  %v1200_v3 = vld [vmem:[%s3794_s7 + $0x35] sm:$0x1]  ;;  %v1205_v4 = vrot.slane %v1198_v1, 7  ;;  %v1207_v5 = vrot.slane %v1199_v2, 6  ;;  %v1023_v8 = vsel %vm260_vm1, %v1022_v62, %v1021_v63  ;;  %v1383_v16 = vld [vmem:[%s3794_s7 + $0x16] sm:$0x1] }
  0x31   : > { %3351 = vmatmul.msk.f32.gmra.mxu0 %vm265_vm4, %v3834_v22  ;;  %v1209_v7 = vrot.slane %v1200_v3, 5  ;;  %v1025_v13 = vsel %vm263_vm2, %v1024_v6, %v1023_v8  ;;  %v1384_v18 = vld [vmem:[%s3794_s7 + $0x26] sm:$0x1]  ;;  %v1385_v19 = vld [vmem:[%s3794_s7 + $0x36] sm:$0x1]  ;;  %v1390_v20 = vrot.slane %v1383_v16, 7 }
  0x32   : > { %775 = vmatpush.msra.mxu0 %v3875_v27  ;;  %v1206_v9 = vsel %vm257_vm0, %v1205_v4, %v1197_v0  ;;  %v1392_v21 = vrot.slane %v1384_v18, 6  ;;  %v1394_v28 = vrot.slane %v1385_v19, 5  ;;  %v1567_v32 = vld [vmem:[%s3794_s7 + $0x7] sm:$0x1]  ;;  %v1568_v33 = vld [vmem:[%s3794_s7 + $0x17] sm:$0x1] }
  0x33   : > { %v1208_v10 = vsel %vm260_vm1, %v1207_v5, %v1206_v9  ;;  %v1391_v29 = vsel %vm257_vm0, %v1390_v20, %v1382_v15  ;;  %v1569_v34 = vld [vmem:[%s3794_s7 + $0x27] sm:$0x1]  ;;  %v1570_v35 = vld [vmem:[%s3794_s7 + $0x37] sm:$0x1]  ;;  %v1575_v36 = vrot.slane %v1568_v33, 7  ;;  %s3247_s18 = sshll.u32 %s4043_s10, 4  ;;  %s3248_s18 = int_to_ptr.vmem [resolvable:$true] %s3247_s18 }
  0x34   : > { %3360 = vmatmul.msk.f32.gmra.mxu2 %vm265_vm4, %v3834_v22  ;;  %v1210_v12 = vsel %vm263_vm2, %v1209_v7, %v1208_v10  ;;  %v1577_v37 = vrot.slane %v1569_v34, 6  ;;  %v1579_v38 = vrot.slane %v1570_v35, 5  ;;  %v1755_v45 = vld [vmem:[%s3794_s7 + $0x38] sm:$0x1]  ;;  %v1937_v52 = vld [vmem:[%s3794_s7 + $0x9] sm:$0x1] }
  0x35   : > { %3394 = vmatpush.msk.msra.mxu2 %vm278_vm3, %v1210_v12  ;;  %v1576_v39 = vsel %vm257_vm0, %v1575_v36, %v1567_v32  ;;  %v1764_v48 = vrot.slane %v1755_v45, 5  ;;  %v1938_v53 = vld [vmem:[%s3794_s7 + $0x19] sm:$0x1]  ;;  %v1939_v54 = vld [vmem:[%s3794_s7 + $0x29] sm:$0x1]  ;;  %s3249_s8 = sshll.u32 %s3246_s5, 4  ;;  %s3250_s8 = int_to_ptr.hbm [resolvable:$true] %s3249_s8 }
  0x36   : > { %v1578_v40 = vsel %vm260_vm1, %v1577_v37, %v1576_v39  ;;  %v1945_v56 = vrot.slane %v1938_v53, 7  ;;  %v1947_v57 = vrot.slane %v1939_v54, 6  ;;  %v2122_v62 = vld [vmem:[%s3794_s7 + $0xa] sm:$0x1]  ;;  %v2123_v63 = vld [vmem:[%s3794_s7 + $0x1a] sm:$0x1] }
  0x37   : > { %v2124_v0 = vld [vmem:[%s3794_s7 + $0x2a] sm:$0x1]  ;;  %v2125_v1 = vld [vmem:[%s3794_s7 + $0x3a] sm:$0x1]  ;;  %v2130_v2 = vrot.slane %v2123_v63, 7  ;;  %s3233_s9 = scalar_lea.sflag [#allocation4], %s3790_s24 }
  0x38   : > { %v1946_v59 = vsel %vm257_vm0, %v1945_v56, %v1937_v52  ;;  %v2132_v3 = vrot.slane %v2124_v0, 6  ;;  %v2134_v4 = vrot.slane %v2125_v1, 5  ;;  %v2308_v15 = vld [vmem:[%s3794_s7 + $0x1b] sm:$0x1]  ;;  %v2309_v16 = vld [vmem:[%s3794_s7 + $0x2b] sm:$0x1] }
  0x39   : > { %3352 = vmatmul.msk.f32.gmra.mxu0 %vm265_vm4, %v3843_v23  ;;  %v2131_v5 = vsel %vm257_vm0, %v2130_v2, %v2122_v62  ;;  %v2310_v18 = vld [vmem:[%s3794_s7 + $0x3b] sm:$0x1]  ;;  %v2315_v19 = vrot.slane %v2308_v15, 7  ;;  %v2317_v20 = vrot.slane %v2309_v16, 6  ;;  %v2492_v39 = vld [vmem:[%s3794_s7 + $0xc] sm:$0x1] }
  0x3a   : > { %v2133_v6 = vsel %vm260_vm1, %v2132_v3, %v2131_v5  ;;  %v2319_v34 = vrot.slane %v2310_v18, 5  ;;  %v2680_v63 = vld [vmem:[%s3794_s7 + $0x3d] sm:$0x1]  ;;  %s3622_s14 = scalar_lea.hbm %s4918_s4, 512 }
  0x3b   : > { %v2135_v7 = vsel %vm263_vm2, %v2134_v4, %v2133_v6  ;;  %v2689_v5 = vrot.slane %v2680_v63, 5 }
  0x3c   : > { %3361 = vmatmul.msk.f32.gmra.mxu2 %vm265_vm4, %v3843_v23 }
  0x41   : > { %3353 = vmatmul.msk.f32.gmra.mxu0 %vm265_vm4, %v3852_v24 }
  0x44   : > { %3362 = vmatmul.msk.f32.gmra.mxu2 %vm265_vm4, %v3852_v24 }
  0x4c   : > { %3377 = vmatmul.msk.f32.vlgmr.msrb.gmra.mxu2 %vm265_vm4, %v3813_v14 }
  0x54   : > { %3378 = vmatmul.msk.f32.gmra.mxu2 %vm265_vm4, %v3834_v22 }
  0x5c   : > { %3379 = vmatmul.msk.f32.gmra.mxu2 %vm265_vm4, %v3843_v23 }
  0x64   : > { %3380 = vmatmul.msk.f32.gmra.mxu2 %vm265_vm4, %v3852_v24 }
  0x6c   : > { %3395 = vmatmul.msk.f32.vlgmr.msra.gmra.mxu2 %vm265_vm4, %v3813_v14 }
  0x74   : > { %3396 = vmatmul.msk.f32.gmra.mxu2 %vm265_vm4, %v3834_v22 }
  0x7c   : > { %3397 = vmatmul.msk.f32.gmra.mxu2 %vm265_vm4, %v3843_v23 }
  0x84   : > { %3398 = vmatmul.msk.f32.gmra.mxu2 %vm265_vm4, %v3852_v24 }
  0xa2   : > { %v4034_v8 = vpop.permute.xlu0 %359 }
  0xa6   : > { %v298_v30 = vpop.f32.mrf.mxu0 }
  0xa7   : > { %3355 = vmatmul.msk.f32.vlgmr.msra.gmra.mxu3 %vm310_vm5, %v298_v30  ;;  %v1393_v30 = vsel %vm260_vm1, %v1392_v21, %v1391_v29 }
  0xa8   : > { %519 = vmatpush.msra.mxu3 %v3867_v26  ;;  %v1395_v31 = vsel %vm263_vm2, %v1394_v28, %v1393_v30 }
  0xaa   : > { %520 = vmatpush.msra.mxu3 %v3875_v27 }
  0xae   : > { %v301_v41 = vpop.f32.mrf.mxu0 }
  0xaf   : > { %v490_v42 = vpop.f32.mrf.mxu2  ;;  %3354 = vmatmul.msk.f32.vlgmr.msra.gmra.mxu1 %vm310_vm5, %v301_v41  ;;  %v1580_v41 = vsel %vm263_vm2, %v1579_v38, %v1578_v40  ;;  %v2493_v40 = vld [vmem:[%s3794_s7 + $0x1c] sm:$0x1] }
  0xb0   : > { %542 = vmatpush.msra.mxu1 %v3818_v17  ;;  %3412 = vmatpush.msk.msrb.mxu2 %vm278_vm3, %v1580_v41  ;;  %v2494_v41 = vld [vmem:[%s3794_s7 + $0x2c] sm:$0x1] }
  0xb1   : > { %3413 = vmatmul.msk.f32.vlgmr.msrb.gmra.mxu2 %vm265_vm4, %v3813_v14 }
  0xb2   : > { %543 = vmatpush.msra.mxu1 %v3861_v25 }
  0xb6   : > { %v304_v43 = vpop.f32.mrf.mxu0 }
  0xb7   : > { %3357 = vmatmul.msk.f32.vlgmr.msrb.gmra.mxu1 %vm310_vm5, %v304_v43  ;;  %v493_v44 = vpop.f32.mrf.mxu2  ;;  %v1753_v43 = vld [vmem:[%s3794_s7 + $0x18] sm:$0x1] }
  0xb8   : > { %612 = vmatpush.msrb.mxu1 %v3818_v17  ;;  %v1760_v46 = vrot.slane %v1753_v43, 7  ;;  %v2500_v43 = vrot.slane %v2493_v40, 7  ;;  %v2864_v40 = vld [vmem:[%s3794_s7 + $0x2e] sm:$0x1] }
  0xb9   : > { %3414 = vmatmul.msk.f32.gmra.mxu2 %vm265_vm4, %v3834_v22 }
  0xba   : > { %613 = vmatpush.msrb.mxu1 %v3861_v25 }
  0xbe   : > { %v307_v49 = vpop.f32.mrf.mxu0 }
  0xbf   : > { %3356 = vmatmul.msk.f32.vlgmr.msrb.gmra.mxu3 %vm310_vm5, %v307_v49  ;;  %3364 = vmatmul.msk.f32.vlgmr.msra.gmra.mxu1 %vm310_vm5, %v490_v42  ;;  %v496_v55 = vpop.f32.mrf.mxu2  ;;  %v1752_v42 = vld [vmem:[%s3794_s7 + $0x8] sm:$0x1] }
  0xc0   : > { %589 = vmatpush.msrb.mxu3 %v3867_v26  ;;  %727 = vmatpush.msra.mxu1 %v3818_v17  ;;  %v1761_v49 = vsel %vm257_vm0, %v1760_v46, %v1752_v42  ;;  %v2495_v42 = vld [vmem:[%s3794_s7 + $0x3c] sm:$0x1] }
  0xc1   : > { %3415 = vmatmul.msk.f32.gmra.mxu2 %vm265_vm4, %v3843_v23  ;;  %v2504_v45 = vrot.slane %v2495_v42, 5 }
  0xc2   : > { %590 = vmatpush.msrb.mxu3 %v3875_v27  ;;  %728 = vmatpush.msra.mxu1 %v3861_v25 }
  0xc7   : > { %3363 = vmatmul.msk.f32.vlgmr.msra.gmra.mxu3 %vm310_vm5, %v493_v44  ;;  %3366 = vmatmul.msk.f32.vlgmr.msrb.gmra.mxu1 %vm310_vm5, %v496_v55  ;;  %v499_v11 = vpop.f32.mrf.mxu2  ;;  %v1754_v44 = vld [vmem:[%s3794_s7 + $0x28] sm:$0x1]  ;;  %v1940_v55 = vld [vmem:[%s3794_s7 + $0x39] sm:$0x1] }
  0xc8   : > { %3367 = vmatpush.msk.msra.mxu3 %vm278_vm3, %v655_v60  ;;  %797 = vmatpush.msrb.mxu1 %v3818_v17  ;;  %v1762_v47 = vrot.slane %v1754_v44, 6  ;;  %v1949_v58 = vrot.slane %v1940_v55, 5  ;;  %v1948_v60 = vsel %vm260_vm1, %v1947_v57, %v1946_v59  ;;  %v2502_v44 = vrot.slane %v2494_v41, 6  ;;  %v2677_v59 = vld [vmem:[%s3794_s7 + $0xd] sm:$0x1] }
  0xc9   : > { %3416 = vmatmul.msk.f32.gmra.mxu2 %vm265_vm4, %v3852_v24  ;;  %v2865_v41 = vld [vmem:[%s3794_s7 + $0x3e] sm:$0x1] }
  0xca   : > { %798 = vmatpush.msrb.mxu1 %v3861_v25  ;;  %v1763_v50 = vsel %vm260_vm1, %v1762_v47, %v1761_v49  ;;  %v1950_v61 = vsel %vm263_vm2, %v1949_v58, %v1948_v60  ;;  %v2501_v47 = vsel %vm257_vm0, %v2500_v43, %v2492_v39  ;;  %v2678_v60 = vld [vmem:[%s3794_s7 + $0x1d] sm:$0x1] }
  0xcb   : > { %v1765_v51 = vsel %vm263_vm2, %v1764_v48, %v1763_v50  ;;  %3430 = vmatpush.msk.msra.mxu2 %vm278_vm3, %v1950_v61  ;;  %v2503_v49 = vsel %vm260_vm1, %v2502_v44, %v2501_v47  ;;  %v2679_v61 = vld [vmem:[%s3794_s7 + $0x2d] sm:$0x1]  ;;  %v2685_v0 = vrot.slane %v2678_v60, 7 }
  0xcc   : > { %v2505_v50 = vsel %vm263_vm2, %v2504_v45, %v2503_v49  ;;  %v2687_v1 = vrot.slane %v2679_v61, 6  ;;  %v2872_v45 = vrot.slane %v2864_v40, 6 }
  0xcd   : > { %v2686_v6 = vsel %vm257_vm0, %v2685_v0, %v2677_v59 }
  0xcf   : > { %3365 = vmatmul.msk.f32.vlgmr.msrb.gmra.mxu3 %vm310_vm5, %v499_v11  ;;  %v4096_v2 = vpop.f32.mrf.mxu2 }
  0xd0   : > { %3385 = vmatpush.msk.msrb.mxu3 %vm278_vm3, %v1025_v13  ;;  %v2307_v13 = vld [vmem:[%s3794_s7 + $0xb] sm:$0x1] }
  0xd1   : > { %3431 = vmatmul.msk.f32.vlgmr.msra.gmra.mxu2 %vm265_vm4, %v3813_v14 }
  0xd7   : > { %3368 = vmatmul.msk.f32.vlgmr.msra.gmra.mxu3 %vm265_vm4, %v3813_v14 }
  0xd8   : > { %3403 = vmatpush.msk.msra.mxu3 %vm278_vm3, %v1395_v31  ;;  %v2316_v31 = vsel %vm257_vm0, %v2315_v19, %v2307_v13 }
  0xd9   : > { %3432 = vmatmul.msk.f32.gmra.mxu2 %vm265_vm4, %v3834_v22  ;;  %v2318_v33 = vsel %vm260_vm1, %v2317_v20, %v2316_v31 }
  0xda   : > { %v2320_v37 = vsel %vm263_vm2, %v2319_v34, %v2318_v33 }
  0xdb   : > { %3448 = vmatpush.msk.msrb.mxu2 %vm278_vm3, %v2320_v37  ;;  %v2862_v37 = vld [vmem:[%s3794_s7 + $0xe] sm:$0x1] }
  0xdf   : > { %3369 = vmatmul.msk.f32.gmra.mxu3 %vm265_vm4, %v3834_v22 }
  0xe1   : > { %3433 = vmatmul.msk.f32.gmra.mxu2 %vm265_vm4, %v3843_v23 }
  0xe7   : > { %3370 = vmatmul.msk.f32.gmra.mxu3 %vm265_vm4, %v3843_v23 }
  0xe9   : > { %3434 = vmatmul.msk.f32.gmra.mxu2 %vm265_vm4, %v3852_v24 }
  0xef   : > { %3371 = vmatmul.msk.f32.gmra.mxu3 %vm265_vm4, %v3852_v24 }
  0xf1   : > { %3449 = vmatmul.msk.f32.vlgmr.msrb.gmra.mxu2 %vm265_vm4, %v3813_v14 }
  0xf7   : > { %3386 = vmatmul.msk.f32.vlgmr.msrb.gmra.mxu3 %vm265_vm4, %v3813_v14 }
  0xf8   : > { %3421 = vmatpush.msk.msrb.mxu3 %vm278_vm3, %v1765_v51 }
  0xf9   : > { %3450 = vmatmul.msk.f32.gmra.mxu2 %vm265_vm4, %v3834_v22 }
  0xff   : > { %3387 = vmatmul.msk.f32.gmra.mxu3 %vm265_vm4, %v3834_v22 }
 0x101   : > { %3451 = vmatmul.msk.f32.gmra.mxu2 %vm265_vm4, %v3843_v23 }
 0x107   : > { %3388 = vmatmul.msk.f32.gmra.mxu3 %vm265_vm4, %v3843_v23 }
 0x109   : > { %3452 = vmatmul.msk.f32.gmra.mxu2 %vm265_vm4, %v3852_v24 }
 0x10f   : > { %3389 = vmatmul.msk.f32.gmra.mxu3 %vm265_vm4, %v3852_v24 }
 0x117   : > { %3404 = vmatmul.msk.f32.vlgmr.msra.gmra.mxu3 %vm265_vm4, %v3813_v14 }
 0x118   : > { %3439 = vmatpush.msk.msra.mxu3 %vm278_vm3, %v2135_v7 }
 0x11f   : > { %3405 = vmatmul.msk.f32.gmra.mxu3 %vm265_vm4, %v3834_v22 }
 0x127   : > { %3406 = vmatmul.msk.f32.gmra.mxu3 %vm265_vm4, %v3843_v23 }
 0x12a   : > { %v354_v9 = vpop.f32.mrf.mxu3 }
 0x12c   : > { %v331_v10 = vpop.f32.mrf.mxu1 }
 0x12d   : > { %v355_v11 = vadd.f32 %v354_v9, %v331_v10  ;;  %v2688_v9 = vsel %vm260_vm1, %v2687_v1, %v2686_v6 }
 0x12e   : > { %v2690_v10 = vsel %vm263_vm2, %v2689_v5, %v2688_v9 }
 0x12f   : > { %v362_v12 = vadd.f32 %v4034_v8, %v355_v11  ;;  %3407 = vmatmul.msk.f32.gmra.mxu3 %vm265_vm4, %v3852_v24  ;;  %3466 = vmatpush.msk.msra.mxu2 %vm278_vm3, %v2690_v10 }
 0x130   : > { %3467 = vmatmul.msk.f32.vlgmr.msra.gmra.mxu2 %vm265_vm4, %v3813_v14 }
 0x131   : > { %v364_v21 = vrot.slane %v362_v12, 1  ;;  %v365_v28 = vrot.slane %v362_v12, 2  ;;  %v366_v29 = vrot.slane %v362_v12, 3  ;;  %379 = vst.msk [vmem:[%s4043_s10] sm:$0x1] %vm378_vm6, %v362_v12  ;;  %v367_v30 = vrot.slane %v362_v12, 4 }
 0x132   : > { %v368_v32 = vrot.slane %v362_v12, 5  ;;  %v369_v35 = vrot.slane %v362_v12, 6  ;;  %v370_v36 = vrot.slane %v362_v12, 7 }
 0x133   : > { %380 = vst.msk [vmem:[%s4043_s10 + $0x20] sm:$0x1] %vm378_vm6, %v364_v21  ;;  %v4123_v21 = vpop.f32.mrf.mxu2 }
 0x134   : > { %381 = vst.msk [vmem:[%s4043_s10 + $0x40] sm:$0x1] %vm378_vm6, %v365_v28  ;;  %v430_v38 = vpop.f32.mrf.mxu1 }
 0x135   : > { %382 = vst.msk [vmem:[%s4043_s10 + $0x60] sm:$0x1] %vm378_vm6, %v366_v29 }
 0x136   : > { %383 = vst.msk [vmem:[%s4043_s10 + $0x80] sm:$0x1] %vm378_vm6, %v367_v30 }
 0x137   : > { %384 = vst.msk [vmem:[%s4043_s10 + $0xa0] sm:$0x1] %vm378_vm6, %v368_v32  ;;  %3422 = vmatmul.msk.f32.vlgmr.msrb.gmra.mxu3 %vm265_vm4, %v3813_v14 }
 0x138   : > { %385 = vst.msk [vmem:[%s4043_s10 + $0xc0] sm:$0x1] %vm378_vm6, %v369_v35  ;;  %3457 = vmatpush.msk.msrb.mxu3 %vm278_vm3, %v2505_v50  ;;  %3468 = vmatmul.msk.f32.gmra.mxu2 %vm265_vm4, %v3834_v22 }
 0x139   : > { %386 = vst.msk [vmem:[%s4043_s10 + $0xe0] sm:$0x1] %vm378_vm6, %v370_v36 }
 0x13b   : > { %v866_v42 = vpop.f32.mrf.mxu2 }
 0x13c   : > { %v545_v52 = vpop.f32.mrf.mxu1 }
 0x13f   : > { %3423 = vmatmul.msk.f32.gmra.mxu3 %vm265_vm4, %v3834_v22 }
 0x140   : > { %3469 = vmatmul.msk.f32.gmra.mxu2 %vm265_vm4, %v3843_v23 }
 0x142   : > { %v407_v46 = vpop.f32.mrf.mxu3 }
 0x143   : > { %v431_v48 = vadd.f32 %v430_v38, %v407_v46  ;;  %v2863_v38 = vld [vmem:[%s3794_s7 + $0x1e] sm:$0x1]  ;;  %v2874_v46 = vrot.slane %v2865_v41, 5 }
 0x144   : > { %v615_v16 = vpop.f32.mrf.mxu1  ;;  %v2870_v44 = vrot.slane %v2863_v38, 7 }
 0x145   : > { %v433_v51 = vadd.f32 %v431_v48, %v4034_v8 }
 0x146   : > { %v2871_v47 = vsel %vm257_vm0, %v2870_v44, %v2862_v37 }
 0x147   : > { %v435_v53 = vrot.slane %v433_v51, 1  ;;  %v436_v54 = vrot.slane %v433_v51, 2  ;;  %v437_v55 = vrot.slane %v433_v51, 3  ;;  %449 = vst.msk [vmem:[%s4043_s10 + $0x1] sm:$0x1] %vm378_vm6, %v433_v51  ;;  %3424 = vmatmul.msk.f32.gmra.mxu3 %vm265_vm4, %v3843_v23  ;;  %v438_v56 = vrot.slane %v433_v51, 4 }
 0x148   : > { %v439_v57 = vrot.slane %v433_v51, 5  ;;  %v440_v58 = vrot.slane %v433_v51, 6  ;;  %v441_v3 = vrot.slane %v433_v51, 7  ;;  %v2873_v48 = vsel %vm260_vm1, %v2872_v45, %v2871_v47  ;;  %v869_v51 = vpop.f32.mrf.mxu2  ;;  %3470 = vmatmul.msk.f32.gmra.mxu2 %vm265_vm4, %v3852_v24 }
 0x149   : > { %450 = vst.msk [vmem:[%s4043_s10 + $0x21] sm:$0x1] %vm378_vm6, %v435_v53  ;;  %v2875_v49 = vsel %vm263_vm2, %v2874_v46, %v2873_v48  ;;  %v3048_v53 = vld [vmem:[%s3794_s7 + $0x1f] sm:$0x1]  ;;  %v4332_v46 = vld [vmem:[%s4916_s2 + $0x8] sm:$0xff] }
 0x14a   : > { %451 = vst.msk [vmem:[%s4043_s10 + $0x41] sm:$0x1] %vm378_vm6, %v436_v54  ;;  %v522_v62 = vpop.f32.mrf.mxu3  ;;  %v3049_v54 = vld [vmem:[%s3794_s7 + $0x2f] sm:$0x1] }
 0x14b   : > { %452 = vst.msk [vmem:[%s4043_s10 + $0x61] sm:$0x1] %vm378_vm6, %v437_v55  ;;  %v546_v4 = vadd.f32 %v545_v52, %v522_v62  ;;  %v3047_v52 = vld [vmem:[%s3794_s7 + $0xf] sm:$0x1]  ;;  %v3050_v55 = vld [vmem:[%s3794_s7 + $0x3f] sm:$0x1] }
 0x14c   : > { %453 = vst.msk [vmem:[%s4043_s10 + $0x81] sm:$0x1] %vm378_vm6, %v438_v56  ;;  %v3055_v56 = vrot.slane %v3048_v53, 7  ;;  %s3616_s7 = sshra.s32 %s3250_s8, 4  ;;  %s3617_s7 = int_to_ptr.hbm [resolvable:$true] %s3616_s7 }
 0x14d   : > { %454 = vst.msk [vmem:[%s4043_s10 + $0xa1] sm:$0x1] %vm378_vm6, %v439_v57  ;;  %v548_v7 = vadd.f32 %v546_v4, %v4034_v8  ;;  %v3057_v57 = vrot.slane %v3049_v54, 6  ;;  %s3618_s11 = scalar_lea.hbm %s3617_s7, 256  ;;  %p3623_p7 = scmp.lt.s32.totalorder %s3617_s7, %s4918_s4 }
 0x14e   : > { %455 = vst.msk [vmem:[%s4043_s10 + $0xc1] sm:$0x1] %vm378_vm6, %v440_v58  ;;  %v3059_v58 = vrot.slane %v3050_v55, 5  ;;  %v3056_v60 = vsel %vm257_vm0, %v3055_v56, %v3047_v52  ;;  %v4350_v56 = vld [vmem:[%s4916_s2] sm:$0xff]  ;;  %p3619_p4 = scmp.ne.s32.totalorder %s3617_s7, %s3618_s11  ;;  %p3624_p8 = scmp.lt.s32.totalorder %s3622_s14, %s3618_s11 }
 0x14f   : > { %456 = vst.msk [vmem:[%s4043_s10 + $0xe1] sm:$0x1] %vm378_vm6, %v441_v3  ;;  %v550_v11 = vrot.slane %v548_v7, 1  ;;  %v551_v12 = vrot.slane %v548_v7, 2  ;;  %v552_v13 = vrot.slane %v548_v7, 3  ;;  %3425 = vmatmul.msk.f32.gmra.mxu3 %vm265_vm4, %v3852_v24  ;;  %v553_v15 = vrot.slane %v548_v7, 4 }
 0x150   : > { %564 = vst.msk [vmem:[%s4043_s10 + $0x2] sm:$0x1] %vm378_vm6, %v548_v7  ;;  %v554_v18 = vrot.slane %v548_v7, 5  ;;  %v555_v19 = vrot.slane %v548_v7, 6  ;;  %v556_v28 = vrot.slane %v548_v7, 7  ;;  %v1230_v61 = vpop.f32.mrf.mxu2  ;;  %v3058_v62 = vsel %vm260_vm1, %v3057_v57, %v3056_v60  ;;  %p3620_p5 = pnand %p3619_p4, %p3767_p9  ;;  %p3625_p10 = por %p3624_p8, %p3623_p7 }
 0x151   : > { %565 = vst.msk [vmem:[%s4043_s10 + $0x22] sm:$0x1] %vm378_vm6, %v550_v11  ;;  %v3060_v63 = vsel %vm263_vm2, %v3059_v58, %v3058_v62 }
 0x152   : > { %566 = vst.msk [vmem:[%s4043_s10 + $0x42] sm:$0x1] %vm378_vm6, %v551_v12  ;;  %v592_v20 = vpop.f32.mrf.mxu3  ;;  %3484 = vmatpush.msk.msrb.mxu2 %vm278_vm3, %v3060_v63  ;;  %p3621_p6 = pneg %p3620_p5 }
 0x153   : > { %567 = vst.msk [vmem:[%s4043_s10 + $0x62] sm:$0x1] %vm378_vm6, %v552_v13  ;;  %v616_v29 = vadd.f32 %v615_v16, %v592_v20  ;;  %3485 = vmatmul.msk.f32.vlgmr.msrb.gmra.mxu2 %vm265_vm4, %v3813_v14 }
 0x154   : > { %568 = vst.msk [vmem:[%s4043_s10 + $0x82] sm:$0x1] %vm378_vm6, %v553_v15  ;;  %p3626_p13 = pnand %p3625_p10, %p3621_p6 }
 0x155   : > { %569 = vst.msk [vmem:[%s4043_s10 + $0xa2] sm:$0x1] %vm378_vm6, %v554_v18  ;;  %v618_v30 = vadd.f32 %v616_v29, %v4034_v8 }
 0x156   : > { %570 = vst.msk [vmem:[%s4043_s10 + $0xc2] sm:$0x1] %vm378_vm6, %v555_v19 }
 0x157   : > { %571 = vst.msk [vmem:[%s4043_s10 + $0xe2] sm:$0x1] %vm378_vm6, %v556_v28  ;;  %v620_v31 = vrot.slane %v618_v30, 1  ;;  %v621_v32 = vrot.slane %v618_v30, 2  ;;  %v622_v33 = vrot.slane %v618_v30, 3  ;;  %3440 = vmatmul.msk.f32.vlgmr.msra.gmra.mxu3 %vm265_vm4, %v3813_v14  ;;  %v623_v34 = vrot.slane %v618_v30, 4 }
 0x158   : > { %v624_v35 = vrot.slane %v618_v30, 5  ;;  %v625_v36 = vrot.slane %v618_v30, 6  ;;  %634 = vst.msk [vmem:[%s4043_s10 + $0x3] sm:$0x1] %vm378_vm6, %v618_v30  ;;  %v626_v43 = vrot.slane %v618_v30, 7  ;;  %3475 = vmatpush.msk.msra.mxu3 %vm278_vm3, %v2875_v49  ;;  %v1233_v1 = vpop.f32.mrf.mxu2 }
 0x159   : > { %635 = vst.msk [vmem:[%s4043_s10 + $0x23] sm:$0x1] %vm378_vm6, %v620_v31 }
 0x15a   : > { %636 = vst.msk [vmem:[%s4043_s10 + $0x43] sm:$0x1] %vm378_vm6, %v621_v32  ;;  %v675_v39 = vpop.f32.mrf.mxu3 }
 0x15b   : > { %637 = vst.msk [vmem:[%s4043_s10 + $0x63] sm:$0x1] %vm378_vm6, %v622_v33  ;;  %3373 = vmatmul.msk.f32.vlgmr.msra.gmra.mxu1 %vm310_vm5, %v675_v39  ;;  %3486 = vmatmul.msk.f32.gmra.mxu2 %vm265_vm4, %v3834_v22 }
 0x15c   : > { %638 = vst.msk [vmem:[%s4043_s10 + $0x83] sm:$0x1] %vm378_vm6, %v623_v34  ;;  %912 = vmatpush.msra.mxu1 %v3818_v17 }
 0x15d   : > { %639 = vst.msk [vmem:[%s4043_s10 + $0xa3] sm:$0x1] %vm378_vm6, %v624_v35 }
 0x15e   : > { %640 = vst.msk [vmem:[%s4043_s10 + $0xc3] sm:$0x1] %vm378_vm6, %v625_v36  ;;  %913 = vmatpush.msra.mxu1 %v3861_v25 }
 0x15f   : > { %641 = vst.msk [vmem:[%s4043_s10 + $0xe3] sm:$0x1] %vm378_vm6, %v626_v43  ;;  %3441 = vmatmul.msk.f32.gmra.mxu3 %vm265_vm4, %v3834_v22 }
 0x160   : > { %v1236_v4 = vpop.f32.mrf.mxu2 }
 0x162   : > { %v678_v50 = vpop.f32.mrf.mxu3 }
 0x163   : > { %3372 = vmatmul.msk.f32.vlgmr.msrb.gmra.mxu0 %vm310_vm5, %v678_v50  ;;  %3487 = vmatmul.msk.f32.gmra.mxu2 %vm265_vm4, %v3843_v23 }
 0x164   : > { %889 = vmatpush.msrb.mxu0 %v3867_v26 }
 0x166   : > { %890 = vmatpush.msrb.mxu0 %v3875_v27 }
 0x167   : > { %3442 = vmatmul.msk.f32.gmra.mxu3 %vm265_vm4, %v3843_v23 }
 0x168   : > { %v1239_v5 = vpop.f32.mrf.mxu2 }
 0x16a   : > { %v681_v59 = vpop.f32.mrf.mxu3 }
 0x16b   : > { %3375 = vmatmul.msk.f32.vlgmr.msrb.gmra.mxu1 %vm310_vm5, %v681_v59  ;;  %3488 = vmatmul.msk.f32.gmra.mxu2 %vm265_vm4, %v3852_v24 }
 0x16c   : > { %982 = vmatpush.msrb.mxu1 %v3818_v17 }
 0x16e   : > { %983 = vmatpush.msrb.mxu1 %v3861_v25 }
 0x16f   : > { %3443 = vmatmul.msk.f32.gmra.mxu3 %vm265_vm4, %v3852_v24 }
 0x170   : > { %v1600_v7 = vpop.f32.mrf.mxu2 }
 0x172   : > { %v684_v0 = vpop.f32.mrf.mxu3 }
 0x173   : > { %3374 = vmatmul.msk.f32.vlgmr.msra.gmra.mxu0 %vm310_vm5, %v684_v0  ;;  %3382 = vmatmul.msk.f32.vlgmr.msra.gmra.mxu1 %vm310_vm5, %v4096_v2  ;;  %v4374_v0 = vld [vmem:[%s4916_s2 + $0x18] sm:$0xff] }
 0x174   : > { %959 = vmatpush.msra.mxu0 %v3867_v26  ;;  %1097 = vmatpush.msra.mxu1 %v3818_v17 }
 0x176   : > { %960 = vmatpush.msra.mxu0 %v3875_v27  ;;  %1098 = vmatpush.msra.mxu1 %v3861_v25 }
 0x177   : > { %3458 = vmatmul.msk.f32.vlgmr.msrb.gmra.mxu3 %vm265_vm4, %v3813_v14 }
 0x178   : > { %v1603_v10 = vpop.f32.mrf.mxu2 }
 0x17a   : > { %v1045_v3 = vpop.f32.mrf.mxu3 }
 0x17b   : > { %3381 = vmatmul.msk.f32.vlgmr.msrb.gmra.mxu0 %vm310_vm5, %v4123_v21  ;;  %3384 = vmatmul.msk.f32.vlgmr.msrb.gmra.mxu1 %vm310_vm5, %v866_v42 }
 0x17c   : > { %1074 = vmatpush.msrb.mxu0 %v3867_v26  ;;  %1167 = vmatpush.msrb.mxu1 %v3818_v17 }
 0x17e   : > { %1075 = vmatpush.msrb.mxu0 %v3875_v27  ;;  %1168 = vmatpush.msrb.mxu1 %v3861_v25 }
 0x17f   : > { %3459 = vmatmul.msk.f32.gmra.mxu3 %vm265_vm4, %v3834_v22 }
 0x180   : > { %v1606_v12 = vpop.f32.mrf.mxu2 }
 0x182   : > { %v1048_v2 = vpop.f32.mrf.mxu3 }
 0x183   : > { %3383 = vmatmul.msk.f32.vlgmr.msra.gmra.mxu0 %vm310_vm5, %v869_v51  ;;  %3391 = vmatmul.msk.f32.vlgmr.msra.gmra.mxu1 %vm310_vm5, %v1045_v3 }
 0x184   : > { %1144 = vmatpush.msra.mxu0 %v3867_v26  ;;  %1282 = vmatpush.msra.mxu1 %v3818_v17 }
 0x186   : > { %1145 = vmatpush.msra.mxu0 %v3875_v27  ;;  %1283 = vmatpush.msra.mxu1 %v3861_v25 }
 0x187   : > { %3460 = vmatmul.msk.f32.gmra.mxu3 %vm265_vm4, %v3843_v23 }
 0x188   : > { %v1609_v15 = vpop.f32.mrf.mxu2 }
 0x18a   : > { %v1051_v6 = vpop.f32.mrf.mxu3 }
 0x18b   : > { %3390 = vmatmul.msk.f32.vlgmr.msrb.gmra.mxu0 %vm310_vm5, %v1048_v2  ;;  %3393 = vmatmul.msk.f32.vlgmr.msrb.gmra.mxu1 %vm310_vm5, %v1051_v6 }
 0x18c   : > { %1259 = vmatpush.msrb.mxu0 %v3867_v26  ;;  %1352 = vmatpush.msrb.mxu1 %v3818_v17 }
 0x18e   : > { %1260 = vmatpush.msrb.mxu0 %v3875_v27  ;;  %1353 = vmatpush.msrb.mxu1 %v3861_v25 }
 0x18f   : > { %3461 = vmatmul.msk.f32.gmra.mxu3 %vm265_vm4, %v3852_v24 }
 0x190   : > { %v1970_v16 = vpop.f32.mrf.mxu2 }
 0x192   : > { %v1054_v9 = vpop.f32.mrf.mxu3 }
 0x193   : > { %3392 = vmatmul.msk.f32.vlgmr.msra.gmra.mxu0 %vm310_vm5, %v1054_v9  ;;  %3400 = vmatmul.msk.f32.vlgmr.msra.gmra.mxu1 %vm310_vm5, %v1230_v61 }
 0x194   : > { %1329 = vmatpush.msra.mxu0 %v3867_v26  ;;  %1467 = vmatpush.msra.mxu1 %v3818_v17 }
 0x196   : > { %1330 = vmatpush.msra.mxu0 %v3875_v27  ;;  %1468 = vmatpush.msra.mxu1 %v3861_v25 }
 0x197   : > { %3476 = vmatmul.msk.f32.vlgmr.msra.gmra.mxu3 %vm265_vm4, %v3813_v14 }
 0x19a   : > { %v1415_v11 = vpop.f32.mrf.mxu3 }
 0x19b   : > { %3399 = vmatmul.msk.f32.vlgmr.msrb.gmra.mxu0 %vm310_vm5, %v1233_v1  ;;  %3402 = vmatmul.msk.f32.vlgmr.msrb.gmra.mxu1 %vm310_vm5, %v1236_v4 }
 0x19c   : > { %1444 = vmatpush.msrb.mxu0 %v3867_v26  ;;  %1537 = vmatpush.msrb.mxu1 %v3818_v17 }
 0x19e   : > { %1445 = vmatpush.msrb.mxu0 %v3875_v27  ;;  %1538 = vmatpush.msrb.mxu1 %v3861_v25 }
 0x19f   : > { %3477 = vmatmul.msk.f32.gmra.mxu3 %vm265_vm4, %v3834_v22 }
 0x1a2   : > { %v1418_v13 = vpop.f32.mrf.mxu3 }
 0x1a3   : > { %3401 = vmatmul.msk.f32.vlgmr.msra.gmra.mxu0 %vm310_vm5, %v1239_v5  ;;  %3409 = vmatmul.msk.f32.vlgmr.msra.gmra.mxu1 %vm310_vm5, %v1415_v11  ;;  %v4385_v5 = vld [vmem:[%s4916_s2 + $0x10] sm:$0xff] }
 0x1a4   : > { %1514 = vmatpush.msra.mxu0 %v3867_v26  ;;  %1652 = vmatpush.msra.mxu1 %v3818_v17 }
 0x1a6   : > { %1515 = vmatpush.msra.mxu0 %v3875_v27  ;;  %1653 = vmatpush.msra.mxu1 %v3861_v25 }
 0x1a7   : > { %3478 = vmatmul.msk.f32.gmra.mxu3 %vm265_vm4, %v3843_v23  ;;  %v1973_v23 = vpop.f32.mrf.mxu2 }
 0x1aa   : > { %v1421_v14 = vpop.f32.mrf.mxu3 }
 0x1ab   : > { %3408 = vmatmul.msk.f32.vlgmr.msrb.gmra.mxu0 %vm310_vm5, %v1418_v13  ;;  %3411 = vmatmul.msk.f32.vlgmr.msrb.gmra.mxu1 %vm310_vm5, %v1421_v14 }
 0x1ac   : > { %1629 = vmatpush.msrb.mxu0 %v3867_v26  ;;  %1722 = vmatpush.msrb.mxu1 %v3818_v17 }
 0x1ae   : > { %1630 = vmatpush.msrb.mxu0 %v3875_v27  ;;  %1723 = vmatpush.msrb.mxu1 %v3861_v25 }
 0x1af   : > { %3479 = vmatmul.msk.f32.gmra.mxu3 %vm265_vm4, %v3852_v24  ;;  %v1976_v24 = vpop.f32.mrf.mxu2 }
 0x1b2   : > { %v1424_v22 = vpop.f32.mrf.mxu3 }
 0x1b3   : > { %3410 = vmatmul.msk.f32.vlgmr.msra.gmra.mxu0 %vm310_vm5, %v1424_v22  ;;  %3418 = vmatmul.msk.f32.vlgmr.msra.gmra.mxu1 %vm310_vm5, %v1600_v7 }
 0x1b4   : > { %1699 = vmatpush.msra.mxu0 %v3867_v26  ;;  %1837 = vmatpush.msra.mxu1 %v3818_v17 }
 0x1b6   : > { %1700 = vmatpush.msra.mxu0 %v3875_v27  ;;  %1838 = vmatpush.msra.mxu1 %v3861_v25 }
 0x1b7   : > { %v1979_v20 = vpop.f32.mrf.mxu2 }
 0x1ba   : > { %v1785_v18 = vpop.f32.mrf.mxu3 }
 0x1bb   : > { %3417 = vmatmul.msk.f32.vlgmr.msrb.gmra.mxu0 %vm310_vm5, %v1603_v10  ;;  %3420 = vmatmul.msk.f32.vlgmr.msrb.gmra.mxu1 %vm310_vm5, %v1606_v12 }
 0x1bc   : > { %1814 = vmatpush.msrb.mxu0 %v3867_v26  ;;  %1907 = vmatpush.msrb.mxu1 %v3818_v17 }
 0x1be   : > { %1815 = vmatpush.msrb.mxu0 %v3875_v27  ;;  %1908 = vmatpush.msrb.mxu1 %v3861_v25 }
 0x1bf   : > { %v2340_v28 = vpop.f32.mrf.mxu2 }
 0x1c2   : > { %v1788_v19 = vpop.f32.mrf.mxu3 }
 0x1c3   : > { %3419 = vmatmul.msk.f32.vlgmr.msra.gmra.mxu0 %vm310_vm5, %v1609_v15  ;;  %3427 = vmatmul.msk.f32.vlgmr.msra.gmra.mxu1 %vm310_vm5, %v1785_v18 }
 0x1c4   : > { %1884 = vmatpush.msra.mxu0 %v3867_v26  ;;  %2022 = vmatpush.msra.mxu1 %v3818_v17 }
 0x1c6   : > { %1885 = vmatpush.msra.mxu0 %v3875_v27  ;;  %2023 = vmatpush.msra.mxu1 %v3861_v25 }
 0x1c7   : > { %v4299_v31 = vpop.f32.mrf.mxu2 }
 0x1ca   : > { %v1791_v21 = vpop.f32.mrf.mxu3 }
 0x1cb   : > { %3426 = vmatmul.msk.f32.vlgmr.msrb.gmra.mxu0 %vm310_vm5, %v1788_v19  ;;  %3429 = vmatmul.msk.f32.vlgmr.msrb.gmra.mxu1 %vm310_vm5, %v1791_v21 }
 0x1cc   : > { %1999 = vmatpush.msrb.mxu0 %v3867_v26  ;;  %2092 = vmatpush.msrb.mxu1 %v3818_v17 }
 0x1ce   : > { %2000 = vmatpush.msrb.mxu0 %v3875_v27  ;;  %2093 = vmatpush.msrb.mxu1 %v3861_v25 }
 0x1cf   : > { %v2346_v40 = vpop.f32.mrf.mxu2 }
 0x1d2   : > { %v1794_v29 = vpop.f32.mrf.mxu3 }
 0x1d3   : > { %3428 = vmatmul.msk.f32.vlgmr.msra.gmra.mxu0 %vm310_vm5, %v1794_v29  ;;  %3436 = vmatmul.msk.f32.vlgmr.msra.gmra.mxu1 %vm310_vm5, %v1970_v16 }
 0x1d4   : > { %2069 = vmatpush.msra.mxu0 %v3867_v26  ;;  %2207 = vmatpush.msra.mxu1 %v3818_v17 }
 0x1d6   : > { %2070 = vmatpush.msra.mxu0 %v3875_v27  ;;  %2208 = vmatpush.msra.mxu1 %v3861_v25 }
 0x1d7   : > { %v2349_v47 = vpop.f32.mrf.mxu2 }
 0x1d8   : > { %v730_v32 = vpop.f32.mrf.mxu1 }
 0x1da   : > { %v2155_v30 = vpop.f32.mrf.mxu3 }
 0x1db   : > { %3435 = vmatmul.msk.f32.vlgmr.msrb.gmra.mxu0 %vm310_vm5, %v1973_v23  ;;  %3438 = vmatmul.msk.f32.vlgmr.msrb.gmra.mxu1 %vm310_vm5, %v1976_v24 }
 0x1dc   : > { %2184 = vmatpush.msrb.mxu0 %v3867_v26  ;;  %2277 = vmatpush.msrb.mxu1 %v3818_v17 }
 0x1de   : > { %2185 = vmatpush.msrb.mxu0 %v3875_v27  ;;  %2278 = vmatpush.msrb.mxu1 %v3861_v25 }
 0x1df   : > { %v4359_v61 = vpop.f32.mrf.mxu2 }
 0x1e0   : > { %v707_v33 = vpop.f32.mrf.mxu0 }
 0x1e1   : > { %v731_v34 = vadd.f32 %v730_v32, %v707_v33 }
 0x1e2   : > { %v2158_v35 = vpop.f32.mrf.mxu3 }
 0x1e3   : > { %v733_v36 = vadd.f32 %v731_v34, %v4034_v8  ;;  %3437 = vmatmul.msk.f32.vlgmr.msra.gmra.mxu0 %vm310_vm5, %v1979_v20  ;;  %3445 = vmatmul.msk.f32.vlgmr.msra.gmra.mxu1 %vm310_vm5, %v2155_v30 }
 0x1e4   : > { %2254 = vmatpush.msra.mxu0 %v3867_v26  ;;  %2392 = vmatpush.msra.mxu1 %v3818_v17 }
 0x1e5   : > { %v735_v37 = vrot.slane %v733_v36, 1  ;;  %v736_v38 = vrot.slane %v733_v36, 2  ;;  %v737_v39 = vrot.slane %v733_v36, 3  ;;  %749 = vst.msk [vmem:[%s4043_s10 + $0x4] sm:$0x1] %vm378_vm6, %v733_v36  ;;  %v738_v41 = vrot.slane %v733_v36, 4 }
 0x1e6   : > { %2255 = vmatpush.msra.mxu0 %v3875_v27  ;;  %2393 = vmatpush.msra.mxu1 %v3861_v25  ;;  %v739_v42 = vrot.slane %v733_v36, 5  ;;  %v740_v43 = vrot.slane %v733_v36, 6  ;;  %v741_v44 = vrot.slane %v733_v36, 7 }
 0x1e7   : > { %750 = vst.msk [vmem:[%s4043_s10 + $0x24] sm:$0x1] %vm378_vm6, %v735_v37  ;;  %v4402_v14 = vpop.f32.mrf.mxu2 }
 0x1e8   : > { %751 = vst.msk [vmem:[%s4043_s10 + $0x44] sm:$0x1] %vm378_vm6, %v736_v38  ;;  %v800_v17 = vpop.f32.mrf.mxu1 }
 0x1e9   : > { %752 = vst.msk [vmem:[%s4043_s10 + $0x64] sm:$0x1] %vm378_vm6, %v737_v39 }
 0x1ea   : > { %753 = vst.msk [vmem:[%s4043_s10 + $0x84] sm:$0x1] %vm378_vm6, %v738_v41  ;;  %v2161_v45 = vpop.f32.mrf.mxu3 }
 0x1eb   : > { %754 = vst.msk [vmem:[%s4043_s10 + $0xa4] sm:$0x1] %vm378_vm6, %v739_v42  ;;  %3444 = vmatmul.msk.f32.vlgmr.msrb.gmra.mxu0 %vm310_vm5, %v2158_v35  ;;  %3447 = vmatmul.msk.f32.vlgmr.msrb.gmra.mxu1 %vm310_vm5, %v2161_v45 }
 0x1ec   : > { %755 = vst.msk [vmem:[%s4043_s10 + $0xc4] sm:$0x1] %vm378_vm6, %v740_v43  ;;  %2369 = vmatpush.msrb.mxu0 %v3867_v26  ;;  %2462 = vmatpush.msrb.mxu1 %v4332_v46 }
 0x1ed   : > { %756 = vst.msk [vmem:[%s4043_s10 + $0xe4] sm:$0x1] %vm378_vm6, %v741_v44 }
 0x1ee   : > { %2370 = vmatpush.msrb.mxu0 %v3875_v27  ;;  %2463 = vmatpush.msrb.mxu1 %v3861_v25 }
 0x1ef   : > { %v2716_v35 = vpop.f32.mrf.mxu2 }
 0x1f0   : > { %v777_v48 = vpop.f32.mrf.mxu0  ;;  %v915_v49 = vpop.f32.mrf.mxu1 }
 0x1f1   : > { %v801_v50 = vadd.f32 %v800_v17, %v777_v48 }
 0x1f2   : > { %v2164_v51 = vpop.f32.mrf.mxu3 }
 0x1f3   : > { %v803_v52 = vadd.f32 %v801_v50, %v4034_v8  ;;  %3446 = vmatmul.msk.f32.vlgmr.msra.gmra.mxu0 %vm310_vm5, %v2164_v51  ;;  %3454 = vmatmul.msk.f32.vlgmr.msra.gmra.mxu1 %vm310_vm5, %v2340_v28 }
 0x1f4   : > { %2439 = vmatpush.msra.mxu0 %v3867_v26  ;;  %2577 = vmatpush.msra.mxu1 %v4332_v46 }
 0x1f5   : > { %v805_v53 = vrot.slane %v803_v52, 1  ;;  %v806_v25 = vrot.slane %v803_v52, 2  ;;  %v807_v54 = vrot.slane %v803_v52, 3  ;;  %819 = vst.msk [vmem:[%s4043_s10 + $0x5] sm:$0x1] %vm378_vm6, %v803_v52  ;;  %v808_v55 = vrot.slane %v803_v52, 4 }
 0x1f6   : > { %2440 = vmatpush.msra.mxu0 %v3875_v27  ;;  %2578 = vmatpush.msra.mxu1 %v4350_v56  ;;  %v809_v26 = vrot.slane %v803_v52, 5  ;;  %v810_v57 = vrot.slane %v803_v52, 6  ;;  %v811_v60 = vrot.slane %v803_v52, 7 }
 0x1f7   : > { %820 = vst.msk [vmem:[%s4043_s10 + $0x25] sm:$0x1] %vm378_vm6, %v805_v53  ;;  %v2719_v50 = vpop.f32.mrf.mxu2 }
 0x1f8   : > { %821 = vst.msk [vmem:[%s4043_s10 + $0x45] sm:$0x1] %vm378_vm6, %v806_v25  ;;  %v892_v58 = vpop.f32.mrf.mxu0  ;;  %v985_v59 = vpop.f32.mrf.mxu1 }
 0x1f9   : > { %822 = vst.msk [vmem:[%s4043_s10 + $0x65] sm:$0x1] %vm378_vm6, %v807_v54  ;;  %v916_v27 = vadd.f32 %v915_v49, %v892_v58 }
 0x1fa   : > { %823 = vst.msk [vmem:[%s4043_s10 + $0x85] sm:$0x1] %vm378_vm6, %v808_v55  ;;  %v2525_v62 = vpop.f32.mrf.mxu3 }
 0x1fb   : > { %824 = vst.msk [vmem:[%s4043_s10 + $0xa5] sm:$0x1] %vm378_vm6, %v809_v26  ;;  %v918_v63 = vadd.f32 %v916_v27, %v4034_v8  ;;  %3453 = vmatmul.msk.f32.vlgmr.msrb.gmra.mxu0 %vm310_vm5, %v4299_v31  ;;  %3456 = vmatmul.msk.f32.vlgmr.msrb.gmra.mxu1 %vm310_vm5, %v2346_v40 }
 0x1fc   : > { %825 = vst.msk [vmem:[%s4043_s10 + $0xc5] sm:$0x1] %vm378_vm6, %v810_v57  ;;  %2554 = vmatpush.msrb.mxu0 %v4374_v0  ;;  %2647 = vmatpush.msrb.mxu1 %v4332_v46 }
 0x1fd   : > { %826 = vst.msk [vmem:[%s4043_s10 + $0xe5] sm:$0x1] %vm378_vm6, %v811_v60  ;;  %v920_v1 = vrot.slane %v918_v63, 1  ;;  %v921_v3 = vrot.slane %v918_v63, 2  ;;  %v922_v4 = vrot.slane %v918_v63, 3  ;;  %v923_v2 = vrot.slane %v918_v63, 4 }
 0x1fe   : > { %934 = vst.msk [vmem:[%s4043_s10 + $0x6] sm:$0x1] %vm378_vm6, %v918_v63  ;;  %2555 = vmatpush.msrb.mxu0 %v4385_v5  ;;  %2648 = vmatpush.msrb.mxu1 %v4350_v56  ;;  %v924_v6 = vrot.slane %v918_v63, 5  ;;  %v925_v7 = vrot.slane %v918_v63, 6  ;;  %v926_v11 = vrot.slane %v918_v63, 7 }
 0x1ff   : > { %935 = vst.msk [vmem:[%s4043_s10 + $0x26] sm:$0x1] %vm378_vm6, %v920_v1 }
 0x200   : > { %936 = vst.msk [vmem:[%s4043_s10 + $0x46] sm:$0x1] %vm378_vm6, %v921_v3  ;;  %v962_v9 = vpop.f32.mrf.mxu0  ;;  %v1100_v10 = vpop.f32.mrf.mxu1 }
 0x201   : > { %937 = vst.msk [vmem:[%s4043_s10 + $0x66] sm:$0x1] %vm378_vm6, %v922_v4  ;;  %v986_v12 = vadd.f32 %v985_v59, %v962_v9  ;;  %v3080_v4 = vpop.f32.mrf.mxu2 }
 0x202   : > { %938 = vst.msk [vmem:[%s4043_s10 + $0x86] sm:$0x1] %vm378_vm6, %v923_v2  ;;  %v2528_v13 = vpop.f32.mrf.mxu3 }
 0x203   : > { %939 = vst.msk [vmem:[%s4043_s10 + $0xa6] sm:$0x1] %vm378_vm6, %v924_v6  ;;  %v988_v15 = vadd.f32 %v986_v12, %v4034_v8  ;;  %3455 = vmatmul.msk.f32.vlgmr.msra.gmra.mxu0 %vm310_vm5, %v2349_v47  ;;  %3463 = vmatmul.msk.f32.vlgmr.msra.gmra.mxu1 %vm310_vm5, %v2525_v62 }
 0x204   : > { %940 = vst.msk [vmem:[%s4043_s10 + $0xc6] sm:$0x1] %vm378_vm6, %v925_v7  ;;  %2624 = vmatpush.msra.mxu0 %v4374_v0  ;;  %2762 = vmatpush.msra.mxu1 %v4332_v46 }
 0x205   : > { %941 = vst.msk [vmem:[%s4043_s10 + $0xe6] sm:$0x1] %vm378_vm6, %v926_v11  ;;  %v990_v16 = vrot.slane %v988_v15, 1  ;;  %v991_v22 = vrot.slane %v988_v15, 2  ;;  %v992_v23 = vrot.slane %v988_v15, 3  ;;  %v993_v18 = vrot.slane %v988_v15, 4 }
 0x206   : > { %1004 = vst.msk [vmem:[%s4043_s10 + $0x7] sm:$0x1] %vm378_vm6, %v988_v15  ;;  %2625 = vmatpush.msra.mxu0 %v4385_v5  ;;  %2763 = vmatpush.msra.mxu1 %v4350_v56  ;;  %v994_v24 = vrot.slane %v988_v15, 5  ;;  %v995_v19 = vrot.slane %v988_v15, 6  ;;  %v996_v28 = vrot.slane %v988_v15, 7 }
 0x207   : > { %1005 = vst.msk [vmem:[%s4043_s10 + $0x27] sm:$0x1] %vm378_vm6, %v990_v16 }
 0x208   : > { %1006 = vst.msk [vmem:[%s4043_s10 + $0x47] sm:$0x1] %vm378_vm6, %v991_v22  ;;  %v1077_v20 = vpop.f32.mrf.mxu0  ;;  %v1170_v21 = vpop.f32.mrf.mxu1 }
 0x209   : > { %1007 = vst.msk [vmem:[%s4043_s10 + $0x67] sm:$0x1] %vm378_vm6, %v992_v23  ;;  %v1101_v29 = vadd.f32 %v1100_v10, %v1077_v20 }
 0x20a   : > { %1008 = vst.msk [vmem:[%s4043_s10 + $0x87] sm:$0x1] %vm378_vm6, %v993_v18  ;;  %v2531_v30 = vpop.f32.mrf.mxu3 }
 0x20b   : > { %1009 = vst.msk [vmem:[%s4043_s10 + $0xa7] sm:$0x1] %vm378_vm6, %v994_v24  ;;  %v1103_v31 = vadd.f32 %v1101_v29, %v4034_v8  ;;  %3462 = vmatmul.msk.f32.vlgmr.msrb.gmra.mxu0 %vm310_vm5, %v2528_v13  ;;  %3465 = vmatmul.msk.f32.vlgmr.msrb.gmra.mxu1 %vm310_vm5, %v2531_v30  ;;  %v3083_v24 = vpop.f32.mrf.mxu2 }
 0x20c   : > { %1010 = vst.msk [vmem:[%s4043_s10 + $0xc7] sm:$0x1] %vm378_vm6, %v995_v19  ;;  %2739 = vmatpush.msrb.mxu0 %v4374_v0  ;;  %2832 = vmatpush.msrb.mxu1 %v4332_v46 }
 0x20d   : > { %1011 = vst.msk [vmem:[%s4043_s10 + $0xe7] sm:$0x1] %vm378_vm6, %v996_v28  ;;  %v1105_v32 = vrot.slane %v1103_v31, 1  ;;  %v1106_v33 = vrot.slane %v1103_v31, 2  ;;  %v1107_v34 = vrot.slane %v1103_v31, 3  ;;  %v1108_v36 = vrot.slane %v1103_v31, 4 }
 0x20e   : > { %1119 = vst.msk [vmem:[%s4043_s10 + $0x8] sm:$0x1] %vm378_vm6, %v1103_v31  ;;  %2740 = vmatpush.msrb.mxu0 %v4385_v5  ;;  %2833 = vmatpush.msrb.mxu1 %v4350_v56  ;;  %v1109_v37 = vrot.slane %v1103_v31, 5  ;;  %v1110_v38 = vrot.slane %v1103_v31, 6  ;;  %v1111_v41 = vrot.slane %v1103_v31, 7 }
 0x20f   : > { %1120 = vst.msk [vmem:[%s4043_s10 + $0x28] sm:$0x1] %vm378_vm6, %v1105_v32 }
 0x210   : > { %1121 = vst.msk [vmem:[%s4043_s10 + $0x48] sm:$0x1] %vm378_vm6, %v1106_v33  ;;  %v1147_v39 = vpop.f32.mrf.mxu0  ;;  %v1285_v40 = vpop.f32.mrf.mxu1 }
 0x211   : > { %1122 = vst.msk [vmem:[%s4043_s10 + $0x68] sm:$0x1] %vm378_vm6, %v1107_v34  ;;  %v1171_v42 = vadd.f32 %v1170_v21, %v1147_v39 }
 0x212   : > { %1123 = vst.msk [vmem:[%s4043_s10 + $0x88] sm:$0x1] %vm378_vm6, %v1108_v36  ;;  %v2534_v43 = vpop.f32.mrf.mxu3 }
 0x213   : > { %1124 = vst.msk [vmem:[%s4043_s10 + $0xa8] sm:$0x1] %vm378_vm6, %v1109_v37  ;;  %v1173_v17 = vadd.f32 %v1171_v42, %v4034_v8  ;;  %3464 = vmatmul.msk.f32.vlgmr.msra.gmra.mxu0 %vm310_vm5, %v2534_v43  ;;  %3472 = vmatmul.msk.f32.vlgmr.msra.gmra.mxu1 %vm310_vm5, %v4359_v61 }
 0x214   : > { %1125 = vst.msk [vmem:[%s4043_s10 + $0xc8] sm:$0x1] %vm378_vm6, %v1110_v38  ;;  %2809 = vmatpush.msra.mxu0 %v4374_v0  ;;  %2947 = vmatpush.msra.mxu1 %v4332_v46  ;;  %v3086_v38 = vpop.f32.mrf.mxu2 }
 0x215   : > { %1126 = vst.msk [vmem:[%s4043_s10 + $0xe8] sm:$0x1] %vm378_vm6, %v1111_v41  ;;  %v1175_v44 = vrot.slane %v1173_v17, 1  ;;  %v1176_v45 = vrot.slane %v1173_v17, 2  ;;  %v1177_v47 = vrot.slane %v1173_v17, 3  ;;  %v1178_v48 = vrot.slane %v1173_v17, 4 }
 0x216   : > { %1189 = vst.msk [vmem:[%s4043_s10 + $0x9] sm:$0x1] %vm378_vm6, %v1173_v17  ;;  %2810 = vmatpush.msra.mxu0 %v4385_v5  ;;  %2948 = vmatpush.msra.mxu1 %v4350_v56  ;;  %v1179_v49 = vrot.slane %v1173_v17, 5  ;;  %v1180_v51 = vrot.slane %v1173_v17, 6  ;;  %v1181_v25 = vrot.slane %v1173_v17, 7 }
 0x217   : > { %1190 = vst.msk [vmem:[%s4043_s10 + $0x29] sm:$0x1] %vm378_vm6, %v1175_v44 }
 0x218   : > { %1191 = vst.msk [vmem:[%s4043_s10 + $0x49] sm:$0x1] %vm378_vm6, %v1176_v45  ;;  %v1262_v52 = vpop.f32.mrf.mxu0  ;;  %v1355_v53 = vpop.f32.mrf.mxu1 }
 0x219   : > { %1192 = vst.msk [vmem:[%s4043_s10 + $0x69] sm:$0x1] %vm378_vm6, %v1177_v47  ;;  %v1286_v54 = vadd.f32 %v1285_v40, %v1262_v52 }
 0x21a   : > { %1193 = vst.msk [vmem:[%s4043_s10 + $0x89] sm:$0x1] %vm378_vm6, %v1178_v48  ;;  %v2895_v55 = vpop.f32.mrf.mxu3 }
 0x21b   : > { %1194 = vst.msk [vmem:[%s4043_s10 + $0xa9] sm:$0x1] %vm378_vm6, %v1179_v49  ;;  %v1288_v26 = vadd.f32 %v1286_v54, %v4034_v8  ;;  %3471 = vmatmul.msk.f32.vlgmr.msrb.gmra.mxu0 %vm310_vm5, %v4402_v14  ;;  %3474 = vmatmul.msk.f32.vlgmr.msrb.gmra.mxu1 %vm310_vm5, %v2716_v35 }
 0x21c   : > { %1195 = vst.msk [vmem:[%s4043_s10 + $0xc9] sm:$0x1] %vm378_vm6, %v1180_v51  ;;  %2924 = vmatpush.msrb.mxu0 %v4374_v0  ;;  %3017 = vmatpush.msrb.mxu1 %v4332_v46 }
 0x21d   : > { %1196 = vst.msk [vmem:[%s4043_s10 + $0xe9] sm:$0x1] %vm378_vm6, %v1181_v25  ;;  %v1290_v57 = vrot.slane %v1288_v26, 1  ;;  %v1291_v58 = vrot.slane %v1288_v26, 2  ;;  %v1292_v59 = vrot.slane %v1288_v26, 3  ;;  %v1293_v60 = vrot.slane %v1288_v26, 4 }
 0x21e   : > { %1304 = vst.msk [vmem:[%s4043_s10 + $0xa] sm:$0x1] %vm378_vm6, %v1288_v26  ;;  %2925 = vmatpush.msrb.mxu0 %v4385_v5  ;;  %3018 = vmatpush.msrb.mxu1 %v4350_v56  ;;  %v1294_v27 = vrot.slane %v1288_v26, 5  ;;  %v1295_v61 = vrot.slane %v1288_v26, 6  ;;  %v1296_v1 = vrot.slane %v1288_v26, 7 }
 0x21f   : > { %1305 = vst.msk [vmem:[%s4043_s10 + $0x2a] sm:$0x1] %vm378_vm6, %v1290_v57 }
 0x220   : > { %1306 = vst.msk [vmem:[%s4043_s10 + $0x4a] sm:$0x1] %vm378_vm6, %v1291_v58  ;;  %v1332_v62 = vpop.f32.mrf.mxu0  ;;  %v1470_v63 = vpop.f32.mrf.mxu1 }
 0x221   : > { %1307 = vst.msk [vmem:[%s4043_s10 + $0x6a] sm:$0x1] %vm378_vm6, %v1292_v59  ;;  %v1356_v3 = vadd.f32 %v1355_v53, %v1332_v62 }
 0x222   : > { %1308 = vst.msk [vmem:[%s4043_s10 + $0x8a] sm:$0x1] %vm378_vm6, %v1293_v60  ;;  %v2898_v2 = vpop.f32.mrf.mxu3 }
 0x223   : > { %1309 = vst.msk [vmem:[%s4043_s10 + $0xaa] sm:$0x1] %vm378_vm6, %v1294_v27  ;;  %v1358_v6 = vadd.f32 %v1356_v3, %v4034_v8  ;;  %3473 = vmatmul.msk.f32.vlgmr.msra.gmra.mxu0 %vm310_vm5, %v2719_v50  ;;  %3481 = vmatmul.msk.f32.vlgmr.msra.gmra.mxu1 %vm310_vm5, %v2895_v55  ;;  %v3089_v50 = vpop.f32.mrf.mxu2 }
 0x224   : > { %1310 = vst.msk [vmem:[%s4043_s10 + $0xca] sm:$0x1] %vm378_vm6, %v1295_v61  ;;  %2994 = vmatpush.msra.mxu0 %v4374_v0  ;;  %3132 = vmatpush.msra.mxu1 %v4332_v46 }
 0x225   : > { %1311 = vst.msk [vmem:[%s4043_s10 + $0xea] sm:$0x1] %vm378_vm6, %v1296_v1  ;;  %v1360_v7 = vrot.slane %v1358_v6, 1  ;;  %v1361_v9 = vrot.slane %v1358_v6, 2  ;;  %v1362_v10 = vrot.slane %v1358_v6, 3  ;;  %v1363_v11 = vrot.slane %v1358_v6, 4 }
 0x226   : > { %1374 = vst.msk [vmem:[%s4043_s10 + $0xb] sm:$0x1] %vm378_vm6, %v1358_v6  ;;  %2995 = vmatpush.msra.mxu0 %v4385_v5  ;;  %3133 = vmatpush.msra.mxu1 %v4350_v56  ;;  %v1364_v12 = vrot.slane %v1358_v6, 5  ;;  %v1365_v13 = vrot.slane %v1358_v6, 6  ;;  %v1366_v16 = vrot.slane %v1358_v6, 7 }
 0x227   : > { %1375 = vst.msk [vmem:[%s4043_s10 + $0x2b] sm:$0x1] %vm378_vm6, %v1360_v7 }
 0x228   : > { %1376 = vst.msk [vmem:[%s4043_s10 + $0x4b] sm:$0x1] %vm378_vm6, %v1361_v9  ;;  %v1447_v15 = vpop.f32.mrf.mxu0  ;;  %v1540_v14 = vpop.f32.mrf.mxu1 }
 0x229   : > { %1377 = vst.msk [vmem:[%s4043_s10 + $0x6b] sm:$0x1] %vm378_vm6, %v1362_v10  ;;  %v1471_v22 = vadd.f32 %v1470_v63, %v1447_v15 }
 0x22a   : > { %1378 = vst.msk [vmem:[%s4043_s10 + $0x8b] sm:$0x1] %vm378_vm6, %v1363_v11  ;;  %v2901_v23 = vpop.f32.mrf.mxu3 }
 0x22b   : > { %1379 = vst.msk [vmem:[%s4043_s10 + $0xab] sm:$0x1] %vm378_vm6, %v1364_v12  ;;  %v1473_v18 = vadd.f32 %v1471_v22, %v4034_v8  ;;  %3480 = vmatmul.msk.f32.vlgmr.msrb.gmra.mxu0 %vm310_vm5, %v2898_v2  ;;  %3483 = vmatmul.msk.f32.vlgmr.msrb.gmra.mxu1 %vm310_vm5, %v2901_v23 }
 0x22c   : > { %1380 = vst.msk [vmem:[%s4043_s10 + $0xcb] sm:$0x1] %vm378_vm6, %v1365_v13  ;;  %3109 = vmatpush.msrb.mxu0 %v4374_v0  ;;  %3202 = vmatpush.msrb.mxu1 %v4332_v46 }
 0x22d   : > { %1381 = vst.msk [vmem:[%s4043_s10 + $0xeb] sm:$0x1] %vm378_vm6, %v1366_v16  ;;  %v1475_v19 = vrot.slane %v1473_v18, 1  ;;  %v1476_v20 = vrot.slane %v1473_v18, 2  ;;  %v1477_v21 = vrot.slane %v1473_v18, 3  ;;  %v1478_v28 = vrot.slane %v1473_v18, 4 }
 0x22e   : > { %1489 = vst.msk [vmem:[%s4043_s10 + $0xc] sm:$0x1] %vm378_vm6, %v1473_v18  ;;  %3110 = vmatpush.msrb.mxu0 %v4385_v5  ;;  %3203 = vmatpush.msrb.mxu1 %v4350_v56  ;;  %v1479_v29 = vrot.slane %v1473_v18, 5  ;;  %v1480_v46 = vrot.slane %v1473_v18, 6  ;;  %v1481_v32 = vrot.slane %v1473_v18, 7 }
 0x22f   : > { %1490 = vst.msk [vmem:[%s4043_s10 + $0x2c] sm:$0x1] %vm378_vm6, %v1475_v19 }
 0x230   : > { %1491 = vst.msk [vmem:[%s4043_s10 + $0x4c] sm:$0x1] %vm378_vm6, %v1476_v20  ;;  %v1517_v30 = vpop.f32.mrf.mxu0  ;;  %v1655_v31 = vpop.f32.mrf.mxu1 }
 0x231   : > { %1492 = vst.msk [vmem:[%s4043_s10 + $0x6c] sm:$0x1] %vm378_vm6, %v1477_v21  ;;  %v1541_v33 = vadd.f32 %v1540_v14, %v1517_v30 }
 0x232   : > { %1493 = vst.msk [vmem:[%s4043_s10 + $0x8c] sm:$0x1] %vm378_vm6, %v1478_v28  ;;  %v2904_v34 = vpop.f32.mrf.mxu3 }
 0x233   : > { %1494 = vst.msk [vmem:[%s4043_s10 + $0xac] sm:$0x1] %vm378_vm6, %v1479_v29  ;;  %v1543_v56 = vadd.f32 %v1541_v33, %v4034_v8  ;;  %3482 = vmatmul.msk.f32.vlgmr.msra.gmra.mxu0 %vm310_vm5, %v2904_v34  ;;  %3490 = vmatmul.msk.f32.vlgmr.msra.gmra.mxu1 %vm310_vm5, %v3080_v4 }
 0x234   : > { %1495 = vst.msk [vmem:[%s4043_s10 + $0xcc] sm:$0x1] %vm378_vm6, %v1480_v46  ;;  %3179 = vmatpush.msra.mxu0 %v4374_v0 }
 0x235   : > { %1496 = vst.msk [vmem:[%s4043_s10 + $0xec] sm:$0x1] %vm378_vm6, %v1481_v32  ;;  %v1545_v35 = vrot.slane %v1543_v56, 1  ;;  %v1546_v36 = vrot.slane %v1543_v56, 2  ;;  %v1547_v37 = vrot.slane %v1543_v56, 3  ;;  %v1548_v39 = vrot.slane %v1543_v56, 4 }
 0x236   : > { %1559 = vst.msk [vmem:[%s4043_s10 + $0xd] sm:$0x1] %vm378_vm6, %v1543_v56  ;;  %3180 = vmatpush.msra.mxu0 %v4385_v5  ;;  %v1549_v40 = vrot.slane %v1543_v56, 5  ;;  %v1550_v0 = vrot.slane %v1543_v56, 6  ;;  %v1551_v43 = vrot.slane %v1543_v56, 7 }
 0x237   : > { %1560 = vst.msk [vmem:[%s4043_s10 + $0x2d] sm:$0x1] %vm378_vm6, %v1545_v35 }
 0x238   : > { %1561 = vst.msk [vmem:[%s4043_s10 + $0x4d] sm:$0x1] %vm378_vm6, %v1546_v36  ;;  %v1632_v41 = vpop.f32.mrf.mxu0  ;;  %v1725_v42 = vpop.f32.mrf.mxu1 }
 0x239   : > { %1562 = vst.msk [vmem:[%s4043_s10 + $0x6d] sm:$0x1] %vm378_vm6, %v1547_v37  ;;  %v1656_v17 = vadd.f32 %v1655_v31, %v1632_v41 }
 0x23a   : > { %1563 = vst.msk [vmem:[%s4043_s10 + $0x8d] sm:$0x1] %vm378_vm6, %v1548_v39 }
 0x23b   : > { %1564 = vst.msk [vmem:[%s4043_s10 + $0xad] sm:$0x1] %vm378_vm6, %v1549_v40  ;;  %v1658_v5 = vadd.f32 %v1656_v17, %v4034_v8  ;;  %3489 = vmatmul.msk.f32.vlgmr.msrb.gmra.mxu0 %vm310_vm5, %v3083_v24  ;;  %3492 = vmatmul.msk.f32.vlgmr.msrb.gmra.mxu1 %vm310_vm5, %v3086_v38 }
 0x23c   : > { %1565 = vst.msk [vmem:[%s4043_s10 + $0xcd] sm:$0x1] %vm378_vm6, %v1550_v0 }
 0x23d   : > { %1566 = vst.msk [vmem:[%s4043_s10 + $0xed] sm:$0x1] %vm378_vm6, %v1551_v43  ;;  %v1660_v44 = vrot.slane %v1658_v5, 1  ;;  %v1661_v45 = vrot.slane %v1658_v5, 2  ;;  %v1662_v47 = vrot.slane %v1658_v5, 3  ;;  %v1663_v48 = vrot.slane %v1658_v5, 4 }
 0x23e   : > { %1674 = vst.msk [vmem:[%s4043_s10 + $0xe] sm:$0x1] %vm378_vm6, %v1658_v5  ;;  %v1664_v49 = vrot.slane %v1658_v5, 5  ;;  %v1665_v51 = vrot.slane %v1658_v5, 6  ;;  %v1666_v25 = vrot.slane %v1658_v5, 7 }
 0x23f   : > { %1675 = vst.msk [vmem:[%s4043_s10 + $0x2e] sm:$0x1] %vm378_vm6, %v1660_v44 }
 0x240   : > { %1676 = vst.msk [vmem:[%s4043_s10 + $0x4e] sm:$0x1] %vm378_vm6, %v1661_v45  ;;  %v1702_v52 = vpop.f32.mrf.mxu0  ;;  %v1840_v53 = vpop.f32.mrf.mxu1 }
 0x241   : > { %1677 = vst.msk [vmem:[%s4043_s10 + $0x6e] sm:$0x1] %vm378_vm6, %v1662_v47  ;;  %v1726_v54 = vadd.f32 %v1725_v42, %v1702_v52 }
 0x242   : > { %1678 = vst.msk [vmem:[%s4043_s10 + $0x8e] sm:$0x1] %vm378_vm6, %v1663_v48 }
 0x243   : > { %1679 = vst.msk [vmem:[%s4043_s10 + $0xae] sm:$0x1] %vm378_vm6, %v1664_v49  ;;  %v1728_v55 = vadd.f32 %v1726_v54, %v4034_v8  ;;  %3491 = vmatmul.msk.f32.vlgmr.msra.gmra.mxu0 %vm310_vm5, %v3089_v50 }
 0x244   : > { %1680 = vst.msk [vmem:[%s4043_s10 + $0xce] sm:$0x1] %vm378_vm6, %v1665_v51 }
 0x245   : > { %1681 = vst.msk [vmem:[%s4043_s10 + $0xee] sm:$0x1] %vm378_vm6, %v1666_v25  ;;  %v1730_v26 = vrot.slane %v1728_v55, 1  ;;  %v1731_v57 = vrot.slane %v1728_v55, 2  ;;  %v1732_v58 = vrot.slane %v1728_v55, 3  ;;  %v1733_v59 = vrot.slane %v1728_v55, 4 }
 0x246   : > { %1744 = vst.msk [vmem:[%s4043_s10 + $0xf] sm:$0x1] %vm378_vm6, %v1728_v55  ;;  %v1734_v60 = vrot.slane %v1728_v55, 5  ;;  %v1735_v27 = vrot.slane %v1728_v55, 6  ;;  %v1736_v63 = vrot.slane %v1728_v55, 7 }
 0x247   : > { %1745 = vst.msk [vmem:[%s4043_s10 + $0x2f] sm:$0x1] %vm378_vm6, %v1730_v26 }
 0x248   : > { %1746 = vst.msk [vmem:[%s4043_s10 + $0x4f] sm:$0x1] %vm378_vm6, %v1731_v57  ;;  %v1817_v61 = vpop.f32.mrf.mxu0  ;;  %v1910_v62 = vpop.f32.mrf.mxu1 }
 0x249   : > { %1747 = vst.msk [vmem:[%s4043_s10 + $0x6f] sm:$0x1] %vm378_vm6, %v1732_v58  ;;  %v1841_v1 = vadd.f32 %v1840_v53, %v1817_v61 }
 0x24a   : > { %1748 = vst.msk [vmem:[%s4043_s10 + $0x8f] sm:$0x1] %vm378_vm6, %v1733_v59 }
 0x24b   : > { %1749 = vst.msk [vmem:[%s4043_s10 + $0xaf] sm:$0x1] %vm378_vm6, %v1734_v60  ;;  %v1843_v3 = vadd.f32 %v1841_v1, %v4034_v8 }
 0x24c   : > { %1750 = vst.msk [vmem:[%s4043_s10 + $0xcf] sm:$0x1] %vm378_vm6, %v1735_v27 }
 0x24d   : > { %1751 = vst.msk [vmem:[%s4043_s10 + $0xef] sm:$0x1] %vm378_vm6, %v1736_v63  ;;  %v1845_v4 = vrot.slane %v1843_v3, 1  ;;  %v1846_v2 = vrot.slane %v1843_v3, 2  ;;  %v1847_v6 = vrot.slane %v1843_v3, 3  ;;  %v1848_v7 = vrot.slane %v1843_v3, 4 }
 0x24e   : > { %1859 = vst.msk [vmem:[%s4043_s10 + $0x10] sm:$0x1] %vm378_vm6, %v1843_v3  ;;  %v1849_v9 = vrot.slane %v1843_v3, 5  ;;  %v1850_v10 = vrot.slane %v1843_v3, 6  ;;  %v1851_v13 = vrot.slane %v1843_v3, 7 }
 0x24f   : > { %1860 = vst.msk [vmem:[%s4043_s10 + $0x30] sm:$0x1] %vm378_vm6, %v1845_v4 }
 0x250   : > { %1861 = vst.msk [vmem:[%s4043_s10 + $0x50] sm:$0x1] %vm378_vm6, %v1846_v2  ;;  %v1887_v11 = vpop.f32.mrf.mxu0  ;;  %v2025_v12 = vpop.f32.mrf.mxu1 }
 0x251   : > { %1862 = vst.msk [vmem:[%s4043_s10 + $0x70] sm:$0x1] %vm378_vm6, %v1847_v6  ;;  %v1911_v15 = vadd.f32 %v1910_v62, %v1887_v11 }
 0x252   : > { %1863 = vst.msk [vmem:[%s4043_s10 + $0x90] sm:$0x1] %vm378_vm6, %v1848_v7 }
 0x253   : > { %1864 = vst.msk [vmem:[%s4043_s10 + $0xb0] sm:$0x1] %vm378_vm6, %v1849_v9  ;;  %v1913_v14 = vadd.f32 %v1911_v15, %v4034_v8 }
 0x254   : > { %1865 = vst.msk [vmem:[%s4043_s10 + $0xd0] sm:$0x1] %vm378_vm6, %v1850_v10 }
 0x255   : > { %1866 = vst.msk [vmem:[%s4043_s10 + $0xf0] sm:$0x1] %vm378_vm6, %v1851_v13  ;;  %v1915_v16 = vrot.slane %v1913_v14, 1  ;;  %v1916_v22 = vrot.slane %v1913_v14, 2  ;;  %v1917_v23 = vrot.slane %v1913_v14, 3  ;;  %v1918_v18 = vrot.slane %v1913_v14, 4 }
 0x256   : > { %1929 = vst.msk [vmem:[%s4043_s10 + $0x11] sm:$0x1] %vm378_vm6, %v1913_v14  ;;  %v1919_v24 = vrot.slane %v1913_v14, 5  ;;  %v1920_v19 = vrot.slane %v1913_v14, 6  ;;  %v1921_v28 = vrot.slane %v1913_v14, 7 }
 0x257   : > { %1930 = vst.msk [vmem:[%s4043_s10 + $0x31] sm:$0x1] %vm378_vm6, %v1915_v16 }
 0x258   : > { %1931 = vst.msk [vmem:[%s4043_s10 + $0x51] sm:$0x1] %vm378_vm6, %v1916_v22  ;;  %v2002_v20 = vpop.f32.mrf.mxu0  ;;  %v2095_v21 = vpop.f32.mrf.mxu1 }
 0x259   : > { %1932 = vst.msk [vmem:[%s4043_s10 + $0x71] sm:$0x1] %vm378_vm6, %v1917_v23  ;;  %v2026_v29 = vadd.f32 %v2025_v12, %v2002_v20 }
 0x25a   : > { %1933 = vst.msk [vmem:[%s4043_s10 + $0x91] sm:$0x1] %vm378_vm6, %v1918_v18 }
 0x25b   : > { %1934 = vst.msk [vmem:[%s4043_s10 + $0xb1] sm:$0x1] %vm378_vm6, %v1919_v24  ;;  %v2028_v46 = vadd.f32 %v2026_v29, %v4034_v8 }
 0x25c   : > { %1935 = vst.msk [vmem:[%s4043_s10 + $0xd1] sm:$0x1] %vm378_vm6, %v1920_v19 }
 0x25d   : > { %1936 = vst.msk [vmem:[%s4043_s10 + $0xf1] sm:$0x1] %vm378_vm6, %v1921_v28  ;;  %v2030_v30 = vrot.slane %v2028_v46, 1  ;;  %v2031_v31 = vrot.slane %v2028_v46, 2  ;;  %v2032_v32 = vrot.slane %v2028_v46, 3  ;;  %v2033_v33 = vrot.slane %v2028_v46, 4 }
 0x25e   : > { %2044 = vst.msk [vmem:[%s4043_s10 + $0x12] sm:$0x1] %vm378_vm6, %v2028_v46  ;;  %v2034_v34 = vrot.slane %v2028_v46, 5  ;;  %v2035_v56 = vrot.slane %v2028_v46, 6  ;;  %v2036_v37 = vrot.slane %v2028_v46, 7 }
 0x25f   : > { %2045 = vst.msk [vmem:[%s4043_s10 + $0x32] sm:$0x1] %vm378_vm6, %v2030_v30 }
 0x260   : > { %2046 = vst.msk [vmem:[%s4043_s10 + $0x52] sm:$0x1] %vm378_vm6, %v2031_v31  ;;  %v2072_v35 = vpop.f32.mrf.mxu0  ;;  %v2210_v36 = vpop.f32.mrf.mxu1 }
 0x261   : > { %2047 = vst.msk [vmem:[%s4043_s10 + $0x72] sm:$0x1] %vm378_vm6, %v2032_v32  ;;  %v2096_v38 = vadd.f32 %v2095_v21, %v2072_v35 }
 0x262   : > { %2048 = vst.msk [vmem:[%s4043_s10 + $0x92] sm:$0x1] %vm378_vm6, %v2033_v33 }
 0x263   : > { %2049 = vst.msk [vmem:[%s4043_s10 + $0xb2] sm:$0x1] %vm378_vm6, %v2034_v34  ;;  %v2098_v39 = vadd.f32 %v2096_v38, %v4034_v8 }
 0x264   : > { %2050 = vst.msk [vmem:[%s4043_s10 + $0xd2] sm:$0x1] %vm378_vm6, %v2035_v56 }
 0x265   : > { %2051 = vst.msk [vmem:[%s4043_s10 + $0xf2] sm:$0x1] %vm378_vm6, %v2036_v37  ;;  %v2100_v40 = vrot.slane %v2098_v39, 1  ;;  %v2101_v0 = vrot.slane %v2098_v39, 2  ;;  %v2102_v41 = vrot.slane %v2098_v39, 3  ;;  %v2103_v42 = vrot.slane %v2098_v39, 4 }
 0x266   : > { %2114 = vst.msk [vmem:[%s4043_s10 + $0x13] sm:$0x1] %vm378_vm6, %v2098_v39  ;;  %v2104_v43 = vrot.slane %v2098_v39, 5  ;;  %v2105_v17 = vrot.slane %v2098_v39, 6  ;;  %v2106_v45 = vrot.slane %v2098_v39, 7 }
 0x267   : > { %2115 = vst.msk [vmem:[%s4043_s10 + $0x33] sm:$0x1] %vm378_vm6, %v2100_v40 }
 0x268   : > { %2116 = vst.msk [vmem:[%s4043_s10 + $0x53] sm:$0x1] %vm378_vm6, %v2101_v0  ;;  %v2187_v5 = vpop.f32.mrf.mxu0  ;;  %v2280_v44 = vpop.f32.mrf.mxu1 }
 0x269   : > { %2117 = vst.msk [vmem:[%s4043_s10 + $0x73] sm:$0x1] %vm378_vm6, %v2102_v41  ;;  %v2211_v47 = vadd.f32 %v2210_v36, %v2187_v5 }
 0x26a   : > { %2118 = vst.msk [vmem:[%s4043_s10 + $0x93] sm:$0x1] %vm378_vm6, %v2103_v42 }
 0x26b   : > { %2119 = vst.msk [vmem:[%s4043_s10 + $0xb3] sm:$0x1] %vm378_vm6, %v2104_v43  ;;  %v2213_v48 = vadd.f32 %v2211_v47, %v4034_v8 }
 0x26c   : > { %2120 = vst.msk [vmem:[%s4043_s10 + $0xd3] sm:$0x1] %vm378_vm6, %v2105_v17 }
 0x26d   : > { %2121 = vst.msk [vmem:[%s4043_s10 + $0xf3] sm:$0x1] %vm378_vm6, %v2106_v45  ;;  %v2215_v49 = vrot.slane %v2213_v48, 1  ;;  %v2216_v50 = vrot.slane %v2213_v48, 2  ;;  %v2217_v51 = vrot.slane %v2213_v48, 3  ;;  %v2218_v52 = vrot.slane %v2213_v48, 4 }
 0x26e   : > { %2229 = vst.msk [vmem:[%s4043_s10 + $0x14] sm:$0x1] %vm378_vm6, %v2213_v48  ;;  %v2219_v53 = vrot.slane %v2213_v48, 5  ;;  %v2220_v25 = vrot.slane %v2213_v48, 6  ;;  %v2221_v26 = vrot.slane %v2213_v48, 7 }
 0x26f   : > { %2230 = vst.msk [vmem:[%s4043_s10 + $0x34] sm:$0x1] %vm378_vm6, %v2215_v49 }
 0x270   : > { %2231 = vst.msk [vmem:[%s4043_s10 + $0x54] sm:$0x1] %vm378_vm6, %v2216_v50  ;;  %v2257_v54 = vpop.f32.mrf.mxu0  ;;  %v2395_v55 = vpop.f32.mrf.mxu1 }
 0x271   : > { %2232 = vst.msk [vmem:[%s4043_s10 + $0x74] sm:$0x1] %vm378_vm6, %v2217_v51  ;;  %v2281_v57 = vadd.f32 %v2280_v44, %v2257_v54 }
 0x272   : > { %2233 = vst.msk [vmem:[%s4043_s10 + $0x94] sm:$0x1] %vm378_vm6, %v2218_v52 }
 0x273   : > { %2234 = vst.msk [vmem:[%s4043_s10 + $0xb4] sm:$0x1] %vm378_vm6, %v2219_v53  ;;  %v2283_v58 = vadd.f32 %v2281_v57, %v4034_v8 }
 0x274   : > { %2235 = vst.msk [vmem:[%s4043_s10 + $0xd4] sm:$0x1] %vm378_vm6, %v2220_v25 }
 0x275   : > { %2236 = vst.msk [vmem:[%s4043_s10 + $0xf4] sm:$0x1] %vm378_vm6, %v2221_v26  ;;  %v2285_v59 = vrot.slane %v2283_v58, 1  ;;  %v2286_v60 = vrot.slane %v2283_v58, 2  ;;  %v2287_v27 = vrot.slane %v2283_v58, 3  ;;  %v2288_v61 = vrot.slane %v2283_v58, 4 }
 0x276   : > { %2299 = vst.msk [vmem:[%s4043_s10 + $0x15] sm:$0x1] %vm378_vm6, %v2283_v58  ;;  %v2289_v62 = vrot.slane %v2283_v58, 5  ;;  %v2290_v63 = vrot.slane %v2283_v58, 6  ;;  %v2291_v4 = vrot.slane %v2283_v58, 7 }
 0x277   : > { %2300 = vst.msk [vmem:[%s4043_s10 + $0x35] sm:$0x1] %vm378_vm6, %v2285_v59 }
 0x278   : > { %2301 = vst.msk [vmem:[%s4043_s10 + $0x55] sm:$0x1] %vm378_vm6, %v2286_v60  ;;  %v2372_v1 = vpop.f32.mrf.mxu0  ;;  %v2465_v3 = vpop.f32.mrf.mxu1 }
 0x279   : > { %2302 = vst.msk [vmem:[%s4043_s10 + $0x75] sm:$0x1] %vm378_vm6, %v2287_v27  ;;  %v2396_v2 = vadd.f32 %v2395_v55, %v2372_v1 }
 0x27a   : > { %2303 = vst.msk [vmem:[%s4043_s10 + $0x95] sm:$0x1] %vm378_vm6, %v2288_v61 }
 0x27b   : > { %2304 = vst.msk [vmem:[%s4043_s10 + $0xb5] sm:$0x1] %vm378_vm6, %v2289_v62  ;;  %v2398_v6 = vadd.f32 %v2396_v2, %v4034_v8 }
 0x27c   : > { %2305 = vst.msk [vmem:[%s4043_s10 + $0xd5] sm:$0x1] %vm378_vm6, %v2290_v63 }
 0x27d   : > { %2306 = vst.msk [vmem:[%s4043_s10 + $0xf5] sm:$0x1] %vm378_vm6, %v2291_v4  ;;  %v2400_v7 = vrot.slane %v2398_v6, 1  ;;  %v2401_v9 = vrot.slane %v2398_v6, 2  ;;  %v2402_v10 = vrot.slane %v2398_v6, 3  ;;  %v2403_v11 = vrot.slane %v2398_v6, 4 }
 0x27e   : > { %2414 = vst.msk [vmem:[%s4043_s10 + $0x16] sm:$0x1] %vm378_vm6, %v2398_v6  ;;  %v2404_v12 = vrot.slane %v2398_v6, 5  ;;  %v2405_v13 = vrot.slane %v2398_v6, 6  ;;  %v2406_v16 = vrot.slane %v2398_v6, 7 }
 0x27f   : > { %2415 = vst.msk [vmem:[%s4043_s10 + $0x36] sm:$0x1] %vm378_vm6, %v2400_v7 }
 0x280   : > { %2416 = vst.msk [vmem:[%s4043_s10 + $0x56] sm:$0x1] %vm378_vm6, %v2401_v9  ;;  %v2442_v15 = vpop.f32.mrf.mxu0  ;;  %v2580_v14 = vpop.f32.mrf.mxu1 }
 0x281   : > { %2417 = vst.msk [vmem:[%s4043_s10 + $0x76] sm:$0x1] %vm378_vm6, %v2402_v10  ;;  %v2466_v22 = vadd.f32 %v2465_v3, %v2442_v15 }
 0x282   : > { %2418 = vst.msk [vmem:[%s4043_s10 + $0x96] sm:$0x1] %vm378_vm6, %v2403_v11 }
 0x283   : > { %2419 = vst.msk [vmem:[%s4043_s10 + $0xb6] sm:$0x1] %vm378_vm6, %v2404_v12  ;;  %v2468_v23 = vadd.f32 %v2466_v22, %v4034_v8 }
 0x284   : > { %2420 = vst.msk [vmem:[%s4043_s10 + $0xd6] sm:$0x1] %vm378_vm6, %v2405_v13 }
 0x285   : > { %2421 = vst.msk [vmem:[%s4043_s10 + $0xf6] sm:$0x1] %vm378_vm6, %v2406_v16  ;;  %v2470_v18 = vrot.slane %v2468_v23, 1  ;;  %v2471_v24 = vrot.slane %v2468_v23, 2  ;;  %v2472_v19 = vrot.slane %v2468_v23, 3  ;;  %v2473_v20 = vrot.slane %v2468_v23, 4 }
 0x286   : > { %2484 = vst.msk [vmem:[%s4043_s10 + $0x17] sm:$0x1] %vm378_vm6, %v2468_v23  ;;  %v2474_v21 = vrot.slane %v2468_v23, 5  ;;  %v2475_v28 = vrot.slane %v2468_v23, 6  ;;  %v2476_v30 = vrot.slane %v2468_v23, 7 }
 0x287   : > { %2485 = vst.msk [vmem:[%s4043_s10 + $0x37] sm:$0x1] %vm378_vm6, %v2470_v18 }
 0x288   : > { %2486 = vst.msk [vmem:[%s4043_s10 + $0x57] sm:$0x1] %vm378_vm6, %v2471_v24  ;;  %v2557_v29 = vpop.f32.mrf.mxu0  ;;  %v2650_v46 = vpop.f32.mrf.mxu1 }
 0x289   : > { %2487 = vst.msk [vmem:[%s4043_s10 + $0x77] sm:$0x1] %vm378_vm6, %v2472_v19  ;;  %v2581_v31 = vadd.f32 %v2580_v14, %v2557_v29 }
 0x28a   : > { %2488 = vst.msk [vmem:[%s4043_s10 + $0x97] sm:$0x1] %vm378_vm6, %v2473_v20 }
 0x28b   : > { %2489 = vst.msk [vmem:[%s4043_s10 + $0xb7] sm:$0x1] %vm378_vm6, %v2474_v21  ;;  %v2583_v32 = vadd.f32 %v2581_v31, %v4034_v8 }
 0x28c   : > { %2490 = vst.msk [vmem:[%s4043_s10 + $0xd7] sm:$0x1] %vm378_vm6, %v2475_v28 }
 0x28d   : > { %2491 = vst.msk [vmem:[%s4043_s10 + $0xf7] sm:$0x1] %vm378_vm6, %v2476_v30  ;;  %v2585_v33 = vrot.slane %v2583_v32, 1  ;;  %v2586_v34 = vrot.slane %v2583_v32, 2  ;;  %v2587_v56 = vrot.slane %v2583_v32, 3  ;;  %v2588_v35 = vrot.slane %v2583_v32, 4 }
 0x28e   : > { %2599 = vst.msk [vmem:[%s4043_s10 + $0x18] sm:$0x1] %vm378_vm6, %v2583_v32  ;;  %v2589_v36 = vrot.slane %v2583_v32, 5  ;;  %v2590_v37 = vrot.slane %v2583_v32, 6  ;;  %v2591_v40 = vrot.slane %v2583_v32, 7 }
 0x28f   : > { %2600 = vst.msk [vmem:[%s4043_s10 + $0x38] sm:$0x1] %vm378_vm6, %v2585_v33 }
 0x290   : > { %2601 = vst.msk [vmem:[%s4043_s10 + $0x58] sm:$0x1] %vm378_vm6, %v2586_v34  ;;  %v2627_v38 = vpop.f32.mrf.mxu0  ;;  %v2765_v39 = vpop.f32.mrf.mxu1 }
 0x291   : > { %2602 = vst.msk [vmem:[%s4043_s10 + $0x78] sm:$0x1] %vm378_vm6, %v2587_v56  ;;  %v2651_v0 = vadd.f32 %v2650_v46, %v2627_v38 }
 0x292   : > { %2603 = vst.msk [vmem:[%s4043_s10 + $0x98] sm:$0x1] %vm378_vm6, %v2588_v35 }
 0x293   : > { %2604 = vst.msk [vmem:[%s4043_s10 + $0xb8] sm:$0x1] %vm378_vm6, %v2589_v36  ;;  %v2653_v41 = vadd.f32 %v2651_v0, %v4034_v8 }
 0x294   : > { %2605 = vst.msk [vmem:[%s4043_s10 + $0xd8] sm:$0x1] %vm378_vm6, %v2590_v37 }
 0x295   : > { %2606 = vst.msk [vmem:[%s4043_s10 + $0xf8] sm:$0x1] %vm378_vm6, %v2591_v40  ;;  %v2655_v42 = vrot.slane %v2653_v41, 1  ;;  %v2656_v43 = vrot.slane %v2653_v41, 2  ;;  %v2657_v17 = vrot.slane %v2653_v41, 3  ;;  %v2658_v5 = vrot.slane %v2653_v41, 4 }
 0x296   : > { %2669 = vst.msk [vmem:[%s4043_s10 + $0x19] sm:$0x1] %vm378_vm6, %v2653_v41  ;;  %v2659_v44 = vrot.slane %v2653_v41, 5  ;;  %v2660_v45 = vrot.slane %v2653_v41, 6  ;;  %v2661_v49 = vrot.slane %v2653_v41, 7 }
 0x297   : > { %2670 = vst.msk [vmem:[%s4043_s10 + $0x39] sm:$0x1] %vm378_vm6, %v2655_v42 }
 0x298   : > { %2671 = vst.msk [vmem:[%s4043_s10 + $0x59] sm:$0x1] %vm378_vm6, %v2656_v43  ;;  %v2742_v47 = vpop.f32.mrf.mxu0  ;;  %v2835_v48 = vpop.f32.mrf.mxu1 }
 0x299   : > { %2672 = vst.msk [vmem:[%s4043_s10 + $0x79] sm:$0x1] %vm378_vm6, %v2657_v17  ;;  %v2766_v50 = vadd.f32 %v2765_v39, %v2742_v47 }
 0x29a   : > { %2673 = vst.msk [vmem:[%s4043_s10 + $0x99] sm:$0x1] %vm378_vm6, %v2658_v5 }
 0x29b   : > { %2674 = vst.msk [vmem:[%s4043_s10 + $0xb9] sm:$0x1] %vm378_vm6, %v2659_v44  ;;  %v2768_v51 = vadd.f32 %v2766_v50, %v4034_v8 }
 0x29c   : > { %2675 = vst.msk [vmem:[%s4043_s10 + $0xd9] sm:$0x1] %vm378_vm6, %v2660_v45 }
 0x29d   : > { %2676 = vst.msk [vmem:[%s4043_s10 + $0xf9] sm:$0x1] %vm378_vm6, %v2661_v49  ;;  %v2770_v52 = vrot.slane %v2768_v51, 1  ;;  %v2771_v53 = vrot.slane %v2768_v51, 2  ;;  %v2772_v25 = vrot.slane %v2768_v51, 3  ;;  %v2773_v54 = vrot.slane %v2768_v51, 4 }
 0x29e   : > { %2784 = vst.msk [vmem:[%s4043_s10 + $0x1a] sm:$0x1] %vm378_vm6, %v2768_v51  ;;  %v2774_v55 = vrot.slane %v2768_v51, 5  ;;  %v2775_v26 = vrot.slane %v2768_v51, 6  ;;  %v2776_v58 = vrot.slane %v2768_v51, 7 }
 0x29f   : > { %2785 = vst.msk [vmem:[%s4043_s10 + $0x3a] sm:$0x1] %vm378_vm6, %v2770_v52 }
 0x2a0   : > { %2786 = vst.msk [vmem:[%s4043_s10 + $0x5a] sm:$0x1] %vm378_vm6, %v2771_v53  ;;  %v2812_v57 = vpop.f32.mrf.mxu0  ;;  %v2950_v60 = vpop.f32.mrf.mxu1 }
 0x2a1   : > { %2787 = vst.msk [vmem:[%s4043_s10 + $0x7a] sm:$0x1] %vm378_vm6, %v2772_v25  ;;  %v2836_v59 = vadd.f32 %v2835_v48, %v2812_v57 }
 0x2a2   : > { %2788 = vst.msk [vmem:[%s4043_s10 + $0x9a] sm:$0x1] %vm378_vm6, %v2773_v54 }
 0x2a3   : > { %2789 = vst.msk [vmem:[%s4043_s10 + $0xba] sm:$0x1] %vm378_vm6, %v2774_v55  ;;  %v2838_v27 = vadd.f32 %v2836_v59, %v4034_v8 }
 0x2a4   : > { %2790 = vst.msk [vmem:[%s4043_s10 + $0xda] sm:$0x1] %vm378_vm6, %v2775_v26 }
 0x2a5   : > { %2791 = vst.msk [vmem:[%s4043_s10 + $0xfa] sm:$0x1] %vm378_vm6, %v2776_v58  ;;  %v2840_v61 = vrot.slane %v2838_v27, 1  ;;  %v2841_v62 = vrot.slane %v2838_v27, 2  ;;  %v2842_v63 = vrot.slane %v2838_v27, 3  ;;  %v2843_v1 = vrot.slane %v2838_v27, 4 }
 0x2a6   : > { %2854 = vst.msk [vmem:[%s4043_s10 + $0x1b] sm:$0x1] %vm378_vm6, %v2838_v27  ;;  %v2844_v3 = vrot.slane %v2838_v27, 5  ;;  %v2845_v4 = vrot.slane %v2838_v27, 6  ;;  %v2846_v6 = vrot.slane %v2838_v27, 7 }
 0x2a7   : > { %2855 = vst.msk [vmem:[%s4043_s10 + $0x3b] sm:$0x1] %vm378_vm6, %v2840_v61 }
 0x2a8   : > { %2856 = vst.msk [vmem:[%s4043_s10 + $0x5b] sm:$0x1] %vm378_vm6, %v2841_v62  ;;  %v2927_v2 = vpop.f32.mrf.mxu0  ;;  %v3020_v10 = vpop.f32.mrf.mxu1 }
 0x2a9   : > { %2857 = vst.msk [vmem:[%s4043_s10 + $0x7b] sm:$0x1] %vm378_vm6, %v2842_v63  ;;  %v2951_v7 = vadd.f32 %v2950_v60, %v2927_v2 }
 0x2aa   : > { %2858 = vst.msk [vmem:[%s4043_s10 + $0x9b] sm:$0x1] %vm378_vm6, %v2843_v1 }
 0x2ab   : > { %2859 = vst.msk [vmem:[%s4043_s10 + $0xbb] sm:$0x1] %vm378_vm6, %v2844_v3  ;;  %v2953_v9 = vadd.f32 %v2951_v7, %v4034_v8 }
 0x2ac   : > { %2860 = vst.msk [vmem:[%s4043_s10 + $0xdb] sm:$0x1] %vm378_vm6, %v2845_v4 }
 0x2ad   : > { %2861 = vst.msk [vmem:[%s4043_s10 + $0xfb] sm:$0x1] %vm378_vm6, %v2846_v6  ;;  %v2955_v11 = vrot.slane %v2953_v9, 1  ;;  %v2956_v12 = vrot.slane %v2953_v9, 2  ;;  %v2957_v13 = vrot.slane %v2953_v9, 3  ;;  %v2958_v15 = vrot.slane %v2953_v9, 4 }
 0x2ae   : > { %2969 = vst.msk [vmem:[%s4043_s10 + $0x1c] sm:$0x1] %vm378_vm6, %v2953_v9  ;;  %v2959_v14 = vrot.slane %v2953_v9, 5  ;;  %v2960_v16 = vrot.slane %v2953_v9, 6  ;;  %v2961_v23 = vrot.slane %v2953_v9, 7 }
 0x2af   : > { %2970 = vst.msk [vmem:[%s4043_s10 + $0x3c] sm:$0x1] %vm378_vm6, %v2955_v11 }
 0x2b0   : > { %2971 = vst.msk [vmem:[%s4043_s10 + $0x5c] sm:$0x1] %vm378_vm6, %v2956_v12  ;;  %v2997_v22 = vpop.f32.mrf.mxu0  ;;  %v3135_v29 = vpop.f32.mrf.mxu1 }
 0x2b1   : > { %2972 = vst.msk [vmem:[%s4043_s10 + $0x7c] sm:$0x1] %vm378_vm6, %v2957_v13  ;;  %v3021_v18 = vadd.f32 %v3020_v10, %v2997_v22 }
 0x2b2   : > { %2973 = vst.msk [vmem:[%s4043_s10 + $0x9c] sm:$0x1] %vm378_vm6, %v2958_v15 }
 0x2b3   : > { %2974 = vst.msk [vmem:[%s4043_s10 + $0xbc] sm:$0x1] %vm378_vm6, %v2959_v14  ;;  %v3023_v24 = vadd.f32 %v3021_v18, %v4034_v8 }
 0x2b4   : > { %2975 = vst.msk [vmem:[%s4043_s10 + $0xdc] sm:$0x1] %vm378_vm6, %v2960_v16 }
 0x2b5   : > { %2976 = vst.msk [vmem:[%s4043_s10 + $0xfc] sm:$0x1] %vm378_vm6, %v2961_v23  ;;  %v3025_v19 = vrot.slane %v3023_v24, 1  ;;  %v3026_v20 = vrot.slane %v3023_v24, 2  ;;  %v3027_v21 = vrot.slane %v3023_v24, 3  ;;  %v3028_v28 = vrot.slane %v3023_v24, 4 }
 0x2b6   : > { %3039 = vst.msk [vmem:[%s4043_s10 + $0x1d] sm:$0x1] %vm378_vm6, %v3023_v24  ;;  %v3029_v46 = vrot.slane %v3023_v24, 5  ;;  %v3030_v30 = vrot.slane %v3023_v24, 6  ;;  %v3031_v32 = vrot.slane %v3023_v24, 7 }
 0x2b7   : > { %3040 = vst.msk [vmem:[%s4043_s10 + $0x3d] sm:$0x1] %vm378_vm6, %v3025_v19 }
 0x2b8   : > { %3041 = vst.msk [vmem:[%s4043_s10 + $0x5d] sm:$0x1] %vm378_vm6, %v3026_v20  ;;  %v3112_v31 = vpop.f32.mrf.mxu0  ;;  %v3205_v40 = vpop.f32.mrf.mxu1 }
 0x2b9   : > { %3042 = vst.msk [vmem:[%s4043_s10 + $0x7d] sm:$0x1] %vm378_vm6, %v3027_v21  ;;  %v3136_v33 = vadd.f32 %v3135_v29, %v3112_v31 }
 0x2ba   : > { %3043 = vst.msk [vmem:[%s4043_s10 + $0x9d] sm:$0x1] %vm378_vm6, %v3028_v28 }
 0x2bb   : > { %3044 = vst.msk [vmem:[%s4043_s10 + $0xbd] sm:$0x1] %vm378_vm6, %v3029_v46  ;;  %v3138_v34 = vadd.f32 %v3136_v33, %v4034_v8 }
 0x2bc   : > { %3045 = vst.msk [vmem:[%s4043_s10 + $0xdd] sm:$0x1] %vm378_vm6, %v3030_v30 }
 0x2bd   : > { %3046 = vst.msk [vmem:[%s4043_s10 + $0xfd] sm:$0x1] %vm378_vm6, %v3031_v32  ;;  %v3140_v56 = vrot.slane %v3138_v34, 1  ;;  %v3141_v35 = vrot.slane %v3138_v34, 2  ;;  %v3142_v36 = vrot.slane %v3138_v34, 3  ;;  %v3143_v37 = vrot.slane %v3138_v34, 4 }
 0x2be   : > { %3154 = vst.msk [vmem:[%s4043_s10 + $0x1e] sm:$0x1] %vm378_vm6, %v3138_v34  ;;  %v3144_v38 = vrot.slane %v3138_v34, 5  ;;  %v3145_v39 = vrot.slane %v3138_v34, 6  ;;  %v3146_v41 = vrot.slane %v3138_v34, 7 }
 0x2bf   : > { %3155 = vst.msk [vmem:[%s4043_s10 + $0x3e] sm:$0x1] %vm378_vm6, %v3140_v56 }
 0x2c0   : > { %3156 = vst.msk [vmem:[%s4043_s10 + $0x5e] sm:$0x1] %vm378_vm6, %v3141_v35  ;;  %v3182_v0 = vpop.f32.mrf.mxu0 }
 0x2c1   : > { %3157 = vst.msk [vmem:[%s4043_s10 + $0x7e] sm:$0x1] %vm378_vm6, %v3142_v36  ;;  %v3206_v42 = vadd.f32 %v3205_v40, %v3182_v0 }
 0x2c2   : > { %3158 = vst.msk [vmem:[%s4043_s10 + $0x9e] sm:$0x1] %vm378_vm6, %v3143_v37 }
 0x2c3   : > { %3159 = vst.msk [vmem:[%s4043_s10 + $0xbe] sm:$0x1] %vm378_vm6, %v3144_v38  ;;  %v3208_v43 = vadd.f32 %v3206_v42, %v4034_v8 }
 0x2c4   : > { %3160 = vst.msk [vmem:[%s4043_s10 + $0xde] sm:$0x1] %vm378_vm6, %v3145_v39 }
 0x2c5   : > { %3161 = vst.msk [vmem:[%s4043_s10 + $0xfe] sm:$0x1] %vm378_vm6, %v3146_v41  ;;  %v3210_v17 = vrot.slane %v3208_v43, 1  ;;  %v3211_v5 = vrot.slane %v3208_v43, 2  ;;  %v3212_v44 = vrot.slane %v3208_v43, 3  ;;  %v3213_v45 = vrot.slane %v3208_v43, 4 }
 0x2c6   : > { %3224 = vst.msk [vmem:[%s4043_s10 + $0x1f] sm:$0x1] %vm378_vm6, %v3208_v43  ;;  %v3214_v8 = vrot.slane %v3208_v43, 5  ;;  %v3215_v47 = vrot.slane %v3208_v43, 6  ;;  %v3216_v48 = vrot.slane %v3208_v43, 7 }
 0x2c7   : > { %3225 = vst.msk [vmem:[%s4043_s10 + $0x3f] sm:$0x1] %vm378_vm6, %v3210_v17 }
 0x2c8   : > { %3226 = vst.msk [vmem:[%s4043_s10 + $0x5f] sm:$0x1] %vm378_vm6, %v3211_v5 }
 0x2c9   : > { %3227 = vst.msk [vmem:[%s4043_s10 + $0x7f] sm:$0x1] %vm378_vm6, %v3212_v44 }
 0x2ca   : > { %3228 = vst.msk [vmem:[%s4043_s10 + $0x9f] sm:$0x1] %vm378_vm6, %v3213_v45 }
 0x2cb   : > { %3229 = vst.msk [vmem:[%s4043_s10 + $0xbf] sm:$0x1] %vm378_vm6, %v3214_v8 }
 0x2cc   : > { %3230 = vst.msk [vmem:[%s4043_s10 + $0xdf] sm:$0x1] %vm378_vm6, %v3215_v47 }
 0x2cd   : > { %3231 = vst.msk [vmem:[%s4043_s10 + $0xff] sm:$0x1] %vm378_vm6, %v3216_v48 }
 0x2ce   : > { %3629 = shalt.err (!%p3626_p13)
}
 0x2cf   : > { %s3689_s24 = smov 128   ;;  %s3690_s10 = smov 8  }
 0x2d0   : > { %3502 = dma.vmem_to_hbm [thread:$0]  (%p3767_p9), %s3248_s18, 4096, %s3250_s8, %s3233_s9, %s3689_s24, %s3689_s24, %s3690_s10  }
 0x2d1 PF: > { %s3264_s26 = sand.u32 1, %s3664_s15   ;;  %p3509_p0 = pnand %p3340_p12, %p3774_p11 }
 0x2d2   : > { %s3265_s6 = scalar_lea.sflag [#allocation4], %s3264_s26 }
 0x2d3   : > { %p3510_p1 = pneg %p3509_p0 }
 0x2d5   : > { %3659 = dma.done.wait (%p3510_p1), %s3265_s6, 4096  }
 0x2d6   : > { %3661 = vsyncadd (%p3510_p1), %s3265_s6, 4294963200  ;;  %s20_s20 = sadd.s32 1, %s3684_s20   ;;  %s4923_s15 = smov %s3668_s16 }
 0x2d7   : > { %p17_p2 = scmp.ge.s32.totalorder %s20_s20, 4   ;;  %s4924_s16 = smov %s3672_s17 }
 0x2d8   : > { %s4925_s17 = smov %s3772_s29  ;;  %s4926_s18 = smov %s3680_s19 }
 0x2d9   : > { %s4927_s19 = smov %s4929_s23  ;;  %19 = sbr.rel (!%p17_p2) target bundleno = 6 (0x6), region = 82 }
 0x2de   :  { %3271 = vsyncpa [#allocation3], 1 }
 0x2df   :  { %3273 = vsyncpa [#allocation3 + $0x1], 1 }
 0x2e0   :  { %3274 = vsyncpa [#allocation4], 1 }
 0x2e1   :  { %3276 = vsyncpa [#allocation4 + $0x1], 1 }

</bundles_post_ra>
